<compile_context>
chip_gen: v5e
topology: v5e:2x2
jax: 0.10.0
libtpu: 0.0.40
codegen_flags: <defaults>
</compile_context>

<pallas_src>
import functools

import jax
import jax.numpy as jnp
from jax.experimental import pallas as pl
from jax.experimental.pallas import tpu as pltpu


def _conv_bn_relu_kernel(x_ref, w_ref, scale_ref, bias_ref, o_ref):
    """Fused conv3x3 + BN(eval) + ReLU for one batch tile.

    x_ref:     (NB, H+2, W+2, Cin)   zero-padded NHWC input tile
    w_ref:     (9*Cin, Cout)         im2col-ordered weights (kh, kw, cin major->minor)
    scale_ref: (1, Cout)             folded BN scale
    bias_ref:  (1, Cout)             folded BN shift (includes conv bias)
    o_ref:     (NB, H, W, Cout)
    """
    NB, Hp2, Wp2, Cin = x_ref.shape
    H, W = Hp2 - 2, Wp2 - 2
    Cout = o_ref.shape[-1]
    M = NB * H * W

    x = x_ref[...]
    # Build the im2col patch once: 9 shifted views concatenated along K.
    taps = [
        x[:, kh:kh + H, kw:kw + W, :].reshape(M, Cin)
        for kh in range(3)
        for kw in range(3)
    ]
    patch = jnp.concatenate(taps, axis=-1)                      # (M, 9*Cin)

    # Single MXU matmul: K = 9*Cin, N = Cout, f32 accumulate.
    acc = jnp.dot(patch, w_ref[...], preferred_element_type=jnp.float32)

    # Fused BatchNorm (eval) + ReLU on the f32 accumulator.
    y = acc * scale_ref[0, :] + bias_ref[0, :]
    y = jnp.maximum(y, 0.0)
    o_ref[...] = y.reshape(NB, H, W, Cout).astype(o_ref.dtype)


def _round_up(v, m):
    return -(-v // m) * m


def _pick_batch_tile(n, h, w, cin, cout, budget_bytes=8 * 1024 * 1024):
    """Largest divisor of n whose VMEM footprint (tiled layout) fits the budget."""
    # (8,128) tiled layout: last dim lane-padded to 128, 2nd-to-last to 8.
    in_img = (h + 2) * _round_up(w + 2, 8) * _round_up(cin, 128) * 4
    out_img = h * _round_up(w, 8) * _round_up(cout, 128) * 4
    patch_img = _round_up(h * w, 8) * _round_up(9 * cin, 128) * 4   # im2col
    acc_img = _round_up(h * w, 8) * _round_up(cout, 128) * 4        # f32 acc
    # in/out are double-buffered by the pipeline; intermediates are single.
    per_img = 2 * (in_img + out_img) + patch_img + acc_img
    nb = int(max(1, min(n, budget_bytes // max(per_img, 1))))
    while n % nb:
        nb -= 1
    return nb


def cnn_block_extractor_nhwc(x_nhwc, w_k9, scale, bias):
    """x_nhwc: (N,H,W,Cin) f32. w_k9: (9*Cin, Cout). Returns (N,H,W,Cout) NHWC."""
    N, H, W, Cin = x_nhwc.shape
    K, Cout = w_k9.shape

    # Spatial halo for pad=1 (glue; XLA fuses it with the layout transpose).
    x_pad = jnp.pad(x_nhwc, ((0, 0), (1, 1), (1, 1), (0, 0)))

    scale2d = scale.reshape(1, Cout).astype(jnp.float32)
    bias2d = bias.reshape(1, Cout).astype(jnp.float32)

    NB = _pick_batch_tile(N, H, W, Cin, Cout)
    grid = (N // NB,)

    flops = 2 * N * H * W * K * Cout + 3 * N * H * W * Cout
    bytes_accessed = 4 * (x_pad.size + w_k9.size + 2 * Cout + N * H * W * Cout)

    out = pl.pallas_call(
        _conv_bn_relu_kernel,
        out_shape=jax.ShapeDtypeStruct((N, H, W, Cout), x_nhwc.dtype),
        grid_spec=pltpu.PrefetchScalarGridSpec(
            num_scalar_prefetch=0,
            grid=grid,
            in_specs=[
                pl.BlockSpec((NB, H + 2, W + 2, Cin), lambda n: (n, 0, 0, 0)),
                pl.BlockSpec((K, Cout), lambda n: (0, 0)),
                pl.BlockSpec((1, Cout), lambda n: (0, 0)),
                pl.BlockSpec((1, Cout), lambda n: (0, 0)),
            ],
            out_specs=pl.BlockSpec((NB, H, W, Cout), lambda n: (n, 0, 0, 0)),
        ),
        compiler_params=pltpu.CompilerParams(
            dimension_semantics=("parallel",),
            vmem_limit_bytes=32 * 1024 * 1024,
        ),
        cost_estimate=pl.CostEstimate(
            flops=flops, transcendentals=0, bytes_accessed=bytes_accessed),
    )(x_pad, w_k9, scale2d, bias2d)
    return out


def cnn_block_extractor(x_nchw, params):
    """PyTorch-compatible entry point: NCHW in, NCHW out (eval semantics)."""
    w_oihw = params["conv_w"]          # (Cout, Cin, 3, 3)  -- PyTorch layout
    b_conv = params["conv_b"]          # (Cout,)
    gamma = params["bn_gamma"]         # (Cout,)
    beta = params["bn_beta"]           # (Cout,)
    rmean = params["bn_rmean"]         # (Cout,)
    rvar = params["bn_rvar"]           # (Cout,)
    eps = params["bn_eps"]

    Cout, Cin = int(w_oihw.shape[0]), int(w_oihw.shape[1])

    # Fold conv bias + BN (eval mode) into per-channel scale/shift:
    #   y = ((conv(x) + b) - mean) / sqrt(var+eps) * gamma + beta
    #     = conv(x) * scale + (b - mean) * scale + beta
    scale = gamma / jnp.sqrt(rvar + eps)
    bias = (b_conv - rmean) * scale + beta

    # OIHW -> (kh, kw, cin, cout) -> (9*Cin, Cout); row index = kh*3*Cin + kw*Cin + cin,
    # matching the kernel's tap ordering.
    w_k9 = jnp.transpose(w_oihw, (2, 3, 1, 0)).reshape(9 * Cin, Cout)
    w_k9 = w_k9.astype(jnp.float32)

    x_nhwc = jnp.transpose(x_nchw, (0, 2, 3, 1))
    y_nhwc = cnn_block_extractor_nhwc(x_nhwc, w_k9, scale, bias)
    return jnp.transpose(y_nhwc, (0, 3, 1, 2))


def init_params(key, features):
    """Deterministic synthetic parameters matching the PyTorch module's shapes."""
    cout = features * 2
    k_w, k_b, k_g, k_be, k_m, k_v = jax.random.split(key, 6)
    return {
        "conv_w": jax.random.normal(k_w, (cout, features, 3, 3), jnp.float32) * 0.1,
        "conv_b": jax.random.normal(k_b, (cout,), jnp.float32) * 0.1,
        "bn_gamma": 1.0 + 0.1 * jax.random.normal(k_g, (cout,), jnp.float32),
        "bn_beta": 0.1 * jax.random.normal(k_be, (cout,), jnp.float32),
        "bn_rmean": 0.1 * jax.random.normal(k_m, (cout,), jnp.float32),
        "bn_rvar": jax.random.uniform(k_v, (cout,), jnp.float32, 0.5, 1.5),
        "bn_eps": jnp.float32(1e-5),
    }


def _reference(x_nchw, params):
    """Pure-JAX reference (eval mode) for correctness checking."""
    y = jax.lax.conv_general_dilated(
        x_nchw, params["conv_w"], window_strides=(1, 1),
        padding=((1, 1), (1, 1)),
        dimension_numbers=("NCHW", "OIHW", "NCHW"),
        precision=jax.lax.Precision.HIGHEST)
    y = y + params["conv_b"][None, :, None, None]
    scale = params["bn_gamma"] / jnp.sqrt(params["bn_rvar"] + params["bn_eps"])
    y = (y - params["bn_rmean"][None, :, None, None]) * scale[None, :, None, None]
    y = y + params["bn_beta"][None, :, None, None]
    return jnp.maximum(y, 0.0)


if __name__ == "__main__":
    key = jax.random.PRNGKey(0)
    k_x, k_p = jax.random.split(key)

    batch, features, spatial = 2, 4, 16
    x = jax.random.normal(k_x, (batch, features, spatial, spatial), jnp.float32)
    params = init_params(k_p, features)

    fn = jax.jit(functools.partial(cnn_block_extractor, params=params))
    y = fn(x)
    jax.block_until_ready(y)

    assert y.shape == (batch, features * 2, spatial, spatial), y.shape
    assert bool(jnp.all(y >= 0.0))  # ReLU output is non-negative

    y_ref = _reference(x, params)
    assert bool(jnp.allclose(y, y_ref, atol=2e-2, rtol=2e-2)), float(
        jnp.max(jnp.abs(y - y_ref)))

    print("KERNEL_OK")
</pallas_src>

<mosaic_0001>
module attributes {stable_mosaic.version = 11 : i64} {
  func.func @_conv_bn_relu_kernel(%arg0: i32, %arg1: memref<2x18x18x4xf32, #tpu.memory_space<vmem>>, %arg2: memref<36x8xf32, #tpu.memory_space<vmem>>, %arg3: memref<1x8xf32, #tpu.memory_space<vmem>>, %arg4: memref<1x8xf32, #tpu.memory_space<vmem>>, %arg5: memref<2x16x16x8xf32, #tpu.memory_space<vmem>>) attributes {dimension_semantics = [#tpu.dimension_semantics<parallel>], iteration_bounds = array<i64: 1>, scalar_prefetch = 0 : i64, scratch_operands = 0 : i64, tpu.core_type = #tpu.core_type<tc>, window_params = [{transform_indices = @transform_0, window_bounds = array<i64: 2, 18, 18, 4>}, {pipeline_mode = #tpu.pipeline_mode<synchronous>, transform_indices = @transform_1, window_bounds = array<i64: 36, 8>}, {pipeline_mode = #tpu.pipeline_mode<synchronous>, transform_indices = @transform_2, window_bounds = array<i64: 1, 8>}, {pipeline_mode = #tpu.pipeline_mode<synchronous>, transform_indices = @transform_3, window_bounds = array<i64: 1, 8>}, {transform_indices = @transform_4, window_bounds = array<i64: 2, 16, 16, 8>}]} {
    %c0 = arith.constant 0 : index
    %c0_0 = arith.constant 0 : index
    %c0_1 = arith.constant 0 : index
    %c0_2 = arith.constant 0 : index
    %0 = vector.load %arg1[%c0, %c0_0, %c0_1, %c0_2] : memref<2x18x18x4xf32, #tpu.memory_space<vmem>>, vector<2x18x18x4xf32>
    %1 = vector.extract_strided_slice %0 {offsets = [0, 0, 0, 0], sizes = [2, 16, 16, 4], strides = [1, 1, 1, 1]} : vector<2x18x18x4xf32> to vector<2x16x16x4xf32>
    %2 = vector.shape_cast %1 : vector<2x16x16x4xf32> to vector<512x4xf32>
    %3 = vector.extract_strided_slice %0 {offsets = [0, 0, 1, 0], sizes = [2, 16, 16, 4], strides = [1, 1, 1, 1]} : vector<2x18x18x4xf32> to vector<2x16x16x4xf32>
    %4 = vector.shape_cast %3 : vector<2x16x16x4xf32> to vector<512x4xf32>
    %5 = vector.extract_strided_slice %0 {offsets = [0, 0, 2, 0], sizes = [2, 16, 16, 4], strides = [1, 1, 1, 1]} : vector<2x18x18x4xf32> to vector<2x16x16x4xf32>
    %6 = vector.shape_cast %5 : vector<2x16x16x4xf32> to vector<512x4xf32>
    %7 = vector.extract_strided_slice %0 {offsets = [0, 1, 0, 0], sizes = [2, 16, 16, 4], strides = [1, 1, 1, 1]} : vector<2x18x18x4xf32> to vector<2x16x16x4xf32>
    %8 = vector.shape_cast %7 : vector<2x16x16x4xf32> to vector<512x4xf32>
    %9 = vector.extract_strided_slice %0 {offsets = [0, 1, 1, 0], sizes = [2, 16, 16, 4], strides = [1, 1, 1, 1]} : vector<2x18x18x4xf32> to vector<2x16x16x4xf32>
    %10 = vector.shape_cast %9 : vector<2x16x16x4xf32> to vector<512x4xf32>
    %11 = vector.extract_strided_slice %0 {offsets = [0, 1, 2, 0], sizes = [2, 16, 16, 4], strides = [1, 1, 1, 1]} : vector<2x18x18x4xf32> to vector<2x16x16x4xf32>
    %12 = vector.shape_cast %11 : vector<2x16x16x4xf32> to vector<512x4xf32>
    %13 = vector.extract_strided_slice %0 {offsets = [0, 2, 0, 0], sizes = [2, 16, 16, 4], strides = [1, 1, 1, 1]} : vector<2x18x18x4xf32> to vector<2x16x16x4xf32>
    %14 = vector.shape_cast %13 : vector<2x16x16x4xf32> to vector<512x4xf32>
    %15 = vector.extract_strided_slice %0 {offsets = [0, 2, 1, 0], sizes = [2, 16, 16, 4], strides = [1, 1, 1, 1]} : vector<2x18x18x4xf32> to vector<2x16x16x4xf32>
    %16 = vector.shape_cast %15 : vector<2x16x16x4xf32> to vector<512x4xf32>
    %17 = vector.extract_strided_slice %0 {offsets = [0, 2, 2, 0], sizes = [2, 16, 16, 4], strides = [1, 1, 1, 1]} : vector<2x18x18x4xf32> to vector<2x16x16x4xf32>
    %18 = vector.shape_cast %17 : vector<2x16x16x4xf32> to vector<512x4xf32>
    %19 = tpu.concatenate %2, %4, %6, %8, %10, %12, %14, %16, %18 in 1 : vector<512x4xf32>, vector<512x4xf32>, vector<512x4xf32>, vector<512x4xf32>, vector<512x4xf32>, vector<512x4xf32>, vector<512x4xf32>, vector<512x4xf32>, vector<512x4xf32> -> vector<512x36xf32>
    %c0_3 = arith.constant 0 : index
    %c0_4 = arith.constant 0 : index
    %20 = vector.load %arg2[%c0_3, %c0_4] : memref<36x8xf32, #tpu.memory_space<vmem>>, vector<36x8xf32>
    %cst = arith.constant dense<0.000000e+00> : vector<512x8xf32>
    %21 = tpu.matmul %19, %20, %cst {dimension_numbers = #tpu.dot_dimension_numbers<[1], [0], [0], [1], [0, 0, 1, 1], [], []>} : vector<512x36xf32>, vector<36x8xf32>, vector<512x8xf32> -> vector<512x8xf32>
    %c0_5 = arith.constant 0 : index
    %c0_6 = arith.constant 0 : index
    %22 = vector.load %arg3[%c0_5, %c0_6] : memref<1x8xf32, #tpu.memory_space<vmem>>, vector<1x8xf32>
    %23 = vector.shape_cast %22 : vector<1x8xf32> to vector<8xf32>
    %24 = vector.shape_cast %23 : vector<8xf32> to vector<1x8xf32>
    %25 = vector.broadcast %24 : vector<1x8xf32> to vector<512x8xf32>
    %26 = arith.mulf %21, %25 : vector<512x8xf32>
    %c0_7 = arith.constant 0 : index
    %c0_8 = arith.constant 0 : index
    %27 = vector.load %arg4[%c0_7, %c0_8] : memref<1x8xf32, #tpu.memory_space<vmem>>, vector<1x8xf32>
    %28 = vector.shape_cast %27 : vector<1x8xf32> to vector<8xf32>
    %29 = vector.shape_cast %28 : vector<8xf32> to vector<1x8xf32>
    %30 = vector.broadcast %29 : vector<1x8xf32> to vector<512x8xf32>
    %31 = arith.addf %26, %30 : vector<512x8xf32>
    %cst_9 = arith.constant 0.000000e+00 : f32
    %32 = vector.broadcast %cst_9 : f32 to vector<512x8xf32>
    %33 = arith.maximumf %31, %32 : vector<512x8xf32>
    %34 = vector.shape_cast %33 : vector<512x8xf32> to vector<2x16x16x8xf32>
    %c0_10 = arith.constant 0 : index
    %c0_11 = arith.constant 0 : index
    %c0_12 = arith.constant 0 : index
    %c0_13 = arith.constant 0 : index
    %35 = vector.load %arg5[%c0_10, %c0_11, %c0_12, %c0_13] : memref<2x16x16x8xf32, #tpu.memory_space<vmem>>, vector<2x16x16x8xf32>
    tpu.vector_store %arg5[%c0_10, %c0_11, %c0_12, %c0_13], %34 {strides = array<i32>} : memref<2x16x16x8xf32, #tpu.memory_space<vmem>>, vector<2x16x16x8xf32>,
    return
  }
  func.func @transform_0(%arg0: i32) -> (i32, i32, i32, i32) {
    %c0_i32 = arith.constant 0 : i32
    %c0_i32_0 = arith.constant 0 : i32
    %c0_i32_1 = arith.constant 0 : i32
    %c0_i32_2 = arith.constant 0 : i32
    return %arg0, %c0_i32, %c0_i32_0, %c0_i32_1 : i32, i32, i32, i32
  }
  func.func @transform_1(%arg0: i32) -> (i32, i32) {
    %c0_i32 = arith.constant 0 : i32
    %c0_i32_0 = arith.constant 0 : i32
    %c0_i32_1 = arith.constant 0 : i32
    return %c0_i32, %c0_i32_0 : i32, i32
  }
  func.func @transform_2(%arg0: i32) -> (i32, i32) {
    %c0_i32 = arith.constant 0 : i32
    %c0_i32_0 = arith.constant 0 : i32
    %c0_i32_1 = arith.constant 0 : i32
    return %c0_i32, %c0_i32_0 : i32, i32
  }
  func.func @transform_3(%arg0: i32) -> (i32, i32) {
    %c0_i32 = arith.constant 0 : i32
    %c0_i32_0 = arith.constant 0 : i32
    %c0_i32_1 = arith.constant 0 : i32
    return %c0_i32, %c0_i32_0 : i32, i32
  }
  func.func @transform_4(%arg0: i32) -> (i32, i32, i32, i32) {
    %c0_i32 = arith.constant 0 : i32
    %c0_i32_0 = arith.constant 0 : i32
    %c0_i32_1 = arith.constant 0 : i32
    %c0_i32_2 = arith.constant 0 : i32
    return %arg0, %c0_i32, %c0_i32_0, %c0_i32_1 : i32, i32, i32, i32
  }
}

</mosaic_0001>

<bundles_post_ra>
// kernel: cnn_block_extractor.1
= control target key start
LH: loop header
LB: loop body
LE: loop exit
PB: predicated region body
PF: predicated region fallthrough
CT: control target
= control target key end

     0   :  { %vm221_vm0 = vcmask 1046528   ;;  %s3542_s7 = smov 4   ;;  %vm382_vm1 = vcmask 1045504   ;;  %s3543_s6 = smov 8   ;;  %vm2849_vm2 = vcmask 1043456   ;;  %vm2131_vm3 = vcmask 31744   ;;  %s8501_s0 = inlined_call_operand.vmem [shape: f32[2,18,18,4], index: 0, kind: input, shape index: {}]   ;;  %s8502_s1 = inlined_call_operand.vmem [shape: f32[36,8], index: 1, kind: input, shape index: {}]   ;;  %s8503_s2 = inlined_call_operand.vmem [shape: f32[1,8], index: 2, kind: input, shape index: {}]   ;;  %s8504_s3 = inlined_call_operand.vmem [shape: f32[1,8], index: 3, kind: input, shape index: {}]   ;;  %s8505_s4 = inlined_call_operand.vmem [shape: f32[2,16,16,8], index: 4, kind: output, shape index: {}]  }
   0x1   :  { %v3578_v0 = vld [vmem:[%s8501_s0 + $0x30] sm:$0xff]  ;;  %v3583_v1 = vld [vmem:[%s8501_s0 + $0x38] sm:$0xff]  ;;  %v3595_v5 = vld [vmem:[%s8501_s0 + $0x20] sm:$0xff]  ;;  %s3544_s9 = smov 12   ;;  %s3545_s19 = smov 16   ;;  %vm2196_vm4 = vcmask 64512  }
   0x2   :  { %v3588_v2 = vld [vmem:[%s8501_s0 + $0x18] sm:$0xff]  ;;  %v232_v3 = vrot.slane %v3578_v0, 1  ;;  %v233_v4 = vrot.slane %v3583_v1, 1  ;;  %v3601_v7 = vld [vmem:[%s8501_s0] sm:$0xff]  ;;  %v3606_v8 = vld [vmem:[%s8501_s0 + $0x8] sm:$0xff]  ;;  %v228_v9 = vrot.slane %v3595_v5, 1 }
   0x3   :  { %v227_v6 = vrot.slane %v3588_v2, 1  ;;  %v222_v10 = vrot.slane %v3601_v7, 1  ;;  %v223_v11 = vrot.slane %v3606_v8, 1  ;;  %v3614_v12 = vld [vmem:[%s8501_s0 + $0x40] sm:$0x3]  ;;  %v3656_v25 = vld [vmem:[%s8501_s0 + $0x68] sm:$0xff] }
   0x4   :  { %v3617_v13 = vsel %vm221_vm0, %v232_v3, %v233_v4  ;;  %v3622_v14 = vld [vmem:[%s8501_s0 + $0x28] sm:$0x3]  ;;  %v3627_v15 = vld [vmem:[%s8501_s0 + $0x10] sm:$0x3]  ;;  %v235_v18 = vrot.slane %v3614_v12, 1  ;;  %v3651_v24 = vld [vmem:[%s8501_s0 + $0x60] sm:$0xff] }
   0x5   :  { %8798 = vst [vmem:[#allocation2_spill] sm:$0xff] %v3617_v13  ;;  %603 = vrot.lane.b32.xlu2 %v3617_v13, %s3542_s7  ;;  %v3632_v16 = vsel %vm221_vm0, %v227_v6, %v228_v9  ;;  %v224_v17 = vsel %vm221_vm0, %v222_v10, %v223_v11  ;;  %v230_v19 = vrot.slane %v3622_v14, 1  ;;  %v225_v20 = vrot.slane %v3627_v15, 1  ;;  %v3661_v26 = vld [vmem:[%s8501_s0 + $0x50] sm:$0xff]  ;;  %v3666_v27 = vld [vmem:[%s8501_s0 + $0x58] sm:$0x3] }
   0x6   :  { %8799 = vst [vmem:[#allocation3_spill] sm:$0xff] %v3632_v16  ;;  %599 = vrot.lane.b32.xlu1 %v3632_v16, %s3542_s7  ;;  %595 = vrot.lane.b32.xlu0 %v224_v17, %s3542_s7  ;;  %v3642_v21 = vsel %vm221_vm0, %v233_v4, %v235_v18  ;;  %v3671_v28 = vld [vmem:[%s8501_s0 + $0x48] sm:$0xff]  ;;  %v242_v29 = vrot.slane %v3651_v24, 1  ;;  %v243_v30 = vrot.slane %v3656_v25, 1  ;;  %v238_v31 = vrot.slane %v3661_v26, 1  ;;  %v3695_v37 = vld [vmem:[%s8501_s0 + $0x80] sm:$0xff] }
   0x7   :  { %8800 = vst [vmem:[#allocation4_spill] sm:$0xff] %v3642_v21  ;;  %v3645_v22 = vsel %vm221_vm0, %v228_v9, %v230_v19  ;;  %v226_v23 = vsel %vm221_vm0, %v223_v11, %v225_v20  ;;  %v240_v32 = vrot.slane %v3666_v27, 1  ;;  %v237_v33 = vrot.slane %v3671_v28, 1  ;;  %v3700_v38 = vld [vmem:[%s8501_s0 + $0x88] sm:$0x3]  ;;  %v3705_v39 = vld [vmem:[%s8501_s0 + $0x78] sm:$0xff] }
   0x8   :  { %8801 = vst [vmem:[#allocation5_spill] sm:$0xff] %v3645_v22  ;;  %v3684_v34 = vsel %vm221_vm0, %v242_v29, %v243_v30  ;;  %v3710_v40 = vld [vmem:[%s8501_s0 + $0x70] sm:$0x3]  ;;  %v248_v41 = vrot.slane %v3695_v37, 1  ;;  %v250_v42 = vrot.slane %v3700_v38, 1  ;;  %v247_v43 = vrot.slane %v3705_v39, 1 }
   0x9   :  { %8802 = vst [vmem:[#allocation6_spill] sm:$0xff] %v3684_v34  ;;  %v3687_v35 = vsel %vm221_vm0, %v238_v31, %v240_v32  ;;  %v3690_v36 = vsel %vm221_vm0, %v237_v33, %v238_v31  ;;  %v245_v44 = vrot.slane %v3710_v40, 1  ;;  %v3734_v48 = vld [vmem:[%s8501_s0 + $0xa8] sm:$0xff]  ;;  %v3739_v49 = vld [vmem:[%s8501_s0 + $0xb0] sm:$0xff]  ;;  %v3744_v50 = vld [vmem:[%s8501_s0 + $0x98] sm:$0xff]  ;;  %s3546_s23 = smov 20  }
   0xa   :  { %8803 = vst [vmem:[#allocation7_spill] sm:$0xff] %v3687_v35  ;;  %v3723_v45 = vsel %vm221_vm0, %v248_v41, %v250_v42  ;;  %v3726_v46 = vsel %vm221_vm0, %v247_v43, %v248_v41  ;;  %v3749_v51 = vld [vmem:[%s8501_s0 + $0xa0] sm:$0x3]  ;;  %v3754_v52 = vld [vmem:[%s8501_s0 + $0x90] sm:$0xff]  ;;  %v257_v53 = vrot.slane %v3734_v48, 1  ;;  %v258_v54 = vrot.slane %v3739_v49, 1 }
   0xb   :  { %8804 = vst [vmem:[#allocation8_spill] sm:$0xff] %v3690_v36  ;;  %v3729_v47 = vsel %vm221_vm0, %v243_v30, %v245_v44  ;;  %v253_v55 = vrot.slane %v3744_v50, 1  ;;  %v255_v56 = vrot.slane %v3749_v51, 1  ;;  %v252_v57 = vrot.slane %v3754_v52, 1  ;;  %v3779_v61 = vld [vmem:[%s8501_s0 + $0xc8] sm:$0xff]  ;;  %v3789_v63 = vld [vmem:[%s8501_s0 + $0xc0] sm:$0xff] }
   0xc   :  { %8805 = vst [vmem:[#allocation9_spill] sm:$0xff] %v3723_v45  ;;  %v3768_v58 = vsel %vm221_vm0, %v257_v53, %v258_v54  ;;  %v3784_v62 = vld [vmem:[%s8501_s0 + $0xd0] sm:$0x3]  ;;  %v3794_v3 = vld [vmem:[%s8501_s0 + $0xb8] sm:$0x3]  ;;  %v263_v4 = vrot.slane %v3779_v61, 1 }
   0xd   :  { %605 = vrot.lane.b32.xlu2 %v3642_v21, %s3542_s7  ;;  %8806 = vst [vmem:[#allocation10_spill] sm:$0xff] %v3726_v46  ;;  %v3771_v59 = vsel %vm221_vm0, %v253_v55, %v255_v56  ;;  %v3774_v60 = vsel %vm221_vm0, %v252_v57, %v253_v55  ;;  %v265_v6 = vrot.slane %v3784_v62, 1  ;;  %v262_v9 = vrot.slane %v3789_v63, 1  ;;  %v3818_v19 = vld [vmem:[%s8501_s0 + $0xf0] sm:$0xff]  ;;  %v3823_v20 = vld [vmem:[%s8501_s0 + $0xf8] sm:$0xff]  ;;  %v3873_v56 = vld [vmem:[%s8501_s0 + $0x108] sm:$0xff] }
   0xe   :  { %601 = vrot.lane.b32.xlu1 %v3645_v22, %s3542_s7  ;;  %597 = vrot.lane.b32.xlu0 %v226_v23, %s3542_s7  ;;  %8807 = vst [vmem:[#allocation11_spill] sm:$0xff] %v3729_v47  ;;  %v260_v10 = vrot.slane %v3794_v3, 1  ;;  %v3828_v23 = vld [vmem:[%s8501_s0 + $0xe0] sm:$0xff]  ;;  %v3833_v29 = vld [vmem:[%s8501_s0 + $0xe8] sm:$0x3]  ;;  %v272_v31 = vrot.slane %v3818_v19, 1 }
   0xf   :  { %8808 = vst [vmem:[#allocation12_spill] sm:$0xff] %v3768_v58  ;;  %v3807_v11 = vsel %vm221_vm0, %v263_v4, %v265_v6  ;;  %v3810_v17 = vsel %vm221_vm0, %v262_v9, %v263_v4  ;;  %v3838_v30 = vld [vmem:[%s8501_s0 + $0xd8] sm:$0xff]  ;;  %v273_v32 = vrot.slane %v3823_v20, 1  ;;  %v268_v33 = vrot.slane %v3828_v23, 1  ;;  %v3878_v57 = vld [vmem:[%s8501_s0 + $0x100] sm:$0x3] }
  0x10   :  { %8809 = vst [vmem:[#allocation13_spill] sm:$0xff] %v3771_v59  ;;  %v3813_v18 = vsel %vm221_vm0, %v258_v54, %v260_v10  ;;  %v270_v41 = vrot.slane %v3833_v29, 1  ;;  %v267_v42 = vrot.slane %v3838_v30, 1  ;;  %v3863_v54 = vld [vmem:[%s8501_s0 + $0x110] sm:$0xff]  ;;  %v3868_v55 = vld [vmem:[%s8501_s0 + $0x118] sm:$0x3] }
  0x11   :  { %8810 = vst [vmem:[#allocation14_spill] sm:$0xff] %v3774_v60  ;;  %v3852_v43 = vsel %vm221_vm0, %v272_v31, %v273_v32  ;;  %v278_v4 = vrot.slane %v3863_v54, 1  ;;  %v280_v6 = vrot.slane %v3868_v55, 1  ;;  %v277_v9 = vrot.slane %v3873_v56, 1  ;;  %s3547_s24 = smov 24   ;;  %s3548_s25 = smov 28  }
  0x12   :  { %8811 = vst [vmem:[#allocation15_spill] sm:$0xff] %v3807_v11  ;;  %v3855_v44 = vsel %vm221_vm0, %v268_v33, %v270_v41  ;;  %v3858_v53 = vsel %vm221_vm0, %v267_v42, %v268_v33  ;;  %v275_v10 = vrot.slane %v3878_v57, 1  ;;  %v3902_v42 = vld [vmem:[%s8501_s0 + $0x138] sm:$0xff]  ;;  %vm2261_vm5 = vcmask 97280  }
  0x13   :  { %8812 = vst [vmem:[#allocation16_spill] sm:$0xff] %v3810_v17  ;;  %v3891_v31 = vsel %vm221_vm0, %v278_v4, %v280_v6  ;;  %v3894_v33 = vsel %vm221_vm0, %v277_v9, %v278_v4  ;;  %v3912_v6 = vld [vmem:[%s8501_s0 + $0x128] sm:$0xff]  ;;  %v3922_v4 = vld [vmem:[%s8501_s0 + $0x120] sm:$0xff]  ;;  %v287_v9 = vrot.slane %v3902_v42, 1  ;;  %vm2326_vm6 = vcmask 130048  }
  0x14   :  { %8813 = vst [vmem:[#allocation17_spill] sm:$0xff] %v3813_v18  ;;  %v3897_v41 = vsel %vm221_vm0, %v273_v32, %v275_v10  ;;  %v3917_v32 = vld [vmem:[%s8501_s0 + $0x130] sm:$0x3]  ;;  %vm2391_vm7 = vcmask 162816   ;;  %vm2456_vm8 = vcmask 195584   ;;  %vm2586_vm9 = vcmask 261120  }
  0x15   :  { %611 = vrot.lane.b32.xlu2 %v3684_v34, %s3542_s7  ;;  %8814 = vst [vmem:[#allocation18_spill] sm:$0xff] %v3852_v43  ;;  %vm2521_vm10 = vcmask 228352   ;;  %vm2656_vm11 = vcmask 293888  }
  0x16   :  { %609 = vrot.lane.b32.xlu1 %v3687_v35, %s3542_s7  ;;  %607 = vrot.lane.b32.xlu0 %v3690_v36, %s3542_s7  ;;  %8815 = vst [vmem:[#allocation19_spill] sm:$0xff] %v3855_v44  ;;  %v4034_v36 = vld [vmem:[%s8501_s0 + $0x1d8] sm:$0x3] }
  0x17   :  { %8816 = vst [vmem:[#allocation20_spill] sm:$0xff] %v3858_v53 }
  0x18   :  { %8817 = vst [vmem:[#allocation21_spill] sm:$0xff] %v3891_v31 }
  0x19   :  { %8818 = vst [vmem:[#allocation22_spill] sm:$0xff] %v3894_v33 }
  0x1a   :  { %8819 = vst [vmem:[#allocation23_spill] sm:$0xff] %v3897_v41 }
  0x1b   :  { %8831 = vst [vmem:[#allocation35_spill] sm:$0xff] %v4034_v36 }
  0x1d   :  { %617 = vrot.lane.b32.xlu2 %v3723_v45, %s3542_s7 }
  0x1e   :  { %615 = vrot.lane.b32.xlu1 %v3726_v46, %s3542_s7  ;;  %613 = vrot.lane.b32.xlu0 %v3729_v47, %s3542_s7 }
  0x25   :  { %623 = vrot.lane.b32.xlu2 %v3768_v58, %s3542_s7 }
  0x26   :  { %621 = vrot.lane.b32.xlu1 %v3771_v59, %s3542_s7  ;;  %619 = vrot.lane.b32.xlu0 %v3774_v60, %s3542_s7 }
  0x2d   :  { %629 = vrot.lane.b32.xlu2 %v3807_v11, %s3542_s7  ;;  %v283_v11 = vrot.slane %v3912_v6, 1 }
  0x2e   :  { %627 = vrot.lane.b32.xlu1 %v3810_v17, %s3542_s7  ;;  %625 = vrot.lane.b32.xlu0 %v3813_v18, %s3542_s7  ;;  %v3952_v18 = vld [vmem:[%s8501_s0 + $0x160] sm:$0x3] }
  0x35   :  { %635 = vrot.lane.b32.xlu2 %v3852_v43, %s3542_s7  ;;  %v3907_v43 = vld [vmem:[%s8501_s0 + $0x140] sm:$0xff] }
  0x36   :  { %633 = vrot.lane.b32.xlu1 %v3855_v44, %s3542_s7  ;;  %631 = vrot.lane.b32.xlu0 %v3858_v53, %s3542_s7  ;;  %v288_v10 = vrot.slane %v3907_v43, 1  ;;  %v285_v53 = vrot.slane %v3917_v32, 1  ;;  %v282_v44 = vrot.slane %v3922_v4, 1 }
  0x38   :  { %v3936_v58 = vsel %vm221_vm0, %v287_v9, %v288_v10  ;;  %v3957_v9 = vld [vmem:[%s8501_s0 + $0x150] sm:$0xff] }
  0x39   :  { %8820 = vst [vmem:[#allocation24_spill] sm:$0xff] %v3936_v58  ;;  %v292_v17 = vrot.slane %v3957_v9, 1 }
  0x3d   :  { %641 = vrot.lane.b32.xlu2 %v3891_v31, %s3542_s7  ;;  %v3939_v31 = vsel %vm221_vm0, %v283_v11, %v285_v53  ;;  %v295_v53 = vrot.slane %v3952_v18, 1 }
  0x3e   :  { %639 = vrot.lane.b32.xlu1 %v3894_v33, %s3542_s7  ;;  %637 = vrot.lane.b32.xlu0 %v3897_v41, %s3542_s7  ;;  %8821 = vst [vmem:[#allocation25_spill] sm:$0xff] %v3939_v31  ;;  %v3942_v33 = vsel %vm221_vm0, %v282_v44, %v283_v11  ;;  %v3947_v41 = vld [vmem:[%s8501_s0 + $0x158] sm:$0xff]  ;;  %v3962_v11 = vld [vmem:[%s8501_s0 + $0x148] sm:$0x3] }
  0x3f   :  { %8822 = vst [vmem:[#allocation26_spill] sm:$0xff] %v3942_v33  ;;  %v293_v44 = vrot.slane %v3947_v41, 1  ;;  %v290_v45 = vrot.slane %v3962_v11, 1 }
  0x41   :  { %v3975_v60 = vsel %vm221_vm0, %v293_v44, %v295_v53  ;;  %v3978_v59 = vsel %vm221_vm0, %v292_v17, %v293_v44  ;;  %v3996_v53 = vld [vmem:[%s8501_s0 + $0x170] sm:$0xff]  ;;  %v4006_v17 = vld [vmem:[%s8501_s0 + $0x168] sm:$0xff] }
  0x42   :  { %8823 = vst [vmem:[#allocation27_spill] sm:$0xff] %v3975_v60  ;;  %v298_v34 = vrot.slane %v3996_v53, 1  ;;  %v297_v46 = vrot.slane %v4006_v17, 1 }
  0x43   :  { %8824 = vst [vmem:[#allocation28_spill] sm:$0xff] %v3978_v59 }
  0x45   :  { %647 = vrot.lane.b32.xlu2 %v3936_v58, %s3542_s7  ;;  %v3981_v58 = vsel %vm221_vm0, %v288_v10, %v290_v45  ;;  %v4001_v45 = vld [vmem:[%s8501_s0 + $0x178] sm:$0x3] }
  0x46   :  { %645 = vrot.lane.b32.xlu1 %v3939_v31, %s3542_s7  ;;  %643 = vrot.lane.b32.xlu0 %v3942_v33, %s3542_s7  ;;  %8825 = vst [vmem:[#allocation29_spill] sm:$0xff] %v3981_v58  ;;  %v3986_v33 = vld [vmem:[%s8501_s0 + $0x1b0] sm:$0xff]  ;;  %v3991_v31 = vld [vmem:[%s8501_s0 + $0x1b8] sm:$0xff]  ;;  %v300_v47 = vrot.slane %v4001_v45, 1 }
  0x47   :  { %8826 = vst [vmem:[#allocation30_spill] sm:$0xff] %v3986_v33  ;;  %v302_v10 = vrot.slane %v3986_v33, 1  ;;  %v303_v44 = vrot.slane %v3991_v31, 1 }
  0x48   :  { %8827 = vst [vmem:[#allocation31_spill] sm:$0xff] %v3991_v31 }
  0x49   :  { %v304_v21 = vsel %vm221_vm0, %v302_v10, %v303_v44  ;;  %v4039_v10 = vld [vmem:[%s8501_s0 + $0x1c8] sm:$0xff] }
  0x4a   :  { %v307_v35 = vrot.slane %v4039_v10, 1 }
  0x4d   :  { %653 = vrot.lane.b32.xlu2 %v3975_v60, %s3542_s7  ;;  %v4021_v60 = vsel %vm221_vm0, %v298_v34, %v300_v47  ;;  %v310_v47 = vrot.slane %v4034_v36, 1 }
  0x4e   :  { %651 = vrot.lane.b32.xlu1 %v3978_v59, %s3542_s7  ;;  %649 = vrot.lane.b32.xlu0 %v3981_v58, %s3542_s7  ;;  %8828 = vst [vmem:[#allocation32_spill] sm:$0xff] %v4021_v60  ;;  %v4024_v59 = vsel %vm221_vm0, %v297_v46, %v298_v34  ;;  %v4029_v58 = vld [vmem:[%s8501_s0 + $0x1d0] sm:$0xff]  ;;  %v4044_v34 = vld [vmem:[%s8501_s0 + $0x1c0] sm:$0x3] }
  0x4f   :  { %8829 = vst [vmem:[#allocation33_spill] sm:$0xff] %v4024_v59  ;;  %v308_v46 = vrot.slane %v4029_v58, 1  ;;  %v305_v16 = vrot.slane %v4044_v34, 1 }
  0x50   :  { %8830 = vst [vmem:[#allocation34_spill] sm:$0xff] %v4029_v58 }
  0x51   :  { %8832 = vst [vmem:[#allocation36_spill] sm:$0xff] %v4044_v34  ;;  %v4056_v22 = vsel %vm221_vm0, %v308_v46, %v310_v47  ;;  %v4059_v13 = vsel %vm221_vm0, %v307_v35, %v308_v46  ;;  %v4075_v47 = vld [vmem:[%s8501_s0 + $0x1e8] sm:$0xff]  ;;  %v4080_v35 = vld [vmem:[%s8501_s0 + $0x1f0] sm:$0x3] }
  0x52   :  { %8833 = vst [vmem:[#allocation37_spill] sm:$0xff] %v4056_v22  ;;  %v313_v33 = vrot.slane %v4075_v47, 1  ;;  %v315_v34 = vrot.slane %v4080_v35, 1 }
  0x53   :  { %8834 = vst [vmem:[#allocation38_spill] sm:$0xff] %v4059_v13 }
  0x54   :  { %8837 = vst [vmem:[#allocation41_spill] sm:$0xff] %v4075_v47 }
  0x55   :  { %659 = vrot.lane.b32.xlu2 %v304_v21, %s3542_s7  ;;  %v306_v21 = vsel %vm221_vm0, %v303_v44, %v305_v16  ;;  %8838 = vst [vmem:[#allocation42_spill] sm:$0xff] %v4080_v35  ;;  %v4085_v16 = vld [vmem:[%s8501_s0 + $0x1e0] sm:$0xff] }
  0x56   :  { %657 = vrot.lane.b32.xlu1 %v4021_v60, %s3542_s7  ;;  %655 = vrot.lane.b32.xlu0 %v4024_v59, %s3542_s7  ;;  %v4065_v59 = vld [vmem:[%s8501_s0 + $0x1f8] sm:$0xff]  ;;  %v4070_v60 = vld [vmem:[%s8501_s0 + $0x200] sm:$0xff]  ;;  %8839 = vst [vmem:[#allocation43_spill] sm:$0xff] %v4085_v16  ;;  %v312_v31 = vrot.slane %v4085_v16, 1 }
  0x57   :  { %8835 = vst [vmem:[#allocation39_spill] sm:$0xff] %v4065_v59  ;;  %v317_v44 = vrot.slane %v4065_v59, 1  ;;  %v318_v46 = vrot.slane %v4070_v60, 1 }
  0x58   :  { %8836 = vst [vmem:[#allocation40_spill] sm:$0xff] %v4070_v60 }
  0x59   :  { %v4100_v58 = vsel %vm221_vm0, %v317_v44, %v318_v46  ;;  %v4121_v44 = vld [vmem:[%s8501_s0 + $0x210] sm:$0xff] }
  0x5a   :  { %8841 = vst [vmem:[#allocation45_spill] sm:$0xff] %v4100_v58  ;;  %v322_v60 = vrot.slane %v4121_v44, 1 }
  0x5b   :  { %8846 = vst [vmem:[#allocation50_spill] sm:$0xff] %v4121_v44 }
  0x5d   :  { %665 = vrot.lane.b32.xlu2 %v4056_v22, %s3542_s7  ;;  %v4103_v22 = vsel %vm221_vm0, %v313_v33, %v315_v34 }
  0x5e   :  { %663 = vrot.lane.b32.xlu1 %v4059_v13, %s3542_s7  ;;  %661 = vrot.lane.b32.xlu0 %v306_v21, %s3542_s7  ;;  %8842 = vst [vmem:[#allocation46_spill] sm:$0xff] %v4103_v22  ;;  %v4106_v21 = vsel %vm221_vm0, %v312_v31, %v313_v33  ;;  %v4111_v13 = vld [vmem:[%s8501_s0 + $0x218] sm:$0xff]  ;;  %v4126_v31 = vld [vmem:[%s8501_s0 + $0x208] sm:$0x3] }
  0x5f   :  { %v4094_v36 = vpop.permute.xlu2 %603  ;;  %8843 = vst [vmem:[#allocation47_spill] sm:$0xff] %v4106_v21  ;;  %v323_v33 = vrot.slane %v4111_v13, 1  ;;  %v320_v16 = vrot.slane %v4126_v31, 1 }
  0x60   :  { %8840 = vst [vmem:[#allocation44_spill] sm:$0xff] %v4094_v36  ;;  %v4116_v36 = vld [vmem:[%s8501_s0 + $0x220] sm:$0x3] }
  0x61   :  { %8844 = vst [vmem:[#allocation48_spill] sm:$0xff] %v4111_v13  ;;  %v325_v34 = vrot.slane %v4116_v36, 1 }
  0x62   :  { %8845 = vst [vmem:[#allocation49_spill] sm:$0xff] %v4116_v36 }
  0x63   :  { %8847 = vst [vmem:[#allocation51_spill] sm:$0xff] %v4126_v31  ;;  %v4141_v35 = vsel %vm221_vm0, %v323_v33, %v325_v34  ;;  %v4162_v34 = vld [vmem:[%s8501_s0 + $0x230] sm:$0xff] }
  0x64   :  { %8849 = vst [vmem:[#allocation53_spill] sm:$0xff] %v4141_v35  ;;  %v328_v31 = vrot.slane %v4162_v34, 1 }
  0x65   :  { %671 = vrot.lane.b32.xlu2 %v4100_v58, %s3542_s7  ;;  %v4144_v58 = vsel %vm221_vm0, %v322_v60, %v323_v33  ;;  %8854 = vst [vmem:[#allocation58_spill] sm:$0xff] %v4162_v34  ;;  %v4167_v60 = vld [vmem:[%s8501_s0 + $0x238] sm:$0x3] }
  0x66   :  { %669 = vrot.lane.b32.xlu1 %v4103_v22, %s3542_s7  ;;  %667 = vrot.lane.b32.xlu0 %v4106_v21, %s3542_s7  ;;  %8850 = vst [vmem:[#allocation54_spill] sm:$0xff] %v4144_v58  ;;  %v4147_v22 = vsel %vm221_vm0, %v318_v46, %v320_v16  ;;  %v4152_v21 = vld [vmem:[%s8501_s0 + $0x240] sm:$0xff]  ;;  %v4172_v16 = vld [vmem:[%s8501_s0 + $0x228] sm:$0xff]  ;;  %v330_v13 = vrot.slane %v4167_v60, 1 }
  0x67   :  { %v4136_v59 = vpop.permute.xlu2 %605  ;;  %8851 = vst [vmem:[#allocation55_spill] sm:$0xff] %v4147_v22  ;;  %v332_v46 = vrot.slane %v4152_v21, 1  ;;  %v327_v44 = vrot.slane %v4172_v16, 1 }
  0x68   :  { %8848 = vst [vmem:[#allocation52_spill] sm:$0xff] %v4136_v59  ;;  %v4157_v59 = vld [vmem:[%s8501_s0 + $0x248] sm:$0xff] }
  0x69   :  { %8852 = vst [vmem:[#allocation56_spill] sm:$0xff] %v4152_v21  ;;  %v333_v33 = vrot.slane %v4157_v59, 1  ;;  %v4199_v21 = vld [vmem:[%s8501_s0 + $0x260] sm:$0xff] }
  0x6a   :  { %8853 = vst [vmem:[#allocation57_spill] sm:$0xff] %v4157_v59 }
  0x6b   :  { %8855 = vst [vmem:[#allocation59_spill] sm:$0xff] %v4167_v60 }
  0x6c   :  { %8856 = vst [vmem:[#allocation60_spill] sm:$0xff] %v4172_v16 }
  0x6d   :  { %677 = vrot.lane.b32.xlu2 %v4141_v35, %s3542_s7  ;;  %v4188_v35 = vsel %vm221_vm0, %v332_v46, %v333_v33  ;;  %8861 = vst [vmem:[#allocation65_spill] sm:$0xff] %v4199_v21  ;;  %v4209_v46 = vld [vmem:[%s8501_s0 + $0x258] sm:$0xff] }
  0x6e   :  { %675 = vrot.lane.b32.xlu1 %v4144_v58, %s3542_s7  ;;  %673 = vrot.lane.b32.xlu0 %v4147_v22, %s3542_s7  ;;  %8858 = vst [vmem:[#allocation62_spill] sm:$0xff] %v4188_v35  ;;  %v4191_v58 = vsel %vm221_vm0, %v328_v31, %v330_v13  ;;  %v4194_v22 = vsel %vm221_vm0, %v327_v44, %v328_v31  ;;  %v4214_v13 = vld [vmem:[%s8501_s0 + $0x250] sm:$0x3]  ;;  %v338_v44 = vrot.slane %v4199_v21, 1  ;;  %v337_v16 = vrot.slane %v4209_v46, 1 }
  0x6f   :  { %v4182_v36 = vpop.permute.xlu2 %611  ;;  %8859 = vst [vmem:[#allocation63_spill] sm:$0xff] %v4191_v58  ;;  %v335_v60 = vrot.slane %v4214_v13, 1 }
  0x70   :  { %8857 = vst [vmem:[#allocation61_spill] sm:$0xff] %v4182_v36  ;;  %v4204_v36 = vld [vmem:[%s8501_s0 + $0x268] sm:$0x3] }
  0x71   :  { %8860 = vst [vmem:[#allocation64_spill] sm:$0xff] %v4194_v22  ;;  %v340_v31 = vrot.slane %v4204_v36, 1 }
  0x72   :  { %8862 = vst [vmem:[#allocation66_spill] sm:$0xff] %v4204_v36 }
  0x73   :  { %8863 = vst [vmem:[#allocation67_spill] sm:$0xff] %v4209_v46 }
  0x74   :  { %8864 = vst [vmem:[#allocation68_spill] sm:$0xff] %v4214_v13 }
  0x75   :  { %683 = vrot.lane.b32.xlu2 %v4188_v35, %s3542_s7  ;;  %v4233_v35 = vsel %vm221_vm0, %v338_v44, %v340_v31  ;;  %v4254_v31 = vld [vmem:[%s8501_s0 + $0x278] sm:$0xff] }
  0x76   :  { %681 = vrot.lane.b32.xlu1 %v4191_v58, %s3542_s7  ;;  %679 = vrot.lane.b32.xlu0 %v4194_v22, %s3542_s7  ;;  %8868 = vst [vmem:[#allocation72_spill] sm:$0xff] %v4233_v35  ;;  %v4236_v58 = vsel %vm221_vm0, %v337_v16, %v338_v44  ;;  %v4239_v22 = vsel %vm221_vm0, %v333_v33, %v335_v60  ;;  %v4259_v60 = vld [vmem:[%s8501_s0 + $0x280] sm:$0x3]  ;;  %v4264_v16 = vld [vmem:[%s8501_s0 + $0x270] sm:$0xff]  ;;  %v343_v36 = vrot.slane %v4254_v31, 1 }
  0x77   :  { %v4224_v59 = vpop.permute.xlu2 %617  ;;  %8869 = vst [vmem:[#allocation73_spill] sm:$0xff] %v4236_v58  ;;  %v345_v13 = vrot.slane %v4259_v60, 1  ;;  %v342_v21 = vrot.slane %v4264_v16, 1 }
  0x78   :  { %8865 = vst [vmem:[#allocation69_spill] sm:$0xff] %v4224_v59  ;;  %v4228_v34 = vpop.permute.xlu1 %599  ;;  %v4230_v47 = vpop.permute.xlu0 %595  ;;  %v4244_v59 = vld [vmem:[%s8501_s0 + $0x288] sm:$0xff] }
  0x79   :  { %8866 = vst [vmem:[#allocation70_spill] sm:$0xff] %v4228_v34  ;;  %v4249_v34 = vld [vmem:[%s8501_s0 + $0x290] sm:$0xff]  ;;  %v347_v33 = vrot.slane %v4244_v59, 1 }
  0x7a   :  { %8867 = vst [vmem:[#allocation71_spill] sm:$0xff] %v4230_v47  ;;  %v348_v44 = vrot.slane %v4249_v34, 1 }
  0x7b   :  { %8870 = vst [vmem:[#allocation74_spill] sm:$0xff] %v4239_v22 }
  0x7c   :  { %8871 = vst [vmem:[#allocation75_spill] sm:$0xff] %v4244_v59  ;;  %v4290_v59 = vsel %vm221_vm0, %v342_v21, %v343_v36 }
  0x7d   :  { %8872 = vst [vmem:[#allocation76_spill] sm:$0xff] %v4249_v34  ;;  %689 = vrot.lane.b32.xlu2 %v4233_v35, %s3542_s7 }
  0x7e   :  { %8873 = vst [vmem:[#allocation77_spill] sm:$0xff] %v4254_v31  ;;  %687 = vrot.lane.b32.xlu1 %v4236_v58, %s3542_s7  ;;  %685 = vrot.lane.b32.xlu0 %v4239_v22, %s3542_s7  ;;  %v4284_v58 = vsel %vm221_vm0, %v347_v33, %v348_v44  ;;  %v4287_v22 = vsel %vm221_vm0, %v343_v36, %v345_v13  ;;  %v4305_v33 = vld [vmem:[%s8501_s0 + $0x2a0] sm:$0xff]  ;;  %v4310_v36 = vld [vmem:[%s8501_s0 + $0x298] sm:$0x3] }
  0x7f   :  { %8874 = vst [vmem:[#allocation78_spill] sm:$0xff] %v4259_v60  ;;  %v4274_v47 = vpop.permute.xlu2 %623  ;;  %v352_v34 = vrot.slane %v4305_v33, 1 }
  0x80   :  { %8875 = vst [vmem:[#allocation79_spill] sm:$0xff] %v4264_v16  ;;  %v4279_v46 = vpop.permute.xlu1 %601  ;;  %v4281_v35 = vpop.permute.xlu0 %597  ;;  %v350_v16 = vrot.slane %v4310_v36, 1 }
  0x81   :  { %8876 = vst [vmem:[#allocation80_spill] sm:$0xff] %v4274_v47  ;;  %v4295_v47 = vld [vmem:[%s8501_s0 + $0x2a8] sm:$0xff] }
  0x82   :  { %8877 = vst [vmem:[#allocation81_spill] sm:$0xff] %v4279_v46  ;;  %v4300_v46 = vld [vmem:[%s8501_s0 + $0x2b0] sm:$0x3]  ;;  %v353_v21 = vrot.slane %v4295_v47, 1 }
  0x83   :  { %8878 = vst [vmem:[#allocation82_spill] sm:$0xff] %v4281_v35  ;;  %v355_v13 = vrot.slane %v4300_v46, 1 }
  0x84   :  { %8879 = vst [vmem:[#allocation83_spill] sm:$0xff] %v4284_v58 }
  0x85   :  { %8880 = vst [vmem:[#allocation84_spill] sm:$0xff] %v4287_v22  ;;  %695 = vrot.lane.b32.xlu2 %v4284_v58, %s3542_s7  ;;  %v4329_v58 = vsel %vm221_vm0, %v353_v21, %v355_v13  ;;  %v4350_v13 = vld [vmem:[%s8501_s0 + $0x2c0] sm:$0xff] }
  0x86   :  { %8881 = vst [vmem:[#allocation85_spill] sm:$0xff] %v4290_v59  ;;  %693 = vrot.lane.b32.xlu1 %v4287_v22, %s3542_s7  ;;  %691 = vrot.lane.b32.xlu0 %v4290_v59, %s3542_s7  ;;  %v4332_v22 = vsel %vm221_vm0, %v352_v34, %v353_v21  ;;  %v4335_v59 = vsel %vm221_vm0, %v348_v44, %v350_v16  ;;  %v4355_v34 = vld [vmem:[%s8501_s0 + $0x2c8] sm:$0x3]  ;;  %v4360_v16 = vld [vmem:[%s8501_s0 + $0x2b8] sm:$0xff] }
  0x87   :  { %8882 = vst [vmem:[#allocation86_spill] sm:$0xff] %v4295_v47  ;;  %v4320_v35 = vpop.permute.xlu2 %629  ;;  %v357_v47 = vrot.slane %v4360_v16, 1 }
  0x88   :  { %8883 = vst [vmem:[#allocation87_spill] sm:$0xff] %v4300_v46  ;;  %v4324_v60 = vpop.permute.xlu1 %609  ;;  %v4326_v31 = vpop.permute.xlu0 %607  ;;  %v358_v46 = vrot.slane %v4350_v13, 1 }
  0x89   :  { %8884 = vst [vmem:[#allocation88_spill] sm:$0xff] %v4305_v33 }
  0x8a   :  { %8885 = vst [vmem:[#allocation89_spill] sm:$0xff] %v4310_v36  ;;  %v360_v36 = vrot.slane %v4355_v34, 1 }
  0x8b   :  { %8886 = vst [vmem:[#allocation90_spill] sm:$0xff] %v4320_v35  ;;  %v4340_v35 = vld [vmem:[%s8501_s0 + $0x2d0] sm:$0xff] }
  0x8c   :  { %8887 = vst [vmem:[#allocation91_spill] sm:$0xff] %v4324_v60  ;;  %v4345_v60 = vld [vmem:[%s8501_s0 + $0x2d8] sm:$0xff]  ;;  %v362_v44 = vrot.slane %v4340_v35, 1 }
  0x8d   :  { %8888 = vst [vmem:[#allocation92_spill] sm:$0xff] %v4326_v31  ;;  %701 = vrot.lane.b32.xlu2 %v4329_v58, %s3542_s7  ;;  %v363_v21 = vrot.slane %v4345_v60, 1 }
  0x8e   :  { %8889 = vst [vmem:[#allocation93_spill] sm:$0xff] %v4329_v58  ;;  %699 = vrot.lane.b32.xlu1 %v4332_v22, %s3542_s7  ;;  %697 = vrot.lane.b32.xlu0 %v4335_v59, %s3542_s7 }
  0x8f   :  { %8890 = vst [vmem:[#allocation94_spill] sm:$0xff] %v4332_v22  ;;  %v4370_v31 = vpop.permute.xlu2 %635  ;;  %v4380_v22 = vsel %vm221_vm0, %v362_v44, %v363_v21  ;;  %v4401_v44 = vld [vmem:[%s8501_s0 + $0x2e8] sm:$0xff] }
  0x90   :  { %8891 = vst [vmem:[#allocation95_spill] sm:$0xff] %v4335_v59  ;;  %v4375_v33 = vpop.permute.xlu1 %615  ;;  %v4377_v58 = vpop.permute.xlu0 %613  ;;  %v4383_v59 = vsel %vm221_vm0, %v358_v46, %v360_v36 }
  0x91   :  { %8892 = vst [vmem:[#allocation96_spill] sm:$0xff] %v4340_v35  ;;  %v4386_v35 = vsel %vm221_vm0, %v357_v47, %v358_v46  ;;  %v4406_v47 = vld [vmem:[%s8501_s0 + $0x2e0] sm:$0x3] }
  0x92   :  { %8893 = vst [vmem:[#allocation97_spill] sm:$0xff] %v4345_v60  ;;  %v367_v60 = vrot.slane %v4401_v44, 1 }
  0x93   :  { %8894 = vst [vmem:[#allocation98_spill] sm:$0xff] %v4350_v13 }
  0x94   :  { %8895 = vst [vmem:[#allocation99_spill] sm:$0xff] %v4355_v34 }
  0x95   :  { %8896 = vst [vmem:[#allocation100_spill] sm:$0xff] %v4360_v16  ;;  %707 = vrot.lane.b32.xlu2 %v4380_v22, %s3542_s7  ;;  %v365_v16 = vrot.slane %v4406_v47, 1 }
  0x96   :  { %8897 = vst [vmem:[#allocation101_spill] sm:$0xff] %v4370_v31  ;;  %v4391_v31 = vld [vmem:[%s8501_s0 + $0x2f0] sm:$0xff]  ;;  %705 = vrot.lane.b32.xlu1 %v4383_v59, %s3542_s7  ;;  %703 = vrot.lane.b32.xlu0 %v4386_v35, %s3542_s7 }
  0x97   :  { %8898 = vst [vmem:[#allocation102_spill] sm:$0xff] %v4375_v33  ;;  %v4396_v33 = vld [vmem:[%s8501_s0 + $0x2f8] sm:$0x3]  ;;  %v368_v46 = vrot.slane %v4391_v31, 1 }
  0x98   :  { %8899 = vst [vmem:[#allocation103_spill] sm:$0xff] %v4377_v58  ;;  %v370_v36 = vrot.slane %v4396_v33, 1  ;;  %v4416_v58 = vpop.permute.xlu2 %641  ;;  %v4420_v34 = vpop.permute.xlu1 %621 }
  0x99   :  { %8900 = vst [vmem:[#allocation104_spill] sm:$0xff] %v4380_v22  ;;  %v4422_v13 = vpop.permute.xlu0 %619 }
  0x9a   :  { %8901 = vst [vmem:[#allocation105_spill] sm:$0xff] %v4383_v59  ;;  %v4425_v22 = vsel %vm221_vm0, %v368_v46, %v370_v36  ;;  %v4428_v59 = vsel %vm221_vm0, %v367_v60, %v368_v46  ;;  %v4446_v36 = vld [vmem:[%s8501_s0 + $0x308] sm:$0xff]  ;;  %v4451_v60 = vld [vmem:[%s8501_s0 + $0x310] sm:$0x3] }
  0x9b   :  { %8902 = vst [vmem:[#allocation106_spill] sm:$0xff] %v4386_v35  ;;  %v4431_v35 = vsel %vm221_vm0, %v363_v21, %v365_v16  ;;  %v4456_v16 = vld [vmem:[%s8501_s0 + $0x300] sm:$0xff] }
  0x9c   :  { %8903 = vst [vmem:[#allocation107_spill] sm:$0xff] %v4391_v31  ;;  %v372_v31 = vrot.slane %v4456_v16, 1 }
  0x9d   :  { %8904 = vst [vmem:[#allocation108_spill] sm:$0xff] %v4396_v33  ;;  %713 = vrot.lane.b32.xlu2 %v4425_v22, %s3542_s7  ;;  %v373_v33 = vrot.slane %v4446_v36, 1 }
  0x9e   :  { %8905 = vst [vmem:[#allocation109_spill] sm:$0xff] %v4401_v44  ;;  %711 = vrot.lane.b32.xlu1 %v4428_v59, %s3542_s7  ;;  %709 = vrot.lane.b32.xlu0 %v4431_v35, %s3542_s7 }
  0x9f   :  { %8906 = vst [vmem:[#allocation110_spill] sm:$0xff] %v4406_v47  ;;  %v375_v47 = vrot.slane %v4451_v60, 1 }
  0xa0   :  { %8907 = vst [vmem:[#allocation111_spill] sm:$0xff] %v4416_v58  ;;  %v4436_v58 = vld [vmem:[%s8501_s0 + $0x318] sm:$0xff]  ;;  %v4471_v44 = vpop.permute.xlu1 %627 }
  0xa1   :  { %8908 = vst [vmem:[#allocation112_spill] sm:$0xff] %v4420_v34  ;;  %v4441_v34 = vld [vmem:[%s8501_s0 + $0x320] sm:$0xff]  ;;  %v377_v21 = vrot.slane %v4436_v58, 1 }
  0xa2   :  { %8909 = vst [vmem:[#allocation113_spill] sm:$0xff] %v4422_v13  ;;  %v378_v46 = vrot.slane %v4441_v34, 1  ;;  %v4466_v13 = vpop.permute.xlu2 %647 }
  0xa3   :  { %8910 = vst [vmem:[#allocation114_spill] sm:$0xff] %v4425_v22  ;;  %v4473_v22 = vpop.permute.xlu0 %625 }
  0xa4   :  { %8911 = vst [vmem:[#allocation115_spill] sm:$0xff] %v4428_v59  ;;  %v4476_v59 = vsel %vm221_vm0, %v377_v21, %v378_v46  ;;  %v386_v21 = vrot.slane %v3627_v15, 2 }
  0xa5   :  { %8912 = vst [vmem:[#allocation116_spill] sm:$0xff] %v4431_v35  ;;  %v4479_v35 = vsel %vm221_vm0, %v373_v33, %v375_v47  ;;  %719 = vrot.lane.b32.xlu2 %v4476_v59, %s3542_s7  ;;  %v384_v47 = vrot.slane %v3606_v8, 2  ;;  %v394_v8 = vrot.slane %v3583_v1, 2  ;;  %v399_v1 = vrot.slane %v3661_v26, 2 }
  0xa6   :  { %8913 = vst [vmem:[#allocation117_spill] sm:$0xff] %v4436_v58  ;;  %v4482_v58 = vsel %vm221_vm0, %v372_v31, %v373_v33  ;;  %717 = vrot.lane.b32.xlu1 %v4479_v35, %s3542_s7  ;;  %v383_v33 = vrot.slane %v3601_v7, 2  ;;  %v393_v7 = vrot.slane %v3578_v0, 2 }
  0xa7   :  { %8914 = vst [vmem:[#allocation118_spill] sm:$0xff] %v4441_v34  ;;  %715 = vrot.lane.b32.xlu0 %v4482_v58, %s3542_s7 }
  0xa8   :  { %8915 = vst [vmem:[#allocation119_spill] sm:$0xff] %v4466_v13  ;;  %v4487_v13 = vld [vmem:[%s8501_s0 + $0x328] sm:$0x3]  ;;  %v385_v34 = vsel %vm382_vm1, %v383_v33, %v384_v47 }
  0xa9   :  { %8916 = vst [vmem:[#allocation120_spill] sm:$0xff] %v4471_v44  ;;  %v4501_v44 = vpop.permute.xlu1 %633 }
  0xaa   :  { %8917 = vst [vmem:[#allocation121_spill] sm:$0xff] %v4473_v22  ;;  %v4497_v31 = vpop.permute.xlu2 %653  ;;  %v380_v22 = vrot.slane %v4487_v13, 1 }
  0xab   :  { %8918 = vst [vmem:[#allocation122_spill] sm:$0xff] %v4476_v59  ;;  %v4503_v59 = vpop.permute.xlu0 %631 }
  0xac   :  { %8919 = vst [vmem:[#allocation123_spill] sm:$0xff] %v4479_v35  ;;  %v387_v35 = vsel %vm382_vm1, %v384_v47, %v386_v21  ;;  %v389_v21 = vrot.slane %v3595_v5, 2  ;;  %v391_v47 = vrot.slane %v3622_v14, 2  ;;  %v398_v14 = vrot.slane %v3671_v28, 2 }
  0xad   :  { %8920 = vst [vmem:[#allocation124_spill] sm:$0xff] %v4482_v58  ;;  %v4508_v58 = vsel %vm221_vm0, %v378_v46, %v380_v22  ;;  %789 = vrot.lane.b32.xlu2 %v387_v35, %s3543_s6  ;;  %v388_v22 = vrot.slane %v3588_v2, 2  ;;  %v401_v2 = vrot.slane %v3666_v27, 2  ;;  %v409_v27 = vrot.slane %v3695_v37, 2 }
  0xae   :  { %8921 = vst [vmem:[#allocation125_spill] sm:$0xff] %v4497_v31  ;;  %787 = vrot.lane.b32.xlu1 %v385_v34, %s3543_s6  ;;  %v4526_v34 = vsel %vm382_vm1, %v393_v7, %v394_v8  ;;  %v4529_v33 = vsel %vm382_vm1, %v389_v21, %v391_v47  ;;  %v396_v7 = vrot.slane %v3614_v12, 2  ;;  %v4554_v31 = vsel %vm382_vm1, %v398_v14, %v399_v1 }
  0xaf   :  { %8922 = vst [vmem:[#allocation126_spill] sm:$0xff] %v4501_v44  ;;  %721 = vrot.lane.b32.xlu0 %v4508_v58, %s3542_s7  ;;  %v4532_v0 = vsel %vm382_vm1, %v388_v22, %v389_v21  ;;  %v4551_v22 = vsel %vm382_vm1, %v399_v1, %v401_v2  ;;  %v408_v12 = vrot.slane %v3705_v39, 2  ;;  %v404_v1 = vrot.slane %v3656_v25, 2 }
  0xb0   :  { %8923 = vst [vmem:[#allocation127_spill] sm:$0xff] %v4503_v59  ;;  %v4557_v26 = vsel %vm382_vm1, %v394_v8, %v396_v7  ;;  %v406_v8 = vrot.slane %v3710_v40, 2  ;;  %v403_v2 = vrot.slane %v3651_v24, 2  ;;  %v414_v24 = vrot.slane %v3744_v50, 2 }
  0xb1   :  { %8924 = vst [vmem:[#allocation128_spill] sm:$0xff] %v4508_v58  ;;  %v4521_v46 = vpop.permute.xlu1 %639  ;;  %v416_v25 = vrot.slane %v3749_v51, 2  ;;  %v413_v40 = vrot.slane %v3754_v52, 2  ;;  %v424_v51 = vrot.slane %v3779_v61, 2 }
  0xb2   :  { %v4516_v15 = vpop.permute.xlu2 %659  ;;  %8926 = vst [vmem:[#allocation130_spill] sm:$0xff] %v4521_v46  ;;  %v4583_v37 = vsel %vm382_vm1, %v403_v2, %v404_v1 }
  0xb3   :  { %8925 = vst [vmem:[#allocation129_spill] sm:$0xff] %v4516_v15  ;;  %v4523_v35 = vpop.permute.xlu0 %637  ;;  %v4602_v2 = vsel %vm382_vm1, %v414_v24, %v416_v25  ;;  %v418_v25 = vrot.slane %v3734_v48, 2  ;;  %v429_v48 = vrot.slane %v3828_v23, 2  ;;  %v9022_v15 = vld [vmem:[#allocation66_spill] sm:$0xff] }
  0xb4   :  { %8927 = vst [vmem:[#allocation131_spill] sm:$0xff] %v4523_v35  ;;  %v8980_v35 = vld [vmem:[#allocation35_spill] sm:$0xff] }
  0xb5   :  { %795 = vrot.lane.b32.xlu2 %v4526_v34, %s3543_s6  ;;  %8937 = vst [vmem:[#allocation141_spill] sm:$0xff] %v4602_v2 }
  0xb6   :  { %793 = vrot.lane.b32.xlu1 %v4529_v33, %s3543_s6 }
  0xb7   :  { %791 = vrot.lane.b32.xlu0 %v4532_v0, %s3543_s6 }
  0xb9   :  { %v4546_v21 = vpop.permute.xlu1 %645 }
  0xba   :  { %v4542_v5 = vpop.permute.xlu2 %665  ;;  %8929 = vst [vmem:[#allocation133_spill] sm:$0xff] %v4546_v21  ;;  %v4577_v21 = vsel %vm382_vm1, %v408_v12, %v409_v27  ;;  %v411_v12 = vrot.slane %v3700_v38, 2  ;;  %v423_v38 = vrot.slane %v3789_v63, 2 }
  0xbb   :  { %8928 = vst [vmem:[#allocation132_spill] sm:$0xff] %v4542_v5  ;;  %v4548_v47 = vpop.permute.xlu0 %643 }
  0xbc   :  { %8930 = vst [vmem:[#allocation134_spill] sm:$0xff] %v4548_v47  ;;  %v4580_v47 = vsel %vm382_vm1, %v404_v1, %v406_v8  ;;  %v4608_v50 = vsel %vm382_vm1, %v409_v27, %v411_v12  ;;  %v421_v27 = vrot.slane %v3794_v3, 2  ;;  %v428_v3 = vrot.slane %v3838_v30, 2 }
  0xbd   :  { %801 = vrot.lane.b32.xlu2 %v4551_v22, %s3543_s6  ;;  %8939 = vst [vmem:[#allocation143_spill] sm:$0xff] %v4608_v50 }
  0xbe   :  { %799 = vrot.lane.b32.xlu1 %v4554_v31, %s3543_s6 }
  0xbf   :  { %797 = vrot.lane.b32.xlu0 %v4557_v26, %s3543_s6 }
  0xc1   :  { %v4572_v14 = vpop.permute.xlu1 %651 }
  0xc2   :  { %v4567_v28 = vpop.permute.xlu2 %671  ;;  %8932 = vst [vmem:[#allocation136_spill] sm:$0xff] %v4572_v14  ;;  %v4605_v14 = vsel %vm382_vm1, %v413_v40, %v414_v24  ;;  %v419_v24 = vrot.slane %v3739_v49, 2  ;;  %v431_v49 = vrot.slane %v3833_v29, 2  ;;  %v439_v29 = vrot.slane %v3863_v54, 2 }
  0xc3   :  { %8931 = vst [vmem:[#allocation135_spill] sm:$0xff] %v4567_v28  ;;  %v4574_v7 = vpop.permute.xlu0 %649  ;;  %v8979_v28 = vld [vmem:[#allocation43_spill] sm:$0xff] }
  0xc4   :  { %8933 = vst [vmem:[#allocation137_spill] sm:$0xff] %v4574_v7  ;;  %v4634_v61 = vsel %vm382_vm1, %v418_v25, %v419_v24  ;;  %v4653_v25 = vsel %vm382_vm1, %v429_v48, %v431_v49  ;;  %v433_v49 = vrot.slane %v3818_v19, 2  ;;  %v444_v19 = vrot.slane %v3912_v6, 2 }
  0xc5   :  { %807 = vrot.lane.b32.xlu2 %v4577_v21, %s3543_s6  ;;  %8938 = vst [vmem:[#allocation142_spill] sm:$0xff] %v4605_v14 }
  0xc6   :  { %805 = vrot.lane.b32.xlu1 %v4580_v47, %s3543_s6  ;;  %8945 = vst [vmem:[#allocation149_spill] sm:$0xff] %v4634_v61 }
  0xc7   :  { %803 = vrot.lane.b32.xlu0 %v4583_v37, %s3543_s6  ;;  %8949 = vst [vmem:[#allocation153_spill] sm:$0xff] %v4653_v25 }
  0xc9   :  { %v4597_v1 = vpop.permute.xlu1 %657 }
  0xca   :  { %v4593_v39 = vpop.permute.xlu2 %677  ;;  %8935 = vst [vmem:[#allocation139_spill] sm:$0xff] %v4597_v1  ;;  %v4628_v1 = vsel %vm382_vm1, %v423_v38, %v424_v51  ;;  %v426_v38 = vrot.slane %v3784_v62, 2  ;;  %v438_v62 = vrot.slane %v3873_v56, 2 }
  0xcb   :  { %8934 = vst [vmem:[#allocation138_spill] sm:$0xff] %v4593_v39  ;;  %v4599_v8 = vpop.permute.xlu0 %655 }
  0xcc   :  { %8936 = vst [vmem:[#allocation140_spill] sm:$0xff] %v4599_v8  ;;  %v4631_v8 = vsel %vm382_vm1, %v419_v24, %v421_v27  ;;  %v4659_v23 = vsel %vm382_vm1, %v424_v51, %v426_v38  ;;  %v436_v51 = vrot.slane %v3878_v57, 2  ;;  %v443_v57 = vrot.slane %v3922_v4, 2 }
  0xcd   :  { %813 = vrot.lane.b32.xlu2 %v4602_v2, %s3543_s6  ;;  %8943 = vst [vmem:[#allocation147_spill] sm:$0xff] %v4628_v1 }
  0xce   :  { %811 = vrot.lane.b32.xlu1 %v4605_v14, %s3543_s6  ;;  %8944 = vst [vmem:[#allocation148_spill] sm:$0xff] %v4631_v8  ;;  %v4707_v39 = vsel %vm382_vm1, %v443_v57, %v444_v19 }
  0xcf   :  { %809 = vrot.lane.b32.xlu0 %v4608_v50, %s3543_s6  ;;  %8951 = vst [vmem:[#allocation155_spill] sm:$0xff] %v4659_v23 }
  0xd1   :  { %v4623_v40 = vpop.permute.xlu1 %663 }
  0xd2   :  { %v4618_v52 = vpop.permute.xlu2 %683  ;;  %8941 = vst [vmem:[#allocation145_spill] sm:$0xff] %v4623_v40 }
  0xd3   :  { %8940 = vst [vmem:[#allocation144_spill] sm:$0xff] %v4618_v52  ;;  %v4625_v12 = vpop.permute.xlu0 %661  ;;  %v4656_v52 = vsel %vm382_vm1, %v428_v3, %v429_v48  ;;  %v434_v48 = vrot.slane %v3823_v20, 2  ;;  %v446_v20 = vrot.slane %v3917_v32, 2  ;;  %v454_v32 = vrot.slane %v3947_v41, 2 }
  0xd4   :  { %8942 = vst [vmem:[#allocation146_spill] sm:$0xff] %v4625_v12 }
  0xd5   :  { %819 = vrot.lane.b32.xlu2 %v4628_v1, %s3543_s6  ;;  %8950 = vst [vmem:[#allocation154_spill] sm:$0xff] %v4656_v52  ;;  %v4682_v7 = vsel %vm382_vm1, %v434_v48, %v436_v51  ;;  %v4685_v54 = vsel %vm382_vm1, %v433_v49, %v434_v48  ;;  %v4704_v49 = vsel %vm382_vm1, %v444_v19, %v446_v20  ;;  %v449_v19 = vrot.slane %v3907_v43, 2 }
  0xd6   :  { %817 = vrot.lane.b32.xlu1 %v4631_v8, %s3543_s6  ;;  %v448_v20 = vrot.slane %v3902_v42, 2  ;;  %v459_v43 = vrot.slane %v3996_v53, 2  ;;  %v461_v42 = vrot.slane %v4001_v45, 2  ;;  %v8968_v45 = vld [vmem:[#allocation34_spill] sm:$0xff] }
  0xd7   :  { %815 = vrot.lane.b32.xlu0 %v4634_v61, %s3543_s6 }
  0xd8   :  { %v4736_v41 = vsel %vm382_vm1, %v448_v20, %v449_v19  ;;  %v4755_v20 = vsel %vm382_vm1, %v459_v43, %v461_v42 }
  0xd9   :  { %v4648_v24 = vpop.permute.xlu1 %669  ;;  %8965 = vst [vmem:[#allocation169_spill] sm:$0xff] %v4755_v20 }
  0xda   :  { %v4644_v63 = vpop.permute.xlu2 %689  ;;  %8947 = vst [vmem:[#allocation151_spill] sm:$0xff] %v4648_v24 }
  0xdb   :  { %8946 = vst [vmem:[#allocation150_spill] sm:$0xff] %v4644_v63  ;;  %v4650_v27 = vpop.permute.xlu0 %667  ;;  %v4679_v63 = vsel %vm382_vm1, %v438_v62, %v439_v29  ;;  %v441_v62 = vrot.slane %v3868_v55, 2  ;;  %v453_v55 = vrot.slane %v3957_v9, 2 }
  0xdc   :  { %8948 = vst [vmem:[#allocation152_spill] sm:$0xff] %v4650_v27 }
  0xdd   :  { %825 = vrot.lane.b32.xlu2 %v4653_v25, %s3543_s6  ;;  %v4710_v6 = vsel %vm382_vm1, %v439_v29, %v441_v62  ;;  %v451_v29 = vrot.slane %v3962_v11, 2  ;;  %v458_v11 = vrot.slane %v4006_v17, 2  ;;  %v469_v17 = vrot.slane %v8968_v45, 2 }
  0xde   :  { %823 = vrot.lane.b32.xlu1 %v4656_v52, %s3543_s6 }
  0xdf   :  { %821 = vrot.lane.b32.xlu0 %v4659_v23, %s3543_s6 }
  0xe1   :  { %v4674_v3 = vpop.permute.xlu1 %675 }
  0xe2   :  { %v4669_v30 = vpop.permute.xlu2 %695  ;;  %8953 = vst [vmem:[#allocation157_spill] sm:$0xff] %v4674_v3 }
  0xe3   :  { %8952 = vst [vmem:[#allocation156_spill] sm:$0xff] %v4669_v30  ;;  %v4676_v38 = vpop.permute.xlu0 %673 }
  0xe4   :  { %8954 = vst [vmem:[#allocation158_spill] sm:$0xff] %v4676_v38 }
  0xe5   :  { %831 = vrot.lane.b32.xlu2 %v4679_v63, %s3543_s6 }
  0xe6   :  { %829 = vrot.lane.b32.xlu1 %v4682_v7, %s3543_s6 }
  0xe7   :  { %827 = vrot.lane.b32.xlu0 %v4685_v54, %s3543_s6 }
  0xe9   :  { %v4699_v48 = vpop.permute.xlu1 %681 }
  0xea   :  { %v4695_v56 = vpop.permute.xlu2 %701  ;;  %8956 = vst [vmem:[#allocation160_spill] sm:$0xff] %v4699_v48  ;;  %v4730_v48 = vsel %vm382_vm1, %v453_v55, %v454_v32  ;;  %v456_v55 = vrot.slane %v3952_v18, 2  ;;  %v468_v18 = vrot.slane %v4039_v10, 2 }
  0xeb   :  { %8955 = vst [vmem:[#allocation159_spill] sm:$0xff] %v4695_v56  ;;  %v4701_v51 = vpop.permute.xlu0 %679  ;;  %v471_v56 = vrot.slane %v8980_v35, 2  ;;  %v8986_v35 = vld [vmem:[#allocation50_spill] sm:$0xff] }
  0xec   :  { %8957 = vst [vmem:[#allocation161_spill] sm:$0xff] %v4701_v51  ;;  %v4733_v51 = vsel %vm382_vm1, %v449_v19, %v451_v29  ;;  %v4761_v53 = vsel %vm382_vm1, %v454_v32, %v456_v55  ;;  %v8972_v55 = vld [vmem:[#allocation30_spill] sm:$0xff]  ;;  %v4781_v38 = vsel %vm382_vm1, %v468_v18, %v469_v17  ;;  %v473_v18 = vrot.slane %v8979_v28, 2 }
  0xed   :  { %837 = vrot.lane.b32.xlu2 %v4704_v49, %s3543_s6  ;;  %8961 = vst [vmem:[#allocation165_spill] sm:$0xff] %v4730_v48  ;;  %v483_v28 = vrot.slane %v8986_v35, 2 }
  0xee   :  { %835 = vrot.lane.b32.xlu1 %v4707_v39, %s3543_s6  ;;  %8967 = vst [vmem:[#allocation171_spill] sm:$0xff] %v4761_v53 }
  0xef   :  { %833 = vrot.lane.b32.xlu0 %v4710_v6, %s3543_s6  ;;  %8975 = vst [vmem:[#allocation30_spill] sm:$0xff] %v4781_v38 }
  0xf1   :  { %v4725_v57 = vpop.permute.xlu1 %687 }
  0xf2   :  { %v4720_v4 = vpop.permute.xlu2 %707  ;;  %8959 = vst [vmem:[#allocation163_spill] sm:$0xff] %v4725_v57  ;;  %v4758_v57 = vsel %vm382_vm1, %v458_v11, %v459_v43  ;;  %v8970_v43 = vld [vmem:[#allocation31_spill] sm:$0xff] }
  0xf3   :  { %8958 = vst [vmem:[#allocation162_spill] sm:$0xff] %v4720_v4  ;;  %v4727_v62 = vpop.permute.xlu0 %685  ;;  %v464_v11 = vrot.slane %v8970_v43, 2  ;;  %v8977_v43 = vld [vmem:[#allocation42_spill] sm:$0xff] }
  0xf4   :  { %8960 = vst [vmem:[#allocation164_spill] sm:$0xff] %v4727_v62  ;;  %v8971_v62 = vld [vmem:[#allocation36_spill] sm:$0xff] }
  0xf5   :  { %843 = vrot.lane.b32.xlu2 %v4730_v48, %s3543_s6  ;;  %8966 = vst [vmem:[#allocation170_spill] sm:$0xff] %v4758_v57  ;;  %v466_v32 = vrot.slane %v8971_v62, 2  ;;  %v8976_v62 = vld [vmem:[#allocation41_spill] sm:$0xff] }
  0xf6   :  { %841 = vrot.lane.b32.xlu1 %v4733_v51, %s3543_s6  ;;  %v474_v45 = vrot.slane %v8976_v62, 2  ;;  %v8987_v62 = vld [vmem:[#allocation48_spill] sm:$0xff] }
  0xf7   :  { %839 = vrot.lane.b32.xlu0 %v4736_v41, %s3543_s6  ;;  %v467_v46 = vsel %vm382_vm1, %v464_v11, %v466_v32 }
  0xf9   :  { %v4750_v19 = vpop.permute.xlu1 %693 }
  0xfa   :  { %v4746_v9 = vpop.permute.xlu2 %713  ;;  %8963 = vst [vmem:[#allocation167_spill] sm:$0xff] %v4750_v19 }
  0xfb   :  { %8962 = vst [vmem:[#allocation166_spill] sm:$0xff] %v4746_v9  ;;  %v4752_v29 = vpop.permute.xlu0 %691  ;;  %v463_v9 = vrot.slane %v8972_v55, 2  ;;  %v476_v55 = vrot.slane %v8977_v43, 2  ;;  %v484_v43 = vrot.slane %v8987_v62, 2 }
  0xfc   :  { %8964 = vst [vmem:[#allocation168_spill] sm:$0xff] %v4752_v29 }
  0xfd   :  { %849 = vrot.lane.b32.xlu2 %v4755_v20, %s3543_s6  ;;  %v465_v10 = vsel %vm382_vm1, %v463_v9, %v464_v11  ;;  %v4800_v11 = vsel %vm382_vm1, %v474_v45, %v476_v55  ;;  %v4826_v27 = vsel %vm382_vm1, %v483_v28, %v484_v43 }
  0xfe   :  { %847 = vrot.lane.b32.xlu1 %v4758_v57, %s3543_s6  ;;  %8983 = vst [vmem:[#allocation35_spill] sm:$0xff] %v4800_v11 }
  0xff   :  { %845 = vrot.lane.b32.xlu0 %v4761_v53, %s3543_s6 }
 0x101   :  { %v4776_v4 = vpop.permute.xlu1 %699 }
 0x102   :  { %v4771_v42 = vpop.permute.xlu2 %719  ;;  %8973 = vst [vmem:[#allocation31_spill] sm:$0xff] %v4776_v4 }
 0x103   :  { %8969 = vst [vmem:[#allocation34_spill] sm:$0xff] %v4771_v42  ;;  %v4778_v3 = vpop.permute.xlu0 %697 }
 0x104   :  { %8974 = vst [vmem:[#allocation36_spill] sm:$0xff] %v4778_v3 }
 0x105   :  { %855 = vrot.lane.b32.xlu2 %v4781_v38, %s3543_s6 }
 0x106   :  { %853 = vrot.lane.b32.xlu1 %v467_v46, %s3543_s6  ;;  %v4803_v46 = vsel %vm382_vm1, %v473_v18, %v474_v45  ;;  %v8989_v45 = vld [vmem:[#allocation40_spill] sm:$0xff] }
 0x107   :  { %851 = vrot.lane.b32.xlu0 %v465_v10, %s3543_s6  ;;  %8984 = vst [vmem:[#allocation172_spill] sm:$0xff] %v4803_v46  ;;  %v4806_v10 = vsel %vm382_vm1, %v469_v17, %v471_v56  ;;  %v479_v18 = vrot.slane %v8989_v45, 2  ;;  %v8991_v17 = vld [vmem:[#allocation39_spill] sm:$0xff] }
 0x108   :  { %8985 = vst [vmem:[#allocation173_spill] sm:$0xff] %v4806_v10  ;;  %v8998_v45 = vld [vmem:[#allocation59_spill] sm:$0xff] }
 0x109   :  { %v4795_v32 = vpop.permute.xlu1 %705  ;;  %v491_v28 = vrot.slane %v8998_v45, 2 }
 0x10a   :  { %v4791_v42 = vpop.permute.xlu2 %789  ;;  %8981 = vst [vmem:[#allocation42_spill] sm:$0xff] %v4795_v32  ;;  %v8990_v32 = vld [vmem:[#allocation51_spill] sm:$0xff] }
 0x10b   :  { %8978 = vst [vmem:[#allocation41_spill] sm:$0xff] %v4791_v42  ;;  %v4797_v9 = vpop.permute.xlu0 %703  ;;  %v481_v56 = vrot.slane %v8990_v32, 2  ;;  %v8997_v32 = vld [vmem:[#allocation58_spill] sm:$0xff] }
 0x10c   :  { %8982 = vst [vmem:[#allocation43_spill] sm:$0xff] %v4797_v9  ;;  %v478_v9 = vrot.slane %v8991_v17, 2  ;;  %v489_v62 = vrot.slane %v8997_v32, 2 }
 0x10d   :  { %861 = vrot.lane.b32.xlu2 %v4800_v11, %s3543_s6  ;;  %8994 = vst [vmem:[#allocation51_spill] sm:$0xff] %v4826_v27  ;;  %v4829_v44 = vsel %vm382_vm1, %v479_v18, %v481_v56  ;;  %v9000_v56 = vld [vmem:[#allocation60_spill] sm:$0xff] }
 0x10e   :  { %859 = vrot.lane.b32.xlu1 %v4803_v46, %s3543_s6  ;;  %8995 = vst [vmem:[#allocation39_spill] sm:$0xff] %v4829_v44  ;;  %v4832_v35 = vsel %vm382_vm1, %v478_v9, %v479_v18  ;;  %v4851_v3 = vsel %vm382_vm1, %v489_v62, %v491_v28 }
 0x10f   :  { %857 = vrot.lane.b32.xlu0 %v4806_v10, %s3543_s6  ;;  %8996 = vst [vmem:[#allocation174_spill] sm:$0xff] %v4832_v35 }
 0x111   :  { %v4821_v24 = vpop.permute.xlu1 %711 }
 0x112   :  { %v4816_v55 = vpop.permute.xlu2 %795  ;;  %8992 = vst [vmem:[#allocation48_spill] sm:$0xff] %v4821_v24  ;;  %v488_v24 = vrot.slane %v9000_v56, 2 }
 0x113   :  { %8988 = vst [vmem:[#allocation50_spill] sm:$0xff] %v4816_v55  ;;  %v4823_v4 = vpop.permute.xlu0 %709 }
 0x114   :  { %8993 = vst [vmem:[#allocation40_spill] sm:$0xff] %v4823_v4  ;;  %v9001_v4 = vld [vmem:[#allocation49_spill] sm:$0xff]  ;;  %v4854_v5 = vsel %vm382_vm1, %v488_v24, %v489_v62 }
 0x115   :  { %867 = vrot.lane.b32.xlu2 %v4826_v27, %s3543_s6  ;;  %v486_v9 = vrot.slane %v9001_v4, 2  ;;  %9004 = vst [vmem:[#allocation49_spill] sm:$0xff] %v4851_v3  ;;  %v9007_v4 = vld [vmem:[#allocation67_spill] sm:$0xff]  ;;  %v9010_v24 = vld [vmem:[#allocation57_spill] sm:$0xff] }
 0x116   :  { %865 = vrot.lane.b32.xlu1 %v4829_v44, %s3543_s6  ;;  %9005 = vst [vmem:[#allocation175_spill] sm:$0xff] %v4854_v5  ;;  %v498_v45 = vrot.slane %v9007_v4, 2  ;;  %v494_v62 = vrot.slane %v9010_v24, 2 }
 0x117   :  { %863 = vrot.lane.b32.xlu0 %v4832_v35, %s3543_s6  ;;  %v4857_v59 = vsel %vm382_vm1, %v484_v43, %v486_v9  ;;  %v9012_v9 = vld [vmem:[#allocation56_spill] sm:$0xff]  ;;  %v9043_v35 = vld [vmem:[#allocation87_spill] sm:$0xff] }
 0x118   :  { %9006 = vst [vmem:[#allocation176_spill] sm:$0xff] %v4857_v59  ;;  %v493_v30 = vrot.slane %v9012_v9, 2 }
 0x119   :  { %v4846_v18 = vpop.permute.xlu1 %717 }
 0x11a   :  { %v4842_v17 = vpop.permute.xlu2 %801  ;;  %9002 = vst [vmem:[#allocation59_spill] sm:$0xff] %v4846_v18  ;;  %v9008_v18 = vld [vmem:[#allocation65_spill] sm:$0xff]  ;;  %v4883_v29 = vsel %vm382_vm1, %v493_v30, %v494_v62  ;;  %v501_v30 = vrot.slane %v9022_v15, 2  ;;  %v9028_v15 = vld [vmem:[#allocation88_spill] sm:$0xff] }
 0x11b   :  { %8999 = vst [vmem:[#allocation58_spill] sm:$0xff] %v4842_v17  ;;  %v4848_v55 = vpop.permute.xlu0 %715  ;;  %v499_v28 = vrot.slane %v9008_v18, 2  ;;  %v9011_v17 = vld [vmem:[#allocation68_spill] sm:$0xff] }
 0x11c   :  { %9003 = vst [vmem:[#allocation60_spill] sm:$0xff] %v4848_v55  ;;  %v496_v43 = vrot.slane %v9011_v17, 2  ;;  %v9018_v17 = vld [vmem:[#allocation77_spill] sm:$0xff] }
 0x11d   :  { %873 = vrot.lane.b32.xlu2 %v4851_v3, %s3543_s6  ;;  %v4877_v19 = vsel %vm382_vm1, %v498_v45, %v499_v28  ;;  %9017 = vst [vmem:[#allocation177_spill] sm:$0xff] %v4883_v29  ;;  %v504_v24 = vrot.slane %v9018_v17, 2 }
 0x11e   :  { %871 = vrot.lane.b32.xlu1 %v4854_v5, %s3543_s6  ;;  %9015 = vst [vmem:[#allocation68_spill] sm:$0xff] %v4877_v19  ;;  %v4880_v12 = vsel %vm382_vm1, %v494_v62, %v496_v43  ;;  %v9021_v43 = vld [vmem:[#allocation79_spill] sm:$0xff] }
 0x11f   :  { %869 = vrot.lane.b32.xlu0 %v4857_v59, %s3543_s6  ;;  %9016 = vst [vmem:[#allocation56_spill] sm:$0xff] %v4880_v12 }
 0x121   :  { %v4872_v40 = vpop.permute.xlu1 %787 }
 0x122   :  { %v4867_v55 = vpop.permute.xlu2 %807  ;;  %9013 = vst [vmem:[#allocation65_spill] sm:$0xff] %v4872_v40  ;;  %v503_v40 = vrot.slane %v9021_v43, 2 }
 0x123   :  { %9009 = vst [vmem:[#allocation67_spill] sm:$0xff] %v4867_v55  ;;  %v4874_v42 = vpop.permute.xlu0 %721 }
 0x124   :  { %9014 = vst [vmem:[#allocation57_spill] sm:$0xff] %v4874_v42  ;;  %v9019_v42 = vld [vmem:[#allocation78_spill] sm:$0xff] }
 0x125   :  { %879 = vrot.lane.b32.xlu2 %v4877_v19, %s3543_s6  ;;  %v506_v45 = vrot.slane %v9019_v42, 2  ;;  %v513_v42 = vrot.slane %v9028_v15, 2 }
 0x126   :  { %877 = vrot.lane.b32.xlu1 %v4880_v12, %s3543_s6  ;;  %v4905_v12 = vsel %vm382_vm1, %v503_v40, %v504_v24  ;;  %v9031_v40 = vld [vmem:[#allocation76_spill] sm:$0xff] }
 0x127   :  { %875 = vrot.lane.b32.xlu0 %v4883_v29, %s3543_s6  ;;  %v4902_v19 = vsel %vm382_vm1, %v504_v24, %v506_v45  ;;  %9026 = vst [vmem:[#allocation178_spill] sm:$0xff] %v4905_v12  ;;  %v4908_v29 = vsel %vm382_vm1, %v499_v28, %v501_v30  ;;  %v509_v24 = vrot.slane %v9031_v40, 2  ;;  %v9033_v30 = vld [vmem:[#allocation75_spill] sm:$0xff] }
 0x128   :  { %9025 = vst [vmem:[#allocation66_spill] sm:$0xff] %v4902_v19  ;;  %v508_v27 = vrot.slane %v9033_v30, 2 }
 0x129   :  { %v4897_v62 = vpop.permute.xlu1 %793  ;;  %9027 = vst [vmem:[#allocation179_spill] sm:$0xff] %v4908_v29 }
 0x12a   :  { %v4893_v55 = vpop.permute.xlu2 %813  ;;  %9023 = vst [vmem:[#allocation78_spill] sm:$0xff] %v4897_v62  ;;  %v4934_v5 = vsel %vm382_vm1, %v508_v27, %v509_v24  ;;  %v516_v27 = vrot.slane %v9043_v35, 2 }
 0x12b   :  { %9020 = vst [vmem:[#allocation77_spill] sm:$0xff] %v4893_v55  ;;  %v4899_v3 = vpop.permute.xlu0 %791  ;;  %v9029_v55 = vld [vmem:[#allocation86_spill] sm:$0xff] }
 0x12c   :  { %9024 = vst [vmem:[#allocation79_spill] sm:$0xff] %v4899_v3  ;;  %v514_v45 = vrot.slane %v9029_v55, 2  ;;  %v9032_v3 = vld [vmem:[#allocation89_spill] sm:$0xff] }
 0x12d   :  { %885 = vrot.lane.b32.xlu2 %v4902_v19, %s3543_s6  ;;  %v511_v28 = vrot.slane %v9032_v3, 2  ;;  %9038 = vst [vmem:[#allocation180_spill] sm:$0xff] %v4934_v5  ;;  %v9039_v3 = vld [vmem:[#allocation98_spill] sm:$0xff] }
 0x12e   :  { %883 = vrot.lane.b32.xlu1 %v4905_v12, %s3543_s6  ;;  %v4928_v12 = vsel %vm382_vm1, %v513_v42, %v514_v45 }
 0x12f   :  { %881 = vrot.lane.b32.xlu0 %v4908_v29, %s3543_s6  ;;  %9036 = vst [vmem:[#allocation89_spill] sm:$0xff] %v4928_v12  ;;  %v4931_v29 = vsel %vm382_vm1, %v509_v24, %v511_v28  ;;  %v9042_v28 = vld [vmem:[#allocation100_spill] sm:$0xff] }
 0x130   :  { %9037 = vst [vmem:[#allocation75_spill] sm:$0xff] %v4931_v29  ;;  %v518_v11 = vrot.slane %v9042_v28, 2 }
 0x131   :  { %v4923_v59 = vpop.permute.xlu1 %799 }
 0x132   :  { %v4918_v62 = vpop.permute.xlu2 %819  ;;  %9034 = vst [vmem:[#allocation86_spill] sm:$0xff] %v4923_v59  ;;  %v519_v59 = vrot.slane %v9039_v3, 2 }
 0x133   :  { %9030 = vst [vmem:[#allocation88_spill] sm:$0xff] %v4918_v62  ;;  %v4925_v19 = vpop.permute.xlu0 %797 }
 0x134   :  { %9035 = vst [vmem:[#allocation76_spill] sm:$0xff] %v4925_v19  ;;  %v9040_v19 = vld [vmem:[#allocation99_spill] sm:$0xff] }
 0x135   :  { %891 = vrot.lane.b32.xlu2 %v4928_v12, %s3543_s6  ;;  %v521_v42 = vrot.slane %v9040_v19, 2  ;;  %v9049_v19 = vld [vmem:[#allocation109_spill] sm:$0xff] }
 0x136   :  { %889 = vrot.lane.b32.xlu1 %v4931_v29, %s3543_s6  ;;  %v4956_v29 = vsel %vm382_vm1, %v518_v11, %v519_v59  ;;  %v528_v35 = vrot.slane %v9049_v19, 2 }
 0x137   :  { %887 = vrot.lane.b32.xlu0 %v4934_v5, %s3543_s6  ;;  %v4953_v12 = vsel %vm382_vm1, %v519_v59, %v521_v42  ;;  %9047 = vst [vmem:[#allocation181_spill] sm:$0xff] %v4956_v29  ;;  %v4959_v5 = vsel %vm382_vm1, %v514_v45, %v516_v27  ;;  %v9052_v59 = vld [vmem:[#allocation97_spill] sm:$0xff]  ;;  %v9054_v27 = vld [vmem:[#allocation96_spill] sm:$0xff] }
 0x138   :  { %9046 = vst [vmem:[#allocation87_spill] sm:$0xff] %v4953_v12  ;;  %v524_v11 = vrot.slane %v9052_v59, 2  ;;  %v523_v38 = vrot.slane %v9054_v27, 2 }
 0x139   :  { %v4948_v24 = vpop.permute.xlu1 %805  ;;  %9048 = vst [vmem:[#allocation182_spill] sm:$0xff] %v4959_v5 }
 0x13a   :  { %v4944_v62 = vpop.permute.xlu2 %825  ;;  %9044 = vst [vmem:[#allocation99_spill] sm:$0xff] %v4948_v24  ;;  %v9050_v24 = vld [vmem:[#allocation107_spill] sm:$0xff]  ;;  %v4985_v46 = vsel %vm382_vm1, %v523_v38, %v524_v11 }
 0x13b   :  { %9041 = vst [vmem:[#allocation98_spill] sm:$0xff] %v4944_v62  ;;  %v4950_v44 = vpop.permute.xlu0 %803  ;;  %v529_v42 = vrot.slane %v9050_v24, 2  ;;  %v9053_v62 = vld [vmem:[#allocation110_spill] sm:$0xff] }
 0x13c   :  { %9045 = vst [vmem:[#allocation100_spill] sm:$0xff] %v4950_v44  ;;  %v526_v45 = vrot.slane %v9053_v62, 2  ;;  %v534_v62 = vrot.slane %v4446_v36, 2 }
 0x13d   :  { %897 = vrot.lane.b32.xlu2 %v4953_v12, %s3543_s6  ;;  %9059 = vst [vmem:[#allocation183_spill] sm:$0xff] %v4985_v46 }
 0x13e   :  { %895 = vrot.lane.b32.xlu1 %v4956_v29, %s3543_s6  ;;  %v4979_v29 = vsel %vm382_vm1, %v528_v35, %v529_v42  ;;  %v536_v35 = vrot.slane %v4451_v60, 2 }
 0x13f   :  { %893 = vrot.lane.b32.xlu0 %v4959_v5, %s3543_s6  ;;  %9057 = vst [vmem:[#allocation110_spill] sm:$0xff] %v4979_v29  ;;  %v4982_v5 = vsel %vm382_vm1, %v524_v11, %v526_v45  ;;  %v533_v45 = vrot.slane %v4456_v16, 2 }
 0x140   :  { %9058 = vst [vmem:[#allocation96_spill] sm:$0xff] %v4982_v5 }
 0x141   :  { %v4974_v10 = vpop.permute.xlu1 %811 }
 0x142   :  { %v4969_v44 = vpop.permute.xlu2 %831  ;;  %9055 = vst [vmem:[#allocation107_spill] sm:$0xff] %v4974_v10 }
 0x143   :  { %9051 = vst [vmem:[#allocation109_spill] sm:$0xff] %v4969_v44  ;;  %v4976_v12 = vpop.permute.xlu0 %809 }
 0x144   :  { %9056 = vst [vmem:[#allocation97_spill] sm:$0xff] %v4976_v12  ;;  %v9061_v12 = vld [vmem:[#allocation108_spill] sm:$0xff] }
 0x145   :  { %903 = vrot.lane.b32.xlu2 %v4979_v29, %s3543_s6  ;;  %v531_v38 = vrot.slane %v9061_v12, 2  ;;  %v5004_v29 = vsel %vm382_vm1, %v534_v62, %v536_v35  ;;  %v9067_v12 = vld [vmem:[#allocation118_spill] sm:$0xff] }
 0x146   :  { %901 = vrot.lane.b32.xlu1 %v4982_v5, %s3543_s6  ;;  %9064 = vst [vmem:[#allocation186_spill] sm:$0xff] %v5004_v29  ;;  %v5007_v5 = vsel %vm382_vm1, %v533_v45, %v534_v62  ;;  %v539_v35 = vrot.slane %v9067_v12, 2  ;;  %v9068_v62 = vld [vmem:[#allocation117_spill] sm:$0xff] }
 0x147   :  { %899 = vrot.lane.b32.xlu0 %v4985_v46, %s3543_s6  ;;  %9065 = vst [vmem:[#allocation187_spill] sm:$0xff] %v5007_v5  ;;  %v5010_v46 = vsel %vm382_vm1, %v529_v42, %v531_v38  ;;  %v538_v45 = vrot.slane %v9068_v62, 2 }
 0x149   :  { %v4999_v11 = vpop.permute.xlu1 %817 }
 0x14a   :  { %v4995_v10 = vpop.permute.xlu2 %837  ;;  %9062 = vst [vmem:[#allocation108_spill] sm:$0xff] %v4999_v11  ;;  %v541_v11 = vrot.slane %v4487_v13, 2 }
 0x14b   :  { %9060 = vst [vmem:[#allocation184_spill] sm:$0xff] %v4995_v10  ;;  %v5001_v44 = vpop.permute.xlu0 %815  ;;  %v5031_v10 = vsel %vm382_vm1, %v538_v45, %v539_v35  ;;  %v3423_v45 = vld [vmem:[%s8501_s0 + $0x20] sm:$0xff] }
 0x14c   :  { %9063 = vst [vmem:[#allocation185_spill] sm:$0xff] %v5001_v44  ;;  %v5028_v38 = vsel %vm382_vm1, %v539_v35, %v541_v11  ;;  %v5050_v35 = vld [vmem:[%s8501_s0 + $0x38] sm:$0xff] }
 0x14d   :  { %909 = vrot.lane.b32.xlu2 %v5004_v29, %s3543_s6  ;;  %9071 = vst [vmem:[#allocation189_spill] sm:$0xff] %v5028_v38  ;;  %v5338_v29 = vld [vmem:[%s8501_s0 + $0x1f8] sm:$0xff] }
 0x14e   :  { %907 = vrot.lane.b32.xlu1 %v5007_v5, %s3543_s6  ;;  %9072 = vst [vmem:[#allocation190_spill] sm:$0xff] %v5031_v10 }
 0x14f   :  { %905 = vrot.lane.b32.xlu0 %v5010_v46, %s3543_s6  ;;  %9076 = vst [vmem:[#allocation194_spill] sm:$0xff] %v5050_v35 }
 0x150   :  { %9137 = vst [vmem:[#allocation255_spill] sm:$0xff] %v5338_v29 }
 0x151   :  { %v5023_v44 = vpop.permute.xlu1 %823 }
 0x152   :  { %v5018_v60 = vpop.permute.xlu2 %843  ;;  %9069 = vst [vmem:[#allocation118_spill] sm:$0xff] %v5023_v44 }
 0x153   :  { %9066 = vst [vmem:[#allocation188_spill] sm:$0xff] %v5018_v60  ;;  %v5025_v42 = vpop.permute.xlu0 %821  ;;  %v3420_v60 = vld [vmem:[%s8501_s0 + $0x18] sm:$0xff] }
 0x154   :  { %9070 = vst [vmem:[#allocation117_spill] sm:$0xff] %v5025_v42  ;;  %v5074_v42 = vld [vmem:[%s8501_s0 + $0x60] sm:$0xff] }
 0x155   :  { %979 = vrot.lane.b32.xlu2 %v3420_v60, %s3544_s9  ;;  %v5057_v60 = vld [vmem:[%s8501_s0 + $0x30] sm:$0xff]  ;;  %9081 = vst [vmem:[#allocation199_spill] sm:$0xff] %v5074_v42 }
 0x156   :  { %913 = vrot.lane.b32.xlu1 %v5028_v38, %s3543_s6  ;;  %9077 = vst [vmem:[#allocation195_spill] sm:$0xff] %v5057_v60 }
 0x157   :  { %911 = vrot.lane.b32.xlu0 %v5031_v10, %s3543_s6 }
 0x159   :  { %v5043_v11 = vpop.permute.xlu1 %829 }
 0x15a   :  { %v5041_v13 = vpop.permute.xlu2 %849  ;;  %9074 = vst [vmem:[#allocation192_spill] sm:$0xff] %v5043_v11 }
 0x15b   :  { %9073 = vst [vmem:[#allocation191_spill] sm:$0xff] %v5041_v13  ;;  %v5045_v44 = vpop.permute.xlu0 %827 }
 0x15c   :  { %9075 = vst [vmem:[#allocation193_spill] sm:$0xff] %v5045_v44 }
 0x15d   :  { %985 = vrot.lane.b32.xlu2 %v5050_v35, %s3544_s9  ;;  %v5081_v35 = vld [vmem:[%s8501_s0 + $0x50] sm:$0xff] }
 0x15e   :  { %983 = vrot.lane.b32.xlu1 %v5057_v60, %s3544_s9  ;;  %9082 = vst [vmem:[#allocation200_spill] sm:$0xff] %v5081_v35  ;;  %v5317_v60 = vld [vmem:[%s8501_s0 + $0x188] sm:$0xff] }
 0x15f   :  { %981 = vrot.lane.b32.xlu0 %v3423_v45, %s3544_s9  ;;  %v5088_v45 = vld [vmem:[%s8501_s0 + $0x48] sm:$0xff] }
 0x160   :  { %9083 = vst [vmem:[#allocation201_spill] sm:$0xff] %v5088_v45 }
 0x161   :  { %v5067_v11 = vpop.permute.xlu1 %835 }
 0x162   :  { %v5065_v13 = vpop.permute.xlu2 %855  ;;  %9079 = vst [vmem:[#allocation197_spill] sm:$0xff] %v5067_v11 }
 0x163   :  { %9078 = vst [vmem:[#allocation196_spill] sm:$0xff] %v5065_v13  ;;  %v5069_v44 = vpop.permute.xlu0 %833 }
 0x164   :  { %9080 = vst [vmem:[#allocation198_spill] sm:$0xff] %v5069_v44 }
 0x165   :  { %991 = vrot.lane.b32.xlu2 %v5074_v42, %s3544_s9  ;;  %v5101_v42 = vld [vmem:[%s8501_s0 + $0x80] sm:$0xff] }
 0x166   :  { %989 = vrot.lane.b32.xlu1 %v5081_v35, %s3544_s9  ;;  %9087 = vst [vmem:[#allocation205_spill] sm:$0xff] %v5101_v42  ;;  %v5108_v35 = vld [vmem:[%s8501_s0 + $0x78] sm:$0xff] }
 0x167   :  { %987 = vrot.lane.b32.xlu0 %v5088_v45, %s3544_s9  ;;  %9088 = vst [vmem:[#allocation206_spill] sm:$0xff] %v5108_v35  ;;  %v5128_v45 = vld [vmem:[%s8501_s0 + $0xa8] sm:$0xff] }
 0x168   :  { %9093 = vst [vmem:[#allocation211_spill] sm:$0xff] %v5128_v45 }
 0x169   :  { %v5094_v44 = vpop.permute.xlu1 %841 }
 0x16a   :  { %v5092_v11 = vpop.permute.xlu2 %861  ;;  %9085 = vst [vmem:[#allocation203_spill] sm:$0xff] %v5094_v44  ;;  %v5115_v44 = vld [vmem:[%s8501_s0 + $0x68] sm:$0xff] }
 0x16b   :  { %9084 = vst [vmem:[#allocation202_spill] sm:$0xff] %v5092_v11  ;;  %v5096_v13 = vpop.permute.xlu0 %839 }
 0x16c   :  { %9086 = vst [vmem:[#allocation204_spill] sm:$0xff] %v5096_v13 }
 0x16d   :  { %997 = vrot.lane.b32.xlu2 %v5101_v42, %s3544_s9  ;;  %9089 = vst [vmem:[#allocation207_spill] sm:$0xff] %v5115_v44 }
 0x16e   :  { %995 = vrot.lane.b32.xlu1 %v5108_v35, %s3544_s9  ;;  %v5135_v35 = vld [vmem:[%s8501_s0 + $0x98] sm:$0xff] }
 0x16f   :  { %993 = vrot.lane.b32.xlu0 %v5115_v44, %s3544_s9  ;;  %9094 = vst [vmem:[#allocation212_spill] sm:$0xff] %v5135_v35  ;;  %v5155_v44 = vld [vmem:[%s8501_s0 + $0xc8] sm:$0xff] }
 0x170   :  { %9099 = vst [vmem:[#allocation217_spill] sm:$0xff] %v5155_v44 }
 0x171   :  { %v5121_v11 = vpop.permute.xlu1 %847 }
 0x172   :  { %v5119_v13 = vpop.permute.xlu2 %867  ;;  %9091 = vst [vmem:[#allocation209_spill] sm:$0xff] %v5121_v11  ;;  %v5142_v11 = vld [vmem:[%s8501_s0 + $0x90] sm:$0xff] }
 0x173   :  { %9090 = vst [vmem:[#allocation208_spill] sm:$0xff] %v5119_v13  ;;  %v5123_v42 = vpop.permute.xlu0 %845 }
 0x174   :  { %9092 = vst [vmem:[#allocation210_spill] sm:$0xff] %v5123_v42 }
 0x175   :  { %1003 = vrot.lane.b32.xlu2 %v5128_v45, %s3544_s9  ;;  %9095 = vst [vmem:[#allocation213_spill] sm:$0xff] %v5142_v11 }
 0x176   :  { %1001 = vrot.lane.b32.xlu1 %v5135_v35, %s3544_s9  ;;  %v5162_v35 = vld [vmem:[%s8501_s0 + $0xc0] sm:$0xff] }
 0x177   :  { %999 = vrot.lane.b32.xlu0 %v5142_v11, %s3544_s9  ;;  %9100 = vst [vmem:[#allocation218_spill] sm:$0xff] %v5162_v35  ;;  %v5182_v11 = vld [vmem:[%s8501_s0 + $0xf0] sm:$0xff] }
 0x178   :  { %9105 = vst [vmem:[#allocation223_spill] sm:$0xff] %v5182_v11 }
 0x179   :  { %v5148_v13 = vpop.permute.xlu1 %853 }
 0x17a   :  { %v5146_v42 = vpop.permute.xlu2 %873  ;;  %9097 = vst [vmem:[#allocation215_spill] sm:$0xff] %v5148_v13 }
 0x17b   :  { %9096 = vst [vmem:[#allocation214_spill] sm:$0xff] %v5146_v42  ;;  %v5150_v45 = vpop.permute.xlu0 %851  ;;  %v5169_v42 = vld [vmem:[%s8501_s0 + $0xb0] sm:$0xff] }
 0x17c   :  { %9098 = vst [vmem:[#allocation216_spill] sm:$0xff] %v5150_v45 }
 0x17d   :  { %1009 = vrot.lane.b32.xlu2 %v5155_v44, %s3544_s9  ;;  %9101 = vst [vmem:[#allocation219_spill] sm:$0xff] %v5169_v42 }
 0x17e   :  { %1007 = vrot.lane.b32.xlu1 %v5162_v35, %s3544_s9  ;;  %v5189_v35 = vld [vmem:[%s8501_s0 + $0xe0] sm:$0xff] }
 0x17f   :  { %1005 = vrot.lane.b32.xlu0 %v5169_v42, %s3544_s9  ;;  %9106 = vst [vmem:[#allocation224_spill] sm:$0xff] %v5189_v35  ;;  %v5209_v42 = vld [vmem:[%s8501_s0 + $0x110] sm:$0xff] }
 0x180   :  { %9111 = vst [vmem:[#allocation229_spill] sm:$0xff] %v5209_v42 }
 0x181   :  { %v5175_v45 = vpop.permute.xlu1 %859 }
 0x182   :  { %v5173_v13 = vpop.permute.xlu2 %879  ;;  %9103 = vst [vmem:[#allocation221_spill] sm:$0xff] %v5175_v45 }
 0x183   :  { %9102 = vst [vmem:[#allocation220_spill] sm:$0xff] %v5173_v13  ;;  %v5177_v44 = vpop.permute.xlu0 %857  ;;  %v5196_v13 = vld [vmem:[%s8501_s0 + $0xd8] sm:$0xff] }
 0x184   :  { %9104 = vst [vmem:[#allocation222_spill] sm:$0xff] %v5177_v44 }
 0x185   :  { %1015 = vrot.lane.b32.xlu2 %v5182_v11, %s3544_s9  ;;  %9107 = vst [vmem:[#allocation225_spill] sm:$0xff] %v5196_v13 }
 0x186   :  { %1013 = vrot.lane.b32.xlu1 %v5189_v35, %s3544_s9  ;;  %v5216_v35 = vld [vmem:[%s8501_s0 + $0x108] sm:$0xff] }
 0x187   :  { %1011 = vrot.lane.b32.xlu0 %v5196_v13, %s3544_s9  ;;  %9112 = vst [vmem:[#allocation230_spill] sm:$0xff] %v5216_v35  ;;  %v5236_v13 = vld [vmem:[%s8501_s0 + $0x138] sm:$0xff] }
 0x188   :  { %9117 = vst [vmem:[#allocation235_spill] sm:$0xff] %v5236_v13 }
 0x189   :  { %v5202_v44 = vpop.permute.xlu1 %865 }
 0x18a   :  { %v5200_v45 = vpop.permute.xlu2 %885  ;;  %9109 = vst [vmem:[#allocation227_spill] sm:$0xff] %v5202_v44  ;;  %v5223_v44 = vld [vmem:[%s8501_s0 + $0xf8] sm:$0xff] }
 0x18b   :  { %9108 = vst [vmem:[#allocation226_spill] sm:$0xff] %v5200_v45  ;;  %v5204_v11 = vpop.permute.xlu0 %863 }
 0x18c   :  { %9110 = vst [vmem:[#allocation228_spill] sm:$0xff] %v5204_v11 }
 0x18d   :  { %1021 = vrot.lane.b32.xlu2 %v5209_v42, %s3544_s9  ;;  %9113 = vst [vmem:[#allocation231_spill] sm:$0xff] %v5223_v44 }
 0x18e   :  { %1019 = vrot.lane.b32.xlu1 %v5216_v35, %s3544_s9  ;;  %v5243_v35 = vld [vmem:[%s8501_s0 + $0x128] sm:$0xff] }
 0x18f   :  { %1017 = vrot.lane.b32.xlu0 %v5223_v44, %s3544_s9  ;;  %9118 = vst [vmem:[#allocation236_spill] sm:$0xff] %v5243_v35  ;;  %v5263_v44 = vld [vmem:[%s8501_s0 + $0x158] sm:$0xff] }
 0x190   :  { %9123 = vst [vmem:[#allocation241_spill] sm:$0xff] %v5263_v44 }
 0x191   :  { %v5229_v45 = vpop.permute.xlu1 %871 }
 0x192   :  { %v5227_v11 = vpop.permute.xlu2 %891  ;;  %9115 = vst [vmem:[#allocation233_spill] sm:$0xff] %v5229_v45  ;;  %v5250_v45 = vld [vmem:[%s8501_s0 + $0x120] sm:$0xff] }
 0x193   :  { %9114 = vst [vmem:[#allocation232_spill] sm:$0xff] %v5227_v11  ;;  %v5231_v42 = vpop.permute.xlu0 %869 }
 0x194   :  { %9116 = vst [vmem:[#allocation234_spill] sm:$0xff] %v5231_v42 }
 0x195   :  { %1027 = vrot.lane.b32.xlu2 %v5236_v13, %s3544_s9  ;;  %9119 = vst [vmem:[#allocation237_spill] sm:$0xff] %v5250_v45 }
 0x196   :  { %1025 = vrot.lane.b32.xlu1 %v5243_v35, %s3544_s9  ;;  %v5270_v35 = vld [vmem:[%s8501_s0 + $0x150] sm:$0xff] }
 0x197   :  { %1023 = vrot.lane.b32.xlu0 %v5250_v45, %s3544_s9  ;;  %9124 = vst [vmem:[#allocation242_spill] sm:$0xff] %v5270_v35  ;;  %v5290_v45 = vld [vmem:[%s8501_s0 + $0x180] sm:$0xff] }
 0x199   :  { %v5256_v11 = vpop.permute.xlu1 %877 }
 0x19a   :  { %v5254_v42 = vpop.permute.xlu2 %897  ;;  %9121 = vst [vmem:[#allocation239_spill] sm:$0xff] %v5256_v11  ;;  %v5277_v11 = vld [vmem:[%s8501_s0 + $0x140] sm:$0xff] }
 0x19b   :  { %9120 = vst [vmem:[#allocation238_spill] sm:$0xff] %v5254_v42  ;;  %v5258_v13 = vpop.permute.xlu0 %875 }
 0x19c   :  { %9122 = vst [vmem:[#allocation240_spill] sm:$0xff] %v5258_v13 }
 0x19d   :  { %1033 = vrot.lane.b32.xlu2 %v5263_v44, %s3544_s9  ;;  %9125 = vst [vmem:[#allocation243_spill] sm:$0xff] %v5277_v11 }
 0x19e   :  { %1031 = vrot.lane.b32.xlu1 %v5270_v35, %s3544_s9  ;;  %v5297_v35 = vld [vmem:[%s8501_s0 + $0x170] sm:$0xff] }
 0x19f   :  { %1029 = vrot.lane.b32.xlu0 %v5277_v11, %s3544_s9  ;;  %9129 = vst [vmem:[#allocation247_spill] sm:$0xff] %v5297_v35 }
 0x1a1   :  { %v5283_v42 = vpop.permute.xlu1 %883 }
 0x1a2   :  { %v5281_v13 = vpop.permute.xlu2 %903  ;;  %9127 = vst [vmem:[#allocation245_spill] sm:$0xff] %v5283_v42 }
 0x1a3   :  { %9126 = vst [vmem:[#allocation244_spill] sm:$0xff] %v5281_v13  ;;  %v5285_v44 = vpop.permute.xlu0 %881 }
 0x1a4   :  { %9128 = vst [vmem:[#allocation246_spill] sm:$0xff] %v5285_v44  ;;  %v5304_v44 = vld [vmem:[%s8501_s0 + $0x168] sm:$0xff] }
 0x1a5   :  { %1039 = vrot.lane.b32.xlu2 %v5290_v45, %s3544_s9  ;;  %9130 = vst [vmem:[#allocation248_spill] sm:$0xff] %v5304_v44 }
 0x1a6   :  { %1037 = vrot.lane.b32.xlu1 %v5297_v35, %s3544_s9  ;;  %v3450_v35 = vld [vmem:[%s8501_s0 + $0x1d0] sm:$0xff] }
 0x1a7   :  { %1035 = vrot.lane.b32.xlu0 %v5304_v44, %s3544_s9  ;;  %v3451_v44 = vld [vmem:[%s8501_s0 + $0x1c8] sm:$0xff] }
 0x1a9   :  { %v5310_v42 = vpop.permute.xlu1 %889 }
 0x1aa   :  { %v5308_v13 = vpop.permute.xlu2 %909  ;;  %9132 = vst [vmem:[#allocation250_spill] sm:$0xff] %v5310_v42 }
 0x1ab   :  { %9131 = vst [vmem:[#allocation249_spill] sm:$0xff] %v5308_v13  ;;  %v5312_v11 = vpop.permute.xlu0 %887 }
 0x1ac   :  { %9133 = vst [vmem:[#allocation251_spill] sm:$0xff] %v5312_v11 }
 0x1ad   :  { %1045 = vrot.lane.b32.xlu2 %v3450_v35, %s3544_s9  ;;  %v5352_v35 = vld [vmem:[%s8501_s0 + $0x1e0] sm:$0xff] }
 0x1ae   :  { %1043 = vrot.lane.b32.xlu1 %v3451_v44, %s3544_s9  ;;  %v5345_v44 = vld [vmem:[%s8501_s0 + $0x1e8] sm:$0xff]  ;;  %9139 = vst [vmem:[#allocation257_spill] sm:$0xff] %v5352_v35 }
 0x1af   :  { %1041 = vrot.lane.b32.xlu0 %v5317_v60, %s3544_s9  ;;  %9138 = vst [vmem:[#allocation256_spill] sm:$0xff] %v5345_v44 }
 0x1b1   :  { %v5331_v42 = vpop.permute.xlu1 %895 }
 0x1b2   :  { %v5329_v13 = vpop.permute.xlu2 %979  ;;  %9135 = vst [vmem:[#allocation253_spill] sm:$0xff] %v5331_v42 }
 0x1b3   :  { %9134 = vst [vmem:[#allocation252_spill] sm:$0xff] %v5329_v13  ;;  %v5333_v11 = vpop.permute.xlu0 %893 }
 0x1b4   :  { %9136 = vst [vmem:[#allocation254_spill] sm:$0xff] %v5333_v11 }
 0x1b5   :  { %1051 = vrot.lane.b32.xlu2 %v5338_v29, %s3544_s9  ;;  %v5365_v29 = vld [vmem:[%s8501_s0 + $0x218] sm:$0xff] }
 0x1b6   :  { %1049 = vrot.lane.b32.xlu1 %v5345_v44, %s3544_s9  ;;  %9143 = vst [vmem:[#allocation261_spill] sm:$0xff] %v5365_v29  ;;  %v5372_v44 = vld [vmem:[%s8501_s0 + $0x210] sm:$0xff] }
 0x1b7   :  { %1047 = vrot.lane.b32.xlu0 %v5352_v35, %s3544_s9  ;;  %9144 = vst [vmem:[#allocation262_spill] sm:$0xff] %v5372_v44 }
 0x1b9   :  { %v5358_v11 = vpop.permute.xlu1 %901 }
 0x1ba   :  { %v5356_v42 = vpop.permute.xlu2 %985  ;;  %9141 = vst [vmem:[#allocation259_spill] sm:$0xff] %v5358_v11  ;;  %v5379_v11 = vld [vmem:[%s8501_s0 + $0x200] sm:$0xff] }
 0x1bb   :  { %9140 = vst [vmem:[#allocation258_spill] sm:$0xff] %v5356_v42  ;;  %v5360_v13 = vpop.permute.xlu0 %899 }
 0x1bc   :  { %9142 = vst [vmem:[#allocation260_spill] sm:$0xff] %v5360_v13 }
 0x1bd   :  { %1057 = vrot.lane.b32.xlu2 %v5365_v29, %s3544_s9  ;;  %9145 = vst [vmem:[#allocation263_spill] sm:$0xff] %v5379_v11 }
 0x1be   :  { %1055 = vrot.lane.b32.xlu1 %v5372_v44, %s3544_s9 }
 0x1bf   :  { %1053 = vrot.lane.b32.xlu0 %v5379_v11, %s3544_s9 }
 0x1c1   :  { %v5385_v42 = vpop.permute.xlu1 %907 }
 0x1c2   :  { %v5383_v13 = vpop.permute.xlu2 %991  ;;  %9147 = vst [vmem:[#allocation265_spill] sm:$0xff] %v5385_v42  ;;  %v9175_v42 = vld [vmem:[#allocation3_spill] sm:$0xff] }
 0x1c3   :  { %9146 = vst [vmem:[#allocation264_spill] sm:$0xff] %v5383_v13  ;;  %v5387_v29 = vpop.permute.xlu0 %905 }
 0x1c4   :  { %9148 = vst [vmem:[#allocation266_spill] sm:$0xff] %v5387_v29  ;;  %v9180_v29 = vld [vmem:[#allocation8_spill] sm:$0xff] }
 0x1c5   :  { %1063 = vrot.lane.b32.xlu2 %v9012_v9, %s3544_s9  ;;  %v5408_v9 = vld [vmem:[%s8501_s0 + $0x248] sm:$0xff] }
 0x1c6   :  { %1061 = vrot.lane.b32.xlu1 %v8997_v32, %s3544_s9 }
 0x1c7   :  { %1059 = vrot.lane.b32.xlu0 %v9000_v56, %s3544_s9 }
 0x1c9   :  { %v5397_v35 = vpop.permute.xlu1 %913 }
 0x1ca   :  { %v5395_v44 = vpop.permute.xlu2 %997  ;;  %9150 = vst [vmem:[#allocation268_spill] sm:$0xff] %v5397_v35 }
 0x1cb   :  { %9149 = vst [vmem:[#allocation267_spill] sm:$0xff] %v5395_v44  ;;  %v5399_v11 = vpop.permute.xlu0 %911 }
 0x1cc   :  { %9151 = vst [vmem:[#allocation269_spill] sm:$0xff] %v5399_v11 }
 0x1cd   :  { %1069 = vrot.lane.b32.xlu2 %v9008_v18, %s3544_s9 }
 0x1ce   :  { %1067 = vrot.lane.b32.xlu1 %v9007_v4, %s3544_s9 }
 0x1cf   :  { %1065 = vrot.lane.b32.xlu0 %v5408_v9, %s3544_s9 }
 0x1d1   :  { %v5414_v56 = vpop.permute.xlu1 %983 }
 0x1d2   :  { %v5412_v32 = vpop.permute.xlu2 %1003  ;;  %9153 = vst [vmem:[#allocation271_spill] sm:$0xff] %v5414_v56  ;;  %v9205_v56 = vld [vmem:[#allocation15_spill] sm:$0xff] }
 0x1d3   :  { %9152 = vst [vmem:[#allocation270_spill] sm:$0xff] %v5412_v32  ;;  %v5416_v35 = vpop.permute.xlu0 %981  ;;  %v9174_v32 = vld [vmem:[#allocation5_spill] sm:$0xff] }
 0x1d4   :  { %9154 = vst [vmem:[#allocation272_spill] sm:$0xff] %v5416_v35 }
 0x1d5   :  { %1075 = vrot.lane.b32.xlu2 %v9033_v30, %s3544_s9 }
 0x1d6   :  { %1073 = vrot.lane.b32.xlu1 %v9018_v17, %s3544_s9 }
 0x1d7   :  { %1071 = vrot.lane.b32.xlu0 %v9021_v43, %s3544_s9 }
 0x1d9   :  { %v5426_v4 = vpop.permute.xlu1 %989 }
 0x1da   :  { %v5424_v18 = vpop.permute.xlu2 %1009  ;;  %9156 = vst [vmem:[#allocation274_spill] sm:$0xff] %v5426_v4 }
 0x1db   :  { %9155 = vst [vmem:[#allocation273_spill] sm:$0xff] %v5424_v18  ;;  %v5428_v11 = vpop.permute.xlu0 %987  ;;  %v5481_v18 = vld [vmem:[%s8501_s0 + $0x338] sm:$0xff] }
 0x1dc   :  { %9157 = vst [vmem:[#allocation275_spill] sm:$0xff] %v5428_v11 }
 0x1dd   :  { %1081 = vrot.lane.b32.xlu2 %v9029_v55, %s3544_s9 }
 0x1de   :  { %1079 = vrot.lane.b32.xlu1 %v9028_v15, %s3544_s9 }
 0x1df   :  { %1077 = vrot.lane.b32.xlu0 %v9031_v40, %s3544_s9 }
 0x1e1   :  { %v5438_v17 = vpop.permute.xlu1 %995 }
 0x1e2   :  { %v5436_v30 = vpop.permute.xlu2 %1015  ;;  %9159 = vst [vmem:[#allocation277_spill] sm:$0xff] %v5438_v17  ;;  %v9186_v17 = vld [vmem:[#allocation11_spill] sm:$0xff] }
 0x1e3   :  { %9158 = vst [vmem:[#allocation276_spill] sm:$0xff] %v5436_v30  ;;  %v5440_v43 = vpop.permute.xlu0 %993 }
 0x1e4   :  { %9160 = vst [vmem:[#allocation278_spill] sm:$0xff] %v5440_v43 }
 0x1e5   :  { %1087 = vrot.lane.b32.xlu2 %v9054_v27, %s3544_s9 }
 0x1e6   :  { %1085 = vrot.lane.b32.xlu1 %v9039_v3, %s3544_s9 }
 0x1e7   :  { %1083 = vrot.lane.b32.xlu0 %v9042_v28, %s3544_s9 }
 0x1e9   :  { %v5450_v15 = vpop.permute.xlu1 %1001 }
 0x1ea   :  { %v5448_v55 = vpop.permute.xlu2 %1021  ;;  %9162 = vst [vmem:[#allocation280_spill] sm:$0xff] %v5450_v15 }
 0x1eb   :  { %9161 = vst [vmem:[#allocation279_spill] sm:$0xff] %v5448_v55  ;;  %v5452_v40 = vpop.permute.xlu0 %999  ;;  %v9191_v55 = vld [vmem:[#allocation13_spill] sm:$0xff] }
 0x1ec   :  { %9163 = vst [vmem:[#allocation281_spill] sm:$0xff] %v5452_v40  ;;  %v9181_v40 = vld [vmem:[#allocation4_spill] sm:$0xff] }
 0x1ed   :  { %1093 = vrot.lane.b32.xlu2 %v9050_v24, %s3544_s9 }
 0x1ee   :  { %1091 = vrot.lane.b32.xlu1 %v9049_v19, %s3544_s9 }
 0x1ef   :  { %1089 = vrot.lane.b32.xlu0 %v9052_v59, %s3544_s9 }
 0x1f1   :  { %v5462_v3 = vpop.permute.xlu1 %1007 }
 0x1f2   :  { %v5460_v27 = vpop.permute.xlu2 %1027  ;;  %9165 = vst [vmem:[#allocation283_spill] sm:$0xff] %v5462_v3 }
 0x1f3   :  { %9164 = vst [vmem:[#allocation282_spill] sm:$0xff] %v5460_v27  ;;  %v5464_v28 = vpop.permute.xlu0 %1005  ;;  %v9185_v27 = vld [vmem:[#allocation10_spill] sm:$0xff] }
 0x1f4   :  { %9166 = vst [vmem:[#allocation284_spill] sm:$0xff] %v5464_v28  ;;  %v9173_v28 = vld [vmem:[#allocation2_spill] sm:$0xff] }
 0x1f5   :  { %1099 = vrot.lane.b32.xlu2 %v9068_v62, %s3544_s9  ;;  %v5486_v62 = vld [vmem:[%s8501_s0 + $0x330] sm:$0xff] }
 0x1f6   :  { %1097 = vrot.lane.b32.xlu1 %v4446_v36, %s3544_s9 }
 0x1f7   :  { %1095 = vrot.lane.b32.xlu0 %v4456_v16, %s3544_s9 }
 0x1f9   :  { %v5474_v19 = vpop.permute.xlu1 %1013 }
 0x1fa   :  { %v5472_v24 = vpop.permute.xlu2 %1033  ;;  %9168 = vst [vmem:[#allocation286_spill] sm:$0xff] %v5474_v19 }
 0x1fb   :  { %9167 = vst [vmem:[#allocation285_spill] sm:$0xff] %v5472_v24  ;;  %v5476_v59 = vpop.permute.xlu0 %1011 }
 0x1fc   :  { %9169 = vst [vmem:[#allocation287_spill] sm:$0xff] %v5476_v59 }
 0x1fd   :  { %1105 = vrot.lane.b32.xlu2 %v5481_v18, %s3544_s9 }
 0x1fe   :  { %1103 = vrot.lane.b32.xlu1 %v5486_v62, %s3544_s9 }
 0x1ff   :  { %1101 = vrot.lane.b32.xlu0 %v9067_v12, %s3544_s9 }
 0x201   :  { %v5496_v16 = vpop.permute.xlu1 %1019 }
 0x202   :  { %v5494_v36 = vpop.permute.xlu2 %1039  ;;  %9171 = vst [vmem:[#allocation289_spill] sm:$0xff] %v5496_v16 }
 0x203   :  { %9170 = vst [vmem:[#allocation288_spill] sm:$0xff] %v5494_v36  ;;  %v5498_v3 = vpop.permute.xlu0 %1017  ;;  %v9179_v36 = vld [vmem:[#allocation7_spill] sm:$0xff] }
 0x204   :  { %9172 = vst [vmem:[#allocation290_spill] sm:$0xff] %v5498_v3 }
 0x205   :  { %1175 = vrot.lane.b32.xlu2 %v9173_v28, %s3545_s19 }
 0x206   :  { %1173 = vrot.lane.b32.xlu1 %v9174_v32, %s3545_s19 }
 0x207   :  { %1171 = vrot.lane.b32.xlu0 %v9175_v42, %s3545_s19 }
 0x209   :  { %v5508_v15 = vpop.permute.xlu1 %1025 }
 0x20a   :  { %v5506_v24 = vpop.permute.xlu2 %1045  ;;  %9177 = vst [vmem:[#allocation5_spill] sm:$0xff] %v5508_v15  ;;  %v9187_v15 = vld [vmem:[#allocation6_spill] sm:$0xff] }
 0x20b   :  { %9176 = vst [vmem:[#allocation2_spill] sm:$0xff] %v5506_v24  ;;  %v5510_v12 = vpop.permute.xlu0 %1023 }
 0x20c   :  { %9178 = vst [vmem:[#allocation3_spill] sm:$0xff] %v5510_v12 }
 0x20d   :  { %1181 = vrot.lane.b32.xlu2 %v9179_v36, %s3545_s19 }
 0x20e   :  { %1179 = vrot.lane.b32.xlu1 %v9180_v29, %s3545_s19 }
 0x20f   :  { %1177 = vrot.lane.b32.xlu0 %v9181_v40, %s3545_s19 }
 0x211   :  { %v5520_v32 = vpop.permute.xlu1 %1031 }
 0x212   :  { %v5518_v44 = vpop.permute.xlu2 %1051  ;;  %9183 = vst [vmem:[#allocation8_spill] sm:$0xff] %v5520_v32  ;;  %v9192_v32 = vld [vmem:[#allocation14_spill] sm:$0xff] }
 0x213   :  { %9182 = vst [vmem:[#allocation7_spill] sm:$0xff] %v5518_v44  ;;  %v5522_v42 = vpop.permute.xlu0 %1029 }
 0x214   :  { %9184 = vst [vmem:[#allocation4_spill] sm:$0xff] %v5522_v42  ;;  %v9193_v42 = vld [vmem:[#allocation9_spill] sm:$0xff] }
 0x215   :  { %1187 = vrot.lane.b32.xlu2 %v9185_v27, %s3545_s19 }
 0x216   :  { %1185 = vrot.lane.b32.xlu1 %v9186_v17, %s3545_s19 }
 0x217   :  { %1183 = vrot.lane.b32.xlu0 %v9187_v15, %s3545_s19 }
 0x219   :  { %v5532_v12 = vpop.permute.xlu1 %1037 }
 0x21a   :  { %v5530_v43 = vpop.permute.xlu2 %1057  ;;  %9189 = vst [vmem:[#allocation11_spill] sm:$0xff] %v5532_v12  ;;  %v9198_v12 = vld [vmem:[#allocation17_spill] sm:$0xff] }
 0x21b   :  { %9188 = vst [vmem:[#allocation10_spill] sm:$0xff] %v5530_v43  ;;  %v5534_v13 = vpop.permute.xlu0 %1035  ;;  %v9197_v43 = vld [vmem:[#allocation16_spill] sm:$0xff] }
 0x21c   :  { %9190 = vst [vmem:[#allocation6_spill] sm:$0xff] %v5534_v13  ;;  %v9199_v13 = vld [vmem:[#allocation12_spill] sm:$0xff] }
 0x21d   :  { %1193 = vrot.lane.b32.xlu2 %v9191_v55, %s3545_s19 }
 0x21e   :  { %1191 = vrot.lane.b32.xlu1 %v9192_v32, %s3545_s19 }
 0x21f   :  { %1189 = vrot.lane.b32.xlu0 %v9193_v42, %s3545_s19 }
 0x221   :  { %v5544_v16 = vpop.permute.xlu1 %1043 }
 0x222   :  { %v5542_v4 = vpop.permute.xlu2 %1063  ;;  %9195 = vst [vmem:[#allocation14_spill] sm:$0xff] %v5544_v16 }
 0x223   :  { %9194 = vst [vmem:[#allocation13_spill] sm:$0xff] %v5542_v4  ;;  %v5546_v11 = vpop.permute.xlu0 %1041  ;;  %v9203_v4 = vld [vmem:[#allocation19_spill] sm:$0xff] }
 0x224   :  { %9196 = vst [vmem:[#allocation9_spill] sm:$0xff] %v5546_v11  ;;  %v9204_v11 = vld [vmem:[#allocation20_spill] sm:$0xff] }
 0x225   :  { %1199 = vrot.lane.b32.xlu2 %v9197_v43, %s3545_s19 }
 0x226   :  { %1197 = vrot.lane.b32.xlu1 %v9198_v12, %s3545_s19 }
 0x227   :  { %1195 = vrot.lane.b32.xlu0 %v9199_v13, %s3545_s19 }
 0x229   :  { %v5556_v3 = vpop.permute.xlu1 %1049 }
 0x22a   :  { %v5554_v44 = vpop.permute.xlu2 %1069  ;;  %9201 = vst [vmem:[#allocation12_spill] sm:$0xff] %v5556_v3  ;;  %v9210_v3 = vld [vmem:[#allocation23_spill] sm:$0xff] }
 0x22b   :  { %9200 = vst [vmem:[#allocation17_spill] sm:$0xff] %v5554_v44  ;;  %v5558_v30 = vpop.permute.xlu0 %1047  ;;  %v9209_v44 = vld [vmem:[#allocation22_spill] sm:$0xff] }
 0x22c   :  { %9202 = vst [vmem:[#allocation291_spill] sm:$0xff] %v5558_v30  ;;  %v9211_v30 = vld [vmem:[#allocation18_spill] sm:$0xff] }
 0x22d   :  { %1205 = vrot.lane.b32.xlu2 %v9203_v4, %s3545_s19 }
 0x22e   :  { %1203 = vrot.lane.b32.xlu1 %v9204_v11, %s3545_s19 }
 0x22f   :  { %1201 = vrot.lane.b32.xlu0 %v9205_v56, %s3545_s19 }
 0x231   :  { %v5568_v35 = vpop.permute.xlu1 %1055 }
 0x232   :  { %v5566_v19 = vpop.permute.xlu2 %1075  ;;  %9207 = vst [vmem:[#allocation15_spill] sm:$0xff] %v5568_v35  ;;  %v9216_v35 = vld [vmem:[#allocation26_spill] sm:$0xff] }
 0x233   :  { %9206 = vst [vmem:[#allocation20_spill] sm:$0xff] %v5566_v19  ;;  %v5570_v24 = vpop.permute.xlu0 %1053  ;;  %v9215_v19 = vld [vmem:[#allocation25_spill] sm:$0xff] }
 0x234   :  { %9208 = vst [vmem:[#allocation292_spill] sm:$0xff] %v5570_v24  ;;  %v9217_v24 = vld [vmem:[#allocation21_spill] sm:$0xff] }
 0x235   :  { %1211 = vrot.lane.b32.xlu2 %v9209_v44, %s3545_s19 }
 0x236   :  { %1209 = vrot.lane.b32.xlu1 %v9210_v3, %s3545_s19 }
 0x237   :  { %1207 = vrot.lane.b32.xlu0 %v9211_v30, %s3545_s19 }
 0x239   :  { %v5580_v16 = vpop.permute.xlu1 %1061 }
 0x23a   :  { %v5578_v59 = vpop.permute.xlu2 %1081  ;;  %9213 = vst [vmem:[#allocation294_spill] sm:$0xff] %v5580_v16  ;;  %v9222_v16 = vld [vmem:[#allocation29_spill] sm:$0xff] }
 0x23b   :  { %9212 = vst [vmem:[#allocation293_spill] sm:$0xff] %v5578_v59  ;;  %v5582_v4 = vpop.permute.xlu0 %1059  ;;  %v9221_v59 = vld [vmem:[#allocation28_spill] sm:$0xff] }
 0x23c   :  { %9214 = vst [vmem:[#allocation295_spill] sm:$0xff] %v5582_v4  ;;  %v9223_v4 = vld [vmem:[#allocation24_spill] sm:$0xff] }
 0x23d   :  { %1217 = vrot.lane.b32.xlu2 %v9215_v19, %s3545_s19 }
 0x23e   :  { %1215 = vrot.lane.b32.xlu1 %v9216_v35, %s3545_s19 }
 0x23f   :  { %1213 = vrot.lane.b32.xlu0 %v9217_v24, %s3545_s19 }
 0x241   :  { %v5592_v3 = vpop.permute.xlu1 %1067 }
 0x242   :  { %v5590_v44 = vpop.permute.xlu2 %1087  ;;  %9219 = vst [vmem:[#allocation297_spill] sm:$0xff] %v5592_v3  ;;  %v5611_v3 = vld [vmem:[%s8501_s0 + $0x190] sm:$0x3] }
 0x243   :  { %9218 = vst [vmem:[#allocation296_spill] sm:$0xff] %v5590_v44  ;;  %v5594_v30 = vpop.permute.xlu0 %1065  ;;  %v9228_v44 = vld [vmem:[#allocation33_spill] sm:$0xff] }
 0x244   :  { %9220 = vst [vmem:[#allocation298_spill] sm:$0xff] %v5594_v30  ;;  %v9227_v30 = vld [vmem:[#allocation32_spill] sm:$0xff] }
 0x245   :  { %1223 = vrot.lane.b32.xlu2 %v9221_v59, %s3545_s19  ;;  %v9229_v59 = vld [vmem:[#allocation27_spill] sm:$0xff] }
 0x246   :  { %1221 = vrot.lane.b32.xlu1 %v9222_v16, %s3545_s19 }
 0x247   :  { %1219 = vrot.lane.b32.xlu0 %v9223_v4, %s3545_s19 }
 0x249   :  { %v5604_v35 = vpop.permute.xlu1 %1073 }
 0x24a   :  { %v5602_v19 = vpop.permute.xlu2 %1093  ;;  %9225 = vst [vmem:[#allocation300_spill] sm:$0xff] %v5604_v35  ;;  %v550_v35 = vrot.slane %v5317_v60, 1 }
 0x24b   :  { %9224 = vst [vmem:[#allocation299_spill] sm:$0xff] %v5602_v19  ;;  %v5606_v24 = vpop.permute.xlu0 %1071  ;;  %v549_v19 = vrot.slane %v5290_v45, 1 }
 0x24c   :  { %9226 = vst [vmem:[#allocation301_spill] sm:$0xff] %v5606_v24  ;;  %v552_v24 = vrot.slane %v5611_v3, 1 }
 0x24d   :  { %1229 = vrot.lane.b32.xlu2 %v9227_v30, %s3545_s19 }
 0x24e   :  { %1227 = vrot.lane.b32.xlu1 %v9228_v44, %s3545_s19  ;;  %v5629_v30 = vsel %vm221_vm0, %v550_v35, %v552_v24  ;;  %v5632_v44 = vsel %vm221_vm0, %v549_v19, %v550_v35  ;;  %v9239_v24 = vld [vmem:[#allocation46_spill] sm:$0xff]  ;;  %v9240_v35 = vld [vmem:[#allocation47_spill] sm:$0xff]  ;;  %v9241_v19 = vld [vmem:[#allocation37_spill] sm:$0xff] }
 0x24f   :  { %1225 = vrot.lane.b32.xlu0 %v9229_v59, %s3545_s19  ;;  %9233 = vst [vmem:[#allocation305_spill] sm:$0xff] %v5629_v30  ;;  %v9235_v59 = vld [vmem:[#allocation38_spill] sm:$0xff] }
 0x250   :  { %9234 = vst [vmem:[#allocation306_spill] sm:$0xff] %v5632_v44 }
 0x251   :  { %v5624_v16 = vpop.permute.xlu1 %1079 }
 0x252   :  { %v5621_v4 = vpop.permute.xlu2 %1099  ;;  %9231 = vst [vmem:[#allocation303_spill] sm:$0xff] %v5624_v16 }
 0x253   :  { %9230 = vst [vmem:[#allocation302_spill] sm:$0xff] %v5621_v4  ;;  %v5626_v43 = vpop.permute.xlu0 %1077 }
 0x254   :  { %9232 = vst [vmem:[#allocation304_spill] sm:$0xff] %v5626_v43 }
 0x255   :  { %1235 = vrot.lane.b32.xlu2 %v9235_v59, %s3545_s19 }
 0x256   :  { %1233 = vrot.lane.b32.xlu1 %v5629_v30, %s3545_s19 }
 0x257   :  { %1231 = vrot.lane.b32.xlu0 %v5632_v44, %s3545_s19 }
 0x259   :  { %v5642_v16 = vpop.permute.xlu1 %1085 }
 0x25a   :  { %v5640_v4 = vpop.permute.xlu2 %1105  ;;  %9237 = vst [vmem:[#allocation307_spill] sm:$0xff] %v5642_v16  ;;  %v9246_v16 = vld [vmem:[#allocation55_spill] sm:$0xff] }
 0x25b   :  { %9236 = vst [vmem:[#allocation38_spill] sm:$0xff] %v5640_v4  ;;  %v5644_v43 = vpop.permute.xlu0 %1083  ;;  %v9245_v4 = vld [vmem:[#allocation54_spill] sm:$0xff] }
 0x25c   :  { %9238 = vst [vmem:[#allocation308_spill] sm:$0xff] %v5644_v43  ;;  %v9247_v43 = vld [vmem:[#allocation45_spill] sm:$0xff] }
 0x25d   :  { %1241 = vrot.lane.b32.xlu2 %v9239_v24, %s3545_s19 }
 0x25e   :  { %1239 = vrot.lane.b32.xlu1 %v9240_v35, %s3545_s19 }
 0x25f   :  { %1237 = vrot.lane.b32.xlu0 %v9241_v19, %s3545_s19 }
 0x261   :  { %v5654_v30 = vpop.permute.xlu1 %1091 }
 0x262   :  { %v5652_v59 = vpop.permute.xlu2 %1175  ;;  %9243 = vst [vmem:[#allocation309_spill] sm:$0xff] %v5654_v30  ;;  %v9252_v30 = vld [vmem:[#allocation64_spill] sm:$0xff] }
 0x263   :  { %9242 = vst [vmem:[#allocation37_spill] sm:$0xff] %v5652_v59  ;;  %v5656_v44 = vpop.permute.xlu0 %1089  ;;  %v9251_v59 = vld [vmem:[#allocation63_spill] sm:$0xff] }
 0x264   :  { %9244 = vst [vmem:[#allocation310_spill] sm:$0xff] %v5656_v44  ;;  %v9253_v44 = vld [vmem:[#allocation53_spill] sm:$0xff] }
 0x265   :  { %1247 = vrot.lane.b32.xlu2 %v9245_v4, %s3545_s19 }
 0x266   :  { %1245 = vrot.lane.b32.xlu1 %v9246_v16, %s3545_s19 }
 0x267   :  { %1243 = vrot.lane.b32.xlu0 %v9247_v43, %s3545_s19 }
 0x269   :  { %v5666_v35 = vpop.permute.xlu1 %1097 }
 0x26a   :  { %v5664_v24 = vpop.permute.xlu2 %1181  ;;  %9249 = vst [vmem:[#allocation312_spill] sm:$0xff] %v5666_v35  ;;  %v9258_v35 = vld [vmem:[#allocation74_spill] sm:$0xff] }
 0x26b   :  { %9248 = vst [vmem:[#allocation311_spill] sm:$0xff] %v5664_v24  ;;  %v5668_v19 = vpop.permute.xlu0 %1095  ;;  %v9257_v24 = vld [vmem:[#allocation73_spill] sm:$0xff] }
 0x26c   :  { %9250 = vst [vmem:[#allocation313_spill] sm:$0xff] %v5668_v19  ;;  %v9259_v19 = vld [vmem:[#allocation62_spill] sm:$0xff] }
 0x26d   :  { %1253 = vrot.lane.b32.xlu2 %v9251_v59, %s3545_s19 }
 0x26e   :  { %1251 = vrot.lane.b32.xlu1 %v9252_v30, %s3545_s19 }
 0x26f   :  { %1249 = vrot.lane.b32.xlu0 %v9253_v44, %s3545_s19 }
 0x271   :  { %v5678_v16 = vpop.permute.xlu1 %1103 }
 0x272   :  { %v5676_v4 = vpop.permute.xlu2 %1187  ;;  %9255 = vst [vmem:[#allocation315_spill] sm:$0xff] %v5678_v16  ;;  %v9264_v16 = vld [vmem:[#allocation85_spill] sm:$0xff] }
 0x273   :  { %9254 = vst [vmem:[#allocation314_spill] sm:$0xff] %v5676_v4  ;;  %v5680_v43 = vpop.permute.xlu0 %1101  ;;  %v9263_v4 = vld [vmem:[#allocation84_spill] sm:$0xff] }
 0x274   :  { %9256 = vst [vmem:[#allocation316_spill] sm:$0xff] %v5680_v43  ;;  %v9265_v43 = vld [vmem:[#allocation72_spill] sm:$0xff] }
 0x275   :  { %1259 = vrot.lane.b32.xlu2 %v9257_v24, %s3545_s19 }
 0x276   :  { %1257 = vrot.lane.b32.xlu1 %v9258_v35, %s3545_s19 }
 0x277   :  { %1255 = vrot.lane.b32.xlu0 %v9259_v19, %s3545_s19 }
 0x279   :  { %v5690_v30 = vpop.permute.xlu1 %1173 }
 0x27a   :  { %v5688_v59 = vpop.permute.xlu2 %1193  ;;  %9261 = vst [vmem:[#allocation318_spill] sm:$0xff] %v5690_v30  ;;  %v9270_v30 = vld [vmem:[#allocation95_spill] sm:$0xff] }
 0x27b   :  { %9260 = vst [vmem:[#allocation317_spill] sm:$0xff] %v5688_v59  ;;  %v5692_v44 = vpop.permute.xlu0 %1171  ;;  %v9269_v59 = vld [vmem:[#allocation94_spill] sm:$0xff] }
 0x27c   :  { %9262 = vst [vmem:[#allocation319_spill] sm:$0xff] %v5692_v44 }
 0x27d   :  { %1265 = vrot.lane.b32.xlu2 %v9263_v4, %s3545_s19  ;;  %v9271_v4 = vld [vmem:[#allocation83_spill] sm:$0xff] }
 0x27e   :  { %1263 = vrot.lane.b32.xlu1 %v9264_v16, %s3545_s19 }
 0x27f   :  { %1261 = vrot.lane.b32.xlu0 %v9265_v43, %s3545_s19 }
 0x281   :  { %v5702_v35 = vpop.permute.xlu1 %1179 }
 0x282   :  { %v5700_v24 = vpop.permute.xlu2 %1199  ;;  %9267 = vst [vmem:[#allocation321_spill] sm:$0xff] %v5702_v35  ;;  %v9276_v35 = vld [vmem:[#allocation106_spill] sm:$0xff] }
 0x283   :  { %9266 = vst [vmem:[#allocation320_spill] sm:$0xff] %v5700_v24  ;;  %v5704_v19 = vpop.permute.xlu0 %1177  ;;  %v9275_v24 = vld [vmem:[#allocation105_spill] sm:$0xff] }
 0x284   :  { %9268 = vst [vmem:[#allocation322_spill] sm:$0xff] %v5704_v19  ;;  %v9277_v19 = vld [vmem:[#allocation93_spill] sm:$0xff] }
 0x285   :  { %1271 = vrot.lane.b32.xlu2 %v9269_v59, %s3545_s19 }
 0x286   :  { %1269 = vrot.lane.b32.xlu1 %v9270_v30, %s3545_s19 }
 0x287   :  { %1267 = vrot.lane.b32.xlu0 %v9271_v4, %s3545_s19 }
 0x289   :  { %v5714_v16 = vpop.permute.xlu1 %1185 }
 0x28a   :  { %v5712_v44 = vpop.permute.xlu2 %1205  ;;  %9273 = vst [vmem:[#allocation324_spill] sm:$0xff] %v5714_v16  ;;  %v9282_v16 = vld [vmem:[#allocation116_spill] sm:$0xff] }
 0x28b   :  { %9272 = vst [vmem:[#allocation323_spill] sm:$0xff] %v5712_v44  ;;  %v5716_v43 = vpop.permute.xlu0 %1183  ;;  %v9281_v44 = vld [vmem:[#allocation115_spill] sm:$0xff] }
 0x28c   :  { %9274 = vst [vmem:[#allocation325_spill] sm:$0xff] %v5716_v43  ;;  %v9283_v43 = vld [vmem:[#allocation104_spill] sm:$0xff] }
 0x28d   :  { %1277 = vrot.lane.b32.xlu2 %v9275_v24, %s3545_s19 }
 0x28e   :  { %1275 = vrot.lane.b32.xlu1 %v9276_v35, %s3545_s19 }
 0x28f   :  { %1273 = vrot.lane.b32.xlu0 %v9277_v19, %s3545_s19 }
 0x291   :  { %v5726_v30 = vpop.permute.xlu1 %1191 }
 0x292   :  { %v5724_v59 = vpop.permute.xlu2 %1211  ;;  %9279 = vst [vmem:[#allocation327_spill] sm:$0xff] %v5726_v30  ;;  %v555_v30 = vrot.slane %v5481_v18, 1 }
 0x293   :  { %9278 = vst [vmem:[#allocation326_spill] sm:$0xff] %v5724_v59  ;;  %v5728_v4 = vpop.permute.xlu0 %1189  ;;  %v9287_v59 = vld [vmem:[#allocation123_spill] sm:$0xff] }
 0x294   :  { %9280 = vst [vmem:[#allocation328_spill] sm:$0xff] %v5728_v4  ;;  %v554_v4 = vrot.slane %v5486_v62, 1 }
 0x295   :  { %1283 = vrot.lane.b32.xlu2 %v9281_v44, %s3545_s19  ;;  %v9288_v44 = vld [vmem:[#allocation124_spill] sm:$0xff] }
 0x296   :  { %1281 = vrot.lane.b32.xlu1 %v9282_v16, %s3545_s19  ;;  %v9289_v16 = vld [vmem:[#allocation114_spill] sm:$0xff] }
 0x297   :  { %1279 = vrot.lane.b32.xlu0 %v9283_v43, %s3545_s19 }
 0x299   :  { %v5738_v35 = vpop.permute.xlu1 %1197 }
 0x29a   :  { %v5736_v24 = vpop.permute.xlu2 %1217  ;;  %9285 = vst [vmem:[#allocation330_spill] sm:$0xff] %v5738_v35 }
 0x29b   :  { %9284 = vst [vmem:[#allocation329_spill] sm:$0xff] %v5736_v24  ;;  %v5740_v19 = vpop.permute.xlu0 %1195 }
 0x29c   :  { %9286 = vst [vmem:[#allocation331_spill] sm:$0xff] %v5740_v19  ;;  %v5757_v19 = vsel %vm221_vm0, %v554_v4, %v555_v30 }
 0x29d   :  { %1289 = vrot.lane.b32.xlu2 %v9287_v59, %s3545_s19  ;;  %9293 = vst [vmem:[#allocation335_spill] sm:$0xff] %v5757_v19  ;;  %v5762_v59 = vld [vmem:[%s8501_s0 + $0x340] sm:$0x3] }
 0x29e   :  { %1287 = vrot.lane.b32.xlu1 %v9288_v44, %s3545_s19 }
 0x29f   :  { %1285 = vrot.lane.b32.xlu0 %v9289_v16, %s3545_s19 }
 0x2a1   :  { %v5752_v24 = vpop.permute.xlu1 %1203 }
 0x2a2   :  { %v5750_v43 = vpop.permute.xlu2 %1223  ;;  %9291 = vst [vmem:[#allocation333_spill] sm:$0xff] %v5752_v24 }
 0x2a3   :  { %9290 = vst [vmem:[#allocation332_spill] sm:$0xff] %v5750_v43  ;;  %v5754_v35 = vpop.permute.xlu0 %1201  ;;  %v9294_v43 = vld [vmem:[#allocation122_spill] sm:$0xff] }
 0x2a4   :  { %9292 = vst [vmem:[#allocation334_spill] sm:$0xff] %v5754_v35  ;;  %v557_v35 = vrot.slane %v5762_v59, 1 }
 0x2a5   :  { %1295 = vrot.lane.b32.xlu2 %v5757_v19, %s3545_s19 }
 0x2a6   :  { %1293 = vrot.lane.b32.xlu1 %v4508_v58, %s3545_s19  ;;  %v5778_v16 = vsel %vm221_vm0, %v555_v30, %v557_v35 }
 0x2a7   :  { %1291 = vrot.lane.b32.xlu0 %v9294_v43, %s3545_s19  ;;  %9298 = vst [vmem:[#allocation339_spill] sm:$0xff] %v5778_v16  ;;  %v9344_v43 = vld [vmem:[#allocation175_spill] sm:$0xff] }
 0x2a9   :  { %v5773_v4 = vpop.permute.xlu1 %1209 }
 0x2aa   :  { %v5770_v44 = vpop.permute.xlu2 %1229  ;;  %9296 = vst [vmem:[#allocation337_spill] sm:$0xff] %v5773_v4 }
 0x2ab   :  { %9295 = vst [vmem:[#allocation336_spill] sm:$0xff] %v5770_v44  ;;  %v5775_v24 = vpop.permute.xlu0 %1207 }
 0x2ac   :  { %9297 = vst [vmem:[#allocation338_spill] sm:$0xff] %v5775_v24 }
 0x2ad   :  { %1365 = vrot.lane.b32.xlu2 %v4529_v33, %s3546_s23 }
 0x2ae   :  { %1363 = vrot.lane.b32.xlu1 %v4532_v0, %s3546_s23 }
 0x2af   :  { %1297 = vrot.lane.b32.xlu0 %v5778_v16, %s3545_s19 }
 0x2b1   :  { %v5788_v19 = vpop.permute.xlu1 %1215 }
 0x2b2   :  { %v5786_v44 = vpop.permute.xlu2 %1235  ;;  %9299 = vst [vmem:[#allocation340_spill] sm:$0xff] %v5788_v19 }
 0x2b3   :  { %v5790_v58 = vpop.permute.xlu0 %1213 }
 0x2b4   :  { %9300 = vst [vmem:[#allocation341_spill] sm:$0xff] %v5790_v58 }
 0x2b5   :  { %1371 = vrot.lane.b32.xlu2 %v4554_v31, %s3546_s23 }
 0x2b6   :  { %1369 = vrot.lane.b32.xlu1 %v4557_v26, %s3546_s23 }
 0x2b7   :  { %1367 = vrot.lane.b32.xlu0 %v4526_v34, %s3546_s23 }
 0x2b9   :  { %v5800_v0 = vpop.permute.xlu1 %1221 }
 0x2ba   :  { %v5798_v33 = vpop.permute.xlu2 %1241  ;;  %9302 = vst [vmem:[#allocation343_spill] sm:$0xff] %v5800_v0 }
 0x2bb   :  { %9301 = vst [vmem:[#allocation342_spill] sm:$0xff] %v5798_v33  ;;  %v5802_v30 = vpop.permute.xlu0 %1219 }
 0x2bc   :  { %9303 = vst [vmem:[#allocation344_spill] sm:$0xff] %v5802_v30 }
 0x2bd   :  { %1377 = vrot.lane.b32.xlu2 %v4580_v47, %s3546_s23 }
 0x2be   :  { %1375 = vrot.lane.b32.xlu1 %v4583_v37, %s3546_s23 }
 0x2bf   :  { %1373 = vrot.lane.b32.xlu0 %v4551_v22, %s3546_s23 }
 0x2c1   :  { %v5812_v19 = vpop.permute.xlu1 %1227 }
 0x2c2   :  { %v5810_v35 = vpop.permute.xlu2 %1247  ;;  %9305 = vst [vmem:[#allocation346_spill] sm:$0xff] %v5812_v19 }
 0x2c3   :  { %9304 = vst [vmem:[#allocation345_spill] sm:$0xff] %v5810_v35  ;;  %v5814_v16 = vpop.permute.xlu0 %1225 }
 0x2c4   :  { %9306 = vst [vmem:[#allocation347_spill] sm:$0xff] %v5814_v16 }
 0x2c5   :  { %1383 = vrot.lane.b32.xlu2 %v4605_v14, %s3546_s23 }
 0x2c6   :  { %1381 = vrot.lane.b32.xlu1 %v4608_v50, %s3546_s23 }
 0x2c7   :  { %1379 = vrot.lane.b32.xlu0 %v4577_v21, %s3546_s23 }
 0x2c9   :  { %v5824_v30 = vpop.permute.xlu1 %1233 }
 0x2ca   :  { %v5822_v0 = vpop.permute.xlu2 %1253  ;;  %9308 = vst [vmem:[#allocation349_spill] sm:$0xff] %v5824_v30 }
 0x2cb   :  { %9307 = vst [vmem:[#allocation348_spill] sm:$0xff] %v5822_v0  ;;  %v5826_v58 = vpop.permute.xlu0 %1231 }
 0x2cc   :  { %9309 = vst [vmem:[#allocation350_spill] sm:$0xff] %v5826_v58 }
 0x2cd   :  { %1389 = vrot.lane.b32.xlu2 %v4631_v8, %s3546_s23 }
 0x2ce   :  { %1387 = vrot.lane.b32.xlu1 %v4634_v61, %s3546_s23 }
 0x2cf   :  { %1385 = vrot.lane.b32.xlu0 %v4602_v2, %s3546_s23 }
 0x2d1   :  { %v5836_v16 = vpop.permute.xlu1 %1239 }
 0x2d2   :  { %v5834_v19 = vpop.permute.xlu2 %1259  ;;  %9311 = vst [vmem:[#allocation352_spill] sm:$0xff] %v5836_v16 }
 0x2d3   :  { %9310 = vst [vmem:[#allocation351_spill] sm:$0xff] %v5834_v19  ;;  %v5838_v35 = vpop.permute.xlu0 %1237 }
 0x2d4   :  { %9312 = vst [vmem:[#allocation353_spill] sm:$0xff] %v5838_v35 }
 0x2d5   :  { %1395 = vrot.lane.b32.xlu2 %v4656_v52, %s3546_s23 }
 0x2d6   :  { %1393 = vrot.lane.b32.xlu1 %v4659_v23, %s3546_s23 }
 0x2d7   :  { %1391 = vrot.lane.b32.xlu0 %v4628_v1, %s3546_s23 }
 0x2d9   :  { %v5848_v58 = vpop.permute.xlu1 %1245 }
 0x2da   :  { %v5846_v30 = vpop.permute.xlu2 %1265  ;;  %9314 = vst [vmem:[#allocation355_spill] sm:$0xff] %v5848_v58 }
 0x2db   :  { %9313 = vst [vmem:[#allocation354_spill] sm:$0xff] %v5846_v30  ;;  %v5850_v0 = vpop.permute.xlu0 %1243 }
 0x2dc   :  { %9315 = vst [vmem:[#allocation356_spill] sm:$0xff] %v5850_v0 }
 0x2dd   :  { %1401 = vrot.lane.b32.xlu2 %v4682_v7, %s3546_s23 }
 0x2de   :  { %1399 = vrot.lane.b32.xlu1 %v4685_v54, %s3546_s23 }
 0x2df   :  { %1397 = vrot.lane.b32.xlu0 %v4653_v25, %s3546_s23 }
 0x2e1   :  { %v5860_v52 = vpop.permute.xlu1 %1251 }
 0x2e2   :  { %v5858_v19 = vpop.permute.xlu2 %1271  ;;  %9317 = vst [vmem:[#allocation358_spill] sm:$0xff] %v5860_v52 }
 0x2e3   :  { %9316 = vst [vmem:[#allocation357_spill] sm:$0xff] %v5858_v19  ;;  %v5862_v23 = vpop.permute.xlu0 %1249 }
 0x2e4   :  { %9318 = vst [vmem:[#allocation359_spill] sm:$0xff] %v5862_v23 }
 0x2e5   :  { %1407 = vrot.lane.b32.xlu2 %v4707_v39, %s3546_s23 }
 0x2e6   :  { %1405 = vrot.lane.b32.xlu1 %v4710_v6, %s3546_s23 }
 0x2e7   :  { %1403 = vrot.lane.b32.xlu0 %v4679_v63, %s3546_s23 }
 0x2e9   :  { %v5872_v1 = vpop.permute.xlu1 %1257 }
 0x2ea   :  { %v5870_v30 = vpop.permute.xlu2 %1277  ;;  %9320 = vst [vmem:[#allocation361_spill] sm:$0xff] %v5872_v1  ;;  %v560_v1 = vrot.slane %v5317_v60, 2 }
 0x2eb   :  { %9319 = vst [vmem:[#allocation360_spill] sm:$0xff] %v5870_v30  ;;  %v5874_v25 = vpop.permute.xlu0 %1255  ;;  %v559_v30 = vrot.slane %v5290_v45, 2 }
 0x2ec   :  { %9321 = vst [vmem:[#allocation362_spill] sm:$0xff] %v5874_v25  ;;  %v562_v25 = vrot.slane %v5611_v3, 2 }
 0x2ed   :  { %1413 = vrot.lane.b32.xlu2 %v4733_v51, %s3546_s23  ;;  %v5907_v0 = vsel %vm382_vm1, %v559_v30, %v560_v1  ;;  %v9334_v30 = vld [vmem:[#allocation30_spill] sm:$0xff] }
 0x2ee   :  { %1411 = vrot.lane.b32.xlu1 %v4736_v41, %s3546_s23  ;;  %v5904_v8 = vsel %vm382_vm1, %v560_v1, %v562_v25  ;;  %9328 = vst [vmem:[#allocation369_spill] sm:$0xff] %v5907_v0  ;;  %v9332_v25 = vld [vmem:[#allocation172_spill] sm:$0xff]  ;;  %v9333_v1 = vld [vmem:[#allocation173_spill] sm:$0xff] }
 0x2ef   :  { %1409 = vrot.lane.b32.xlu0 %v4704_v49, %s3546_s23  ;;  %9327 = vst [vmem:[#allocation368_spill] sm:$0xff] %v5904_v8 }
 0x2f1   :  { %v5884_v23 = vpop.permute.xlu1 %1263 }
 0x2f2   :  { %v5882_v52 = vpop.permute.xlu2 %1283  ;;  %9323 = vst [vmem:[#allocation364_spill] sm:$0xff] %v5884_v23 }
 0x2f3   :  { %9322 = vst [vmem:[#allocation363_spill] sm:$0xff] %v5882_v52  ;;  %v5886_v58 = vpop.permute.xlu0 %1261 }
 0x2f4   :  { %9324 = vst [vmem:[#allocation365_spill] sm:$0xff] %v5886_v58 }
 0x2f5   :  { %1419 = vrot.lane.b32.xlu2 %v4758_v57, %s3546_s23  ;;  %v9340_v57 = vld [vmem:[#allocation35_spill] sm:$0xff] }
 0x2f6   :  { %1417 = vrot.lane.b32.xlu1 %v4761_v53, %s3546_s23 }
 0x2f7   :  { %1415 = vrot.lane.b32.xlu0 %v4730_v48, %s3546_s23 }
 0x2f9   :  { %v5899_v23 = vpop.permute.xlu1 %1269 }
 0x2fa   :  { %v5897_v52 = vpop.permute.xlu2 %1289  ;;  %9326 = vst [vmem:[#allocation367_spill] sm:$0xff] %v5899_v23 }
 0x2fb   :  { %9325 = vst [vmem:[#allocation366_spill] sm:$0xff] %v5897_v52  ;;  %v5901_v58 = vpop.permute.xlu0 %1267 }
 0x2fd   :  { %1425 = vrot.lane.b32.xlu2 %v5904_v8, %s3546_s23 }
 0x2fe   :  { %1423 = vrot.lane.b32.xlu1 %v5907_v0, %s3546_s23 }
 0x2ff   :  { %1421 = vrot.lane.b32.xlu0 %v4755_v20, %s3546_s23 }
 0x301   :  { %v5917_v52 = vpop.permute.xlu1 %1275 }
 0x302   :  { %v5915_v3 = vpop.permute.xlu2 %1295  ;;  %9330 = vst [vmem:[#allocation371_spill] sm:$0xff] %v5917_v52  ;;  %v9339_v52 = vld [vmem:[#allocation174_spill] sm:$0xff] }
 0x303   :  { %9329 = vst [vmem:[#allocation370_spill] sm:$0xff] %v5915_v3  ;;  %v5919_v61 = vpop.permute.xlu0 %1273  ;;  %v9338_v3 = vld [vmem:[#allocation39_spill] sm:$0xff] }
 0x304   :  { %9331 = vst [vmem:[#allocation372_spill] sm:$0xff] %v5919_v61 }
 0x305   :  { %1431 = vrot.lane.b32.xlu2 %v9332_v25, %s3546_s23 }
 0x306   :  { %1429 = vrot.lane.b32.xlu1 %v9333_v1, %s3546_s23 }
 0x307   :  { %1427 = vrot.lane.b32.xlu0 %v9334_v30, %s3546_s23 }
 0x309   :  { %v5929_v0 = vpop.permute.xlu1 %1281 }
 0x30a   :  { %v5927_v8 = vpop.permute.xlu2 %1365  ;;  %9336 = vst [vmem:[#allocation173_spill] sm:$0xff] %v5929_v0  ;;  %v9345_v0 = vld [vmem:[#allocation176_spill] sm:$0xff] }
 0x30b   :  { %9335 = vst [vmem:[#allocation172_spill] sm:$0xff] %v5927_v8  ;;  %v5931_v20 = vpop.permute.xlu0 %1279  ;;  %v9372_v8 = vld [vmem:[#allocation96_spill] sm:$0xff] }
 0x30c   :  { %9337 = vst [vmem:[#allocation30_spill] sm:$0xff] %v5931_v20  ;;  %v9346_v20 = vld [vmem:[#allocation51_spill] sm:$0xff] }
 0x30d   :  { %1437 = vrot.lane.b32.xlu2 %v9338_v3, %s3546_s23 }
 0x30e   :  { %1435 = vrot.lane.b32.xlu1 %v9339_v52, %s3546_s23 }
 0x30f   :  { %1433 = vrot.lane.b32.xlu0 %v9340_v57, %s3546_s23 }
 0x311   :  { %v5941_v1 = vpop.permute.xlu1 %1287 }
 0x312   :  { %v5939_v4 = vpop.permute.xlu2 %1371  ;;  %9342 = vst [vmem:[#allocation174_spill] sm:$0xff] %v5941_v1  ;;  %v9351_v1 = vld [vmem:[#allocation177_spill] sm:$0xff] }
 0x313   :  { %9341 = vst [vmem:[#allocation39_spill] sm:$0xff] %v5939_v4  ;;  %v5943_v30 = vpop.permute.xlu0 %1285  ;;  %v9350_v4 = vld [vmem:[#allocation56_spill] sm:$0xff] }
 0x314   :  { %9343 = vst [vmem:[#allocation35_spill] sm:$0xff] %v5943_v30  ;;  %v9352_v30 = vld [vmem:[#allocation49_spill] sm:$0xff] }
 0x315   :  { %1443 = vrot.lane.b32.xlu2 %v9344_v43, %s3546_s23 }
 0x316   :  { %1441 = vrot.lane.b32.xlu1 %v9345_v0, %s3546_s23 }
 0x317   :  { %1439 = vrot.lane.b32.xlu0 %v9346_v20, %s3546_s23 }
 0x319   :  { %v5953_v33 = vpop.permute.xlu1 %1293 }
 0x31a   :  { %v5951_v61 = vpop.permute.xlu2 %1377  ;;  %9348 = vst [vmem:[#allocation176_spill] sm:$0xff] %v5953_v33  ;;  %v9356_v33 = vld [vmem:[#allocation179_spill] sm:$0xff] }
 0x31b   :  { %9347 = vst [vmem:[#allocation175_spill] sm:$0xff] %v5951_v61  ;;  %v5955_v2 = vpop.permute.xlu0 %1291  ;;  %v9355_v61 = vld [vmem:[#allocation178_spill] sm:$0xff] }
 0x31c   :  { %9349 = vst [vmem:[#allocation51_spill] sm:$0xff] %v5955_v2  ;;  %v9357_v2 = vld [vmem:[#allocation68_spill] sm:$0xff] }
 0x31d   :  { %1449 = vrot.lane.b32.xlu2 %v9350_v4, %s3546_s23 }
 0x31e   :  { %1447 = vrot.lane.b32.xlu1 %v9351_v1, %s3546_s23 }
 0x31f   :  { %1445 = vrot.lane.b32.xlu0 %v9352_v30, %s3546_s23 }
 0x321   :  { %v5965_v24 = vpop.permute.xlu1 %1363 }
 0x322   :  { %v5963_v53 = vpop.permute.xlu2 %1383 }
 0x323   :  { %9353 = vst [vmem:[#allocation49_spill] sm:$0xff] %v5963_v53  ;;  %v5967_v19 = vpop.permute.xlu0 %1297  ;;  %v9361_v53 = vld [vmem:[#allocation75_spill] sm:$0xff] }
 0x324   :  { %9354 = vst [vmem:[#allocation373_spill] sm:$0xff] %v5967_v19  ;;  %v9362_v19 = vld [vmem:[#allocation180_spill] sm:$0xff] }
 0x325   :  { %1455 = vrot.lane.b32.xlu2 %v9355_v61, %s3546_s23  ;;  %v9363_v61 = vld [vmem:[#allocation66_spill] sm:$0xff] }
 0x326   :  { %1453 = vrot.lane.b32.xlu1 %v9356_v33, %s3546_s23 }
 0x327   :  { %1451 = vrot.lane.b32.xlu0 %v9357_v2, %s3546_s23 }
 0x329   :  { %v5977_v16 = vpop.permute.xlu1 %1369 }
 0x32a   :  { %v5975_v4 = vpop.permute.xlu2 %1389  ;;  %9359 = vst [vmem:[#allocation375_spill] sm:$0xff] %v5977_v16  ;;  %v9367_v16 = vld [vmem:[#allocation182_spill] sm:$0xff] }
 0x32b   :  { %9358 = vst [vmem:[#allocation374_spill] sm:$0xff] %v5975_v4  ;;  %v5979_v14 = vpop.permute.xlu0 %1367  ;;  %v9366_v4 = vld [vmem:[#allocation181_spill] sm:$0xff] }
 0x32c   :  { %9360 = vst [vmem:[#allocation376_spill] sm:$0xff] %v5979_v14 }
 0x32d   :  { %1461 = vrot.lane.b32.xlu2 %v9361_v53, %s3546_s23  ;;  %v9368_v53 = vld [vmem:[#allocation89_spill] sm:$0xff] }
 0x32e   :  { %1459 = vrot.lane.b32.xlu1 %v9362_v19, %s3546_s23 }
 0x32f   :  { %1457 = vrot.lane.b32.xlu0 %v9363_v61, %s3546_s23 }
 0x331   :  { %v5989_v33 = vpop.permute.xlu1 %1375 }
 0x332   :  { %v5987_v48 = vpop.permute.xlu2 %1395  ;;  %9364 = vst [vmem:[#allocation377_spill] sm:$0xff] %v5989_v33  ;;  %v9373_v33 = vld [vmem:[#allocation183_spill] sm:$0xff] }
 0x333   :  { %v5991_v2 = vpop.permute.xlu0 %1373 }
 0x334   :  { %9365 = vst [vmem:[#allocation378_spill] sm:$0xff] %v5991_v2  ;;  %v9374_v2 = vld [vmem:[#allocation87_spill] sm:$0xff] }
 0x335   :  { %1467 = vrot.lane.b32.xlu2 %v9366_v4, %s3546_s23 }
 0x336   :  { %1465 = vrot.lane.b32.xlu1 %v9367_v16, %s3546_s23 }
 0x337   :  { %1463 = vrot.lane.b32.xlu0 %v9368_v53, %s3546_s23 }
 0x339   :  { %v6001_v19 = vpop.permute.xlu1 %1381 }
 0x33a   :  { %v5999_v14 = vpop.permute.xlu2 %1401  ;;  %9370 = vst [vmem:[#allocation182_spill] sm:$0xff] %v6001_v19  ;;  %v9378_v19 = vld [vmem:[#allocation110_spill] sm:$0xff] }
 0x33b   :  { %9369 = vst [vmem:[#allocation181_spill] sm:$0xff] %v5999_v14  ;;  %v6003_v61 = vpop.permute.xlu0 %1379 }
 0x33c   :  { %9371 = vst [vmem:[#allocation89_spill] sm:$0xff] %v6003_v61 }
 0x33d   :  { %1473 = vrot.lane.b32.xlu2 %v9372_v8, %s3546_s23 }
 0x33e   :  { %1471 = vrot.lane.b32.xlu1 %v9373_v33, %s3546_s23 }
 0x33f   :  { %1469 = vrot.lane.b32.xlu0 %v9374_v2, %s3546_s23 }
 0x341   :  { %v6013_v23 = vpop.permute.xlu1 %1387 }
 0x342   :  { %v6011_v1 = vpop.permute.xlu2 %1407  ;;  %9376 = vst [vmem:[#allocation183_spill] sm:$0xff] %v6013_v23  ;;  %v9382_v23 = vld [vmem:[#allocation186_spill] sm:$0xff] }
 0x343   :  { %9375 = vst [vmem:[#allocation96_spill] sm:$0xff] %v6011_v1  ;;  %v6015_v35 = vpop.permute.xlu0 %1385  ;;  %v564_v1 = vrot.slane %v5486_v62, 2 }
 0x344   :  { %9377 = vst [vmem:[#allocation87_spill] sm:$0xff] %v6015_v35  ;;  %v565_v35 = vrot.slane %v5481_v18, 2 }
 0x345   :  { %1479 = vrot.lane.b32.xlu2 %v5007_v5, %s3546_s23 }
 0x346   :  { %1477 = vrot.lane.b32.xlu1 %v5010_v46, %s3546_s23 }
 0x347   :  { %1475 = vrot.lane.b32.xlu0 %v9378_v19, %s3546_s23 }
 0x349   :  { %v6025_v14 = vpop.permute.xlu1 %1393 }
 0x34a   :  { %v6023_v61 = vpop.permute.xlu2 %1413  ;;  %9380 = vst [vmem:[#allocation379_spill] sm:$0xff] %v6025_v14 }
 0x34b   :  { %9379 = vst [vmem:[#allocation110_spill] sm:$0xff] %v6023_v61  ;;  %v6027_v50 = vpop.permute.xlu0 %1391  ;;  %v567_v61 = vrot.slane %v5762_v59, 2 }
 0x34c   :  { %9381 = vst [vmem:[#allocation380_spill] sm:$0xff] %v6027_v50 }
 0x34d   :  { %1485 = vrot.lane.b32.xlu2 %v5028_v38, %s3546_s23  ;;  %v6045_v38 = vsel %vm382_vm1, %v565_v35, %v567_v61  ;;  %v9392_v61 = vld [vmem:[#allocation200_spill] sm:$0xff] }
 0x34e   :  { %1483 = vrot.lane.b32.xlu1 %v5031_v10, %s3546_s23  ;;  %9386 = vst [vmem:[#allocation384_spill] sm:$0xff] %v6045_v38  ;;  %v6048_v10 = vsel %vm382_vm1, %v564_v1, %v565_v35  ;;  %v9393_v35 = vld [vmem:[#allocation201_spill] sm:$0xff] }
 0x34f   :  { %1481 = vrot.lane.b32.xlu0 %v9382_v23, %s3546_s23  ;;  %9387 = vst [vmem:[#allocation385_spill] sm:$0xff] %v6048_v10  ;;  %v9388_v23 = vld [vmem:[#allocation195_spill] sm:$0xff] }
 0x351   :  { %v6040_v14 = vpop.permute.xlu1 %1399 }
 0x352   :  { %v6037_v5 = vpop.permute.xlu2 %1419  ;;  %9384 = vst [vmem:[#allocation382_spill] sm:$0xff] %v6040_v14 }
 0x353   :  { %9383 = vst [vmem:[#allocation381_spill] sm:$0xff] %v6037_v5  ;;  %v6042_v50 = vpop.permute.xlu0 %1397 }
 0x354   :  { %9385 = vst [vmem:[#allocation383_spill] sm:$0xff] %v6042_v50  ;;  %v9422_v50 = vld [vmem:[#allocation231_spill] sm:$0xff] }
 0x355   :  { %1555 = vrot.lane.b32.xlu2 %v9388_v23, %s3547_s24  ;;  %v9394_v23 = vld [vmem:[#allocation194_spill] sm:$0xff] }
 0x356   :  { %1489 = vrot.lane.b32.xlu1 %v6045_v38, %s3546_s23 }
 0x357   :  { %1487 = vrot.lane.b32.xlu0 %v6048_v10, %s3546_s23 }
 0x359   :  { %v6058_v5 = vpop.permute.xlu1 %1405 }
 0x35a   :  { %v6056_v59 = vpop.permute.xlu2 %1425  ;;  %9390 = vst [vmem:[#allocation386_spill] sm:$0xff] %v6058_v5  ;;  %v9399_v5 = vld [vmem:[#allocation207_spill] sm:$0xff] }
 0x35b   :  { %9389 = vst [vmem:[#allocation195_spill] sm:$0xff] %v6056_v59  ;;  %v6060_v14 = vpop.permute.xlu0 %1403  ;;  %v9398_v59 = vld [vmem:[#allocation206_spill] sm:$0xff] }
 0x35c   :  { %9391 = vst [vmem:[#allocation387_spill] sm:$0xff] %v6060_v14 }
 0x35d   :  { %1561 = vrot.lane.b32.xlu2 %v9392_v61, %s3547_s24  ;;  %v9400_v61 = vld [vmem:[#allocation199_spill] sm:$0xff] }
 0x35e   :  { %1559 = vrot.lane.b32.xlu1 %v9393_v35, %s3547_s24 }
 0x35f   :  { %1557 = vrot.lane.b32.xlu0 %v9394_v23, %s3547_s24 }
 0x361   :  { %v6070_v38 = vpop.permute.xlu1 %1411 }
 0x362   :  { %v6068_v1 = vpop.permute.xlu2 %1431  ;;  %9396 = vst [vmem:[#allocation201_spill] sm:$0xff] %v6070_v38  ;;  %v9405_v38 = vld [vmem:[#allocation213_spill] sm:$0xff] }
 0x363   :  { %9395 = vst [vmem:[#allocation200_spill] sm:$0xff] %v6068_v1  ;;  %v6072_v10 = vpop.permute.xlu0 %1409  ;;  %v9404_v1 = vld [vmem:[#allocation212_spill] sm:$0xff] }
 0x364   :  { %9397 = vst [vmem:[#allocation194_spill] sm:$0xff] %v6072_v10 }
 0x365   :  { %1567 = vrot.lane.b32.xlu2 %v9398_v59, %s3547_s24  ;;  %v9406_v59 = vld [vmem:[#allocation205_spill] sm:$0xff] }
 0x366   :  { %1565 = vrot.lane.b32.xlu1 %v9399_v5, %s3547_s24 }
 0x367   :  { %1563 = vrot.lane.b32.xlu0 %v9400_v61, %s3547_s24 }
 0x369   :  { %v6082_v35 = vpop.permute.xlu1 %1417 }
 0x36a   :  { %v6080_v14 = vpop.permute.xlu2 %1437  ;;  %9402 = vst [vmem:[#allocation207_spill] sm:$0xff] %v6082_v35  ;;  %v9411_v35 = vld [vmem:[#allocation219_spill] sm:$0xff] }
 0x36b   :  { %9401 = vst [vmem:[#allocation206_spill] sm:$0xff] %v6080_v14  ;;  %v6084_v23 = vpop.permute.xlu0 %1415  ;;  %v9410_v14 = vld [vmem:[#allocation218_spill] sm:$0xff] }
 0x36c   :  { %9403 = vst [vmem:[#allocation199_spill] sm:$0xff] %v6084_v23 }
 0x36d   :  { %1573 = vrot.lane.b32.xlu2 %v9404_v1, %s3547_s24  ;;  %v9412_v1 = vld [vmem:[#allocation211_spill] sm:$0xff] }
 0x36e   :  { %1571 = vrot.lane.b32.xlu1 %v9405_v38, %s3547_s24 }
 0x36f   :  { %1569 = vrot.lane.b32.xlu0 %v9406_v59, %s3547_s24 }
 0x371   :  { %v6094_v5 = vpop.permute.xlu1 %1423 }
 0x372   :  { %v6092_v10 = vpop.permute.xlu2 %1443  ;;  %9408 = vst [vmem:[#allocation213_spill] sm:$0xff] %v6094_v5  ;;  %v9416_v5 = vld [vmem:[#allocation225_spill] sm:$0xff] }
 0x373   :  { %9407 = vst [vmem:[#allocation212_spill] sm:$0xff] %v6092_v10  ;;  %v6096_v61 = vpop.permute.xlu0 %1421  ;;  %v9415_v10 = vld [vmem:[#allocation224_spill] sm:$0xff] }
 0x374   :  { %9409 = vst [vmem:[#allocation205_spill] sm:$0xff] %v6096_v61 }
 0x375   :  { %1579 = vrot.lane.b32.xlu2 %v9410_v14, %s3547_s24  ;;  %v9417_v14 = vld [vmem:[#allocation217_spill] sm:$0xff] }
 0x376   :  { %1577 = vrot.lane.b32.xlu1 %v9411_v35, %s3547_s24 }
 0x377   :  { %1575 = vrot.lane.b32.xlu0 %v9412_v1, %s3547_s24 }
 0x379   :  { %v6106_v38 = vpop.permute.xlu1 %1429 }
 0x37a   :  { %v6104_v23 = vpop.permute.xlu2 %1449  ;;  %9414 = vst [vmem:[#allocation219_spill] sm:$0xff] %v6106_v38 }
 0x37b   :  { %9413 = vst [vmem:[#allocation218_spill] sm:$0xff] %v6104_v23  ;;  %v6108_v59 = vpop.permute.xlu0 %1427  ;;  %v9421_v23 = vld [vmem:[#allocation230_spill] sm:$0xff] }
 0x37d   :  { %1585 = vrot.lane.b32.xlu2 %v9415_v10, %s3547_s24  ;;  %v9423_v10 = vld [vmem:[#allocation223_spill] sm:$0xff] }
 0x37e   :  { %1583 = vrot.lane.b32.xlu1 %v9416_v5, %s3547_s24 }
 0x37f   :  { %1581 = vrot.lane.b32.xlu0 %v9417_v14, %s3547_s24 }
 0x381   :  { %v6118_v35 = vpop.permute.xlu1 %1435 }
 0x382   :  { %v6116_v61 = vpop.permute.xlu2 %1455  ;;  %9419 = vst [vmem:[#allocation224_spill] sm:$0xff] %v6118_v35  ;;  %v9428_v35 = vld [vmem:[#allocation237_spill] sm:$0xff] }
 0x383   :  { %9418 = vst [vmem:[#allocation211_spill] sm:$0xff] %v6116_v61  ;;  %v6120_v1 = vpop.permute.xlu0 %1433  ;;  %v9427_v61 = vld [vmem:[#allocation236_spill] sm:$0xff] }
 0x384   :  { %9420 = vst [vmem:[#allocation225_spill] sm:$0xff] %v6120_v1 }
 0x385   :  { %1591 = vrot.lane.b32.xlu2 %v9421_v23, %s3547_s24  ;;  %v9429_v23 = vld [vmem:[#allocation229_spill] sm:$0xff] }
 0x386   :  { %1589 = vrot.lane.b32.xlu1 %v9422_v50, %s3547_s24 }
 0x387   :  { %1587 = vrot.lane.b32.xlu0 %v9423_v10, %s3547_s24 }
 0x389   :  { %v6130_v5 = vpop.permute.xlu1 %1441 }
 0x38a   :  { %v6128_v38 = vpop.permute.xlu2 %1461  ;;  %9425 = vst [vmem:[#allocation230_spill] sm:$0xff] %v6130_v5  ;;  %v9434_v5 = vld [vmem:[#allocation243_spill] sm:$0xff] }
 0x38b   :  { %9424 = vst [vmem:[#allocation217_spill] sm:$0xff] %v6128_v38  ;;  %v6132_v14 = vpop.permute.xlu0 %1439  ;;  %v9433_v38 = vld [vmem:[#allocation242_spill] sm:$0xff] }
 0x38c   :  { %9426 = vst [vmem:[#allocation231_spill] sm:$0xff] %v6132_v14 }
 0x38d   :  { %1597 = vrot.lane.b32.xlu2 %v9427_v61, %s3547_s24  ;;  %v9435_v61 = vld [vmem:[#allocation235_spill] sm:$0xff] }
 0x38e   :  { %1595 = vrot.lane.b32.xlu1 %v9428_v35, %s3547_s24 }
 0x38f   :  { %1593 = vrot.lane.b32.xlu0 %v9429_v23, %s3547_s24 }
 0x391   :  { %v6142_v50 = vpop.permute.xlu1 %1447 }
 0x392   :  { %v6140_v1 = vpop.permute.xlu2 %1467  ;;  %9431 = vst [vmem:[#allocation236_spill] sm:$0xff] %v6142_v50  ;;  %v9440_v50 = vld [vmem:[#allocation248_spill] sm:$0xff] }
 0x393   :  { %9430 = vst [vmem:[#allocation223_spill] sm:$0xff] %v6140_v1  ;;  %v6144_v10 = vpop.permute.xlu0 %1445  ;;  %v9439_v1 = vld [vmem:[#allocation247_spill] sm:$0xff] }
 0x394   :  { %9432 = vst [vmem:[#allocation237_spill] sm:$0xff] %v6144_v10 }
 0x395   :  { %1603 = vrot.lane.b32.xlu2 %v9433_v38, %s3547_s24  ;;  %v9441_v38 = vld [vmem:[#allocation241_spill] sm:$0xff] }
 0x396   :  { %1601 = vrot.lane.b32.xlu1 %v9434_v5, %s3547_s24 }
 0x397   :  { %1599 = vrot.lane.b32.xlu0 %v9435_v61, %s3547_s24 }
 0x399   :  { %v6154_v35 = vpop.permute.xlu1 %1453 }
 0x39a   :  { %v6152_v14 = vpop.permute.xlu2 %1473  ;;  %9437 = vst [vmem:[#allocation242_spill] sm:$0xff] %v6154_v35  ;;  %v68_v35 = vld [vmem:[%s8501_s0 + $0x198] sm:$0xff] }
 0x39b   :  { %9436 = vst [vmem:[#allocation229_spill] sm:$0xff] %v6152_v14  ;;  %v6156_v23 = vpop.permute.xlu0 %1451  ;;  %v9452_v14 = vld [vmem:[#allocation263_spill] sm:$0xff] }
 0x39c   :  { %9438 = vst [vmem:[#allocation243_spill] sm:$0xff] %v6156_v23  ;;  %v9447_v23 = vld [vmem:[#allocation256_spill] sm:$0xff] }
 0x39d   :  { %1609 = vrot.lane.b32.xlu2 %v9439_v1, %s3547_s24 }
 0x39e   :  { %1607 = vrot.lane.b32.xlu1 %v9440_v50, %s3547_s24 }
 0x39f   :  { %1605 = vrot.lane.b32.xlu0 %v9441_v38, %s3547_s24 }
 0x3a1   :  { %v6166_v5 = vpop.permute.xlu1 %1459 }
 0x3a2   :  { %v6164_v10 = vpop.permute.xlu2 %1479 }
 0x3a3   :  { %9442 = vst [vmem:[#allocation235_spill] sm:$0xff] %v6164_v10  ;;  %v6168_v61 = vpop.permute.xlu0 %1457  ;;  %v9451_v10 = vld [vmem:[#allocation262_spill] sm:$0xff] }
 0x3a4   :  { %9443 = vst [vmem:[#allocation247_spill] sm:$0xff] %v6168_v61  ;;  %v69_v61 = vld [vmem:[%s8501_s0 + $0x1a0] sm:$0xff] }
 0x3a5   :  { %1615 = vrot.lane.b32.xlu2 %v68_v35, %s3547_s24  ;;  %v9448_v35 = vld [vmem:[#allocation257_spill] sm:$0xff] }
 0x3a6   :  { %1613 = vrot.lane.b32.xlu1 %v5317_v60, %s3547_s24 }
 0x3a7   :  { %1611 = vrot.lane.b32.xlu0 %v5290_v45, %s3547_s24 }
 0x3a9   :  { %v6180_v50 = vpop.permute.xlu1 %1465 }
 0x3aa   :  { %v6178_v1 = vpop.permute.xlu2 %1485  ;;  %9445 = vst [vmem:[#allocation241_spill] sm:$0xff] %v6180_v50  ;;  %v9453_v50 = vld [vmem:[#allocation255_spill] sm:$0xff] }
 0x3ab   :  { %9444 = vst [vmem:[#allocation248_spill] sm:$0xff] %v6178_v1  ;;  %v6182_v38 = vpop.permute.xlu0 %1463 }
 0x3ac   :  { %9446 = vst [vmem:[#allocation388_spill] sm:$0xff] %v6182_v38 }
 0x3ad   :  { %1621 = vrot.lane.b32.xlu2 %v9447_v23, %s3547_s24 }
 0x3ae   :  { %1619 = vrot.lane.b32.xlu1 %v9448_v35, %s3547_s24 }
 0x3af   :  { %1617 = vrot.lane.b32.xlu0 %v69_v61, %s3547_s24 }
 0x3b1   :  { %v6194_v45 = vpop.permute.xlu1 %1471 }
 0x3b2   :  { %v6192_v60 = vpop.permute.xlu2 %1555  ;;  %9449 = vst [vmem:[#allocation256_spill] sm:$0xff] %v6194_v45  ;;  %v3459_v45 = vld [vmem:[%s8501_s0 + $0x230] sm:$0xff] }
 0x3b3   :  { %v6196_v1 = vpop.permute.xlu0 %1469 }
 0x3b4   :  { %9450 = vst [vmem:[#allocation257_spill] sm:$0xff] %v6196_v1  ;;  %v3461_v1 = vld [vmem:[%s8501_s0 + $0x258] sm:$0xff] }
 0x3b5   :  { %1627 = vrot.lane.b32.xlu2 %v9451_v10, %s3547_s24  ;;  %v3460_v10 = vld [vmem:[%s8501_s0 + $0x228] sm:$0xff] }
 0x3b6   :  { %1625 = vrot.lane.b32.xlu1 %v9452_v14, %s3547_s24  ;;  %v9457_v14 = vld [vmem:[#allocation261_spill] sm:$0xff] }
 0x3b7   :  { %1623 = vrot.lane.b32.xlu0 %v9453_v50, %s3547_s24 }
 0x3b9   :  { %v6206_v35 = vpop.permute.xlu1 %1477 }
 0x3ba   :  { %v6204_v23 = vpop.permute.xlu2 %1561  ;;  %9455 = vst [vmem:[#allocation263_spill] sm:$0xff] %v6206_v35 }
 0x3bb   :  { %9454 = vst [vmem:[#allocation262_spill] sm:$0xff] %v6204_v23  ;;  %v6208_v61 = vpop.permute.xlu0 %1475 }
 0x3bc   :  { %9456 = vst [vmem:[#allocation255_spill] sm:$0xff] %v6208_v61 }
 0x3bd   :  { %1633 = vrot.lane.b32.xlu2 %v3459_v45, %s3547_s24  ;;  %v3462_v45 = vld [vmem:[%s8501_s0 + $0x240] sm:$0xff] }
 0x3be   :  { %1631 = vrot.lane.b32.xlu1 %v3460_v10, %s3547_s24 }
 0x3bf   :  { %1629 = vrot.lane.b32.xlu0 %v9457_v14, %s3547_s24 }
 0x3c1   :  { %v6222_v35 = vpop.permute.xlu1 %1483 }
 0x3c2   :  { %v6220_v50 = vpop.permute.xlu2 %1567  ;;  %9459 = vst [vmem:[#allocation389_spill] sm:$0xff] %v6222_v35 }
 0x3c3   :  { %9458 = vst [vmem:[#allocation261_spill] sm:$0xff] %v6220_v50  ;;  %v6224_v61 = vpop.permute.xlu0 %1481  ;;  %v6276_v50 = vld [vmem:[%s8501_s0 + $0x290] sm:$0xff] }
 0x3c4   :  { %9460 = vst [vmem:[#allocation390_spill] sm:$0xff] %v6224_v61  ;;  %v6245_v61 = vld [vmem:[%s8501_s0 + $0x278] sm:$0xff] }
 0x3c5   :  { %1639 = vrot.lane.b32.xlu2 %v3461_v1, %s3547_s24  ;;  %v3465_v1 = vld [vmem:[%s8501_s0 + $0x260] sm:$0xff]  ;;  %9467 = vst [vmem:[#allocation397_spill] sm:$0xff] %v6276_v50 }
 0x3c6   :  { %1637 = vrot.lane.b32.xlu1 %v5408_v9, %s3547_s24  ;;  %v6252_v9 = vld [vmem:[%s8501_s0 + $0x270] sm:$0xff] }
 0x3c7   :  { %1635 = vrot.lane.b32.xlu0 %v3462_v45, %s3547_s24 }
 0x3c9   :  { %v6238_v14 = vpop.permute.xlu1 %1489 }
 0x3ca   :  { %v6236_v10 = vpop.permute.xlu2 %1573  ;;  %9462 = vst [vmem:[#allocation392_spill] sm:$0xff] %v6238_v14 }
 0x3cb   :  { %9461 = vst [vmem:[#allocation391_spill] sm:$0xff] %v6236_v10  ;;  %v6240_v35 = vpop.permute.xlu0 %1487  ;;  %v6269_v10 = vld [vmem:[%s8501_s0 + $0x2a0] sm:$0xff] }
 0x3cc   :  { %9463 = vst [vmem:[#allocation393_spill] sm:$0xff] %v6240_v35 }
 0x3cd   :  { %1645 = vrot.lane.b32.xlu2 %v6245_v61, %s3547_s24  ;;  %9466 = vst [vmem:[#allocation396_spill] sm:$0xff] %v6269_v10 }
 0x3ce   :  { %1643 = vrot.lane.b32.xlu1 %v6252_v9, %s3547_s24 }
 0x3cf   :  { %1641 = vrot.lane.b32.xlu0 %v3465_v1, %s3547_s24  ;;  %v6283_v1 = vld [vmem:[%s8501_s0 + $0x288] sm:$0xff] }
 0x3d1   :  { %v6262_v14 = vpop.permute.xlu1 %1559 }
 0x3d2   :  { %v6260_v45 = vpop.permute.xlu2 %1579  ;;  %9465 = vst [vmem:[#allocation395_spill] sm:$0xff] %v6262_v14  ;;  %v3469_v14 = vld [vmem:[%s8501_s0 + $0x2c0] sm:$0xff] }
 0x3d3   :  { %9464 = vst [vmem:[#allocation394_spill] sm:$0xff] %v6260_v45  ;;  %v6264_v35 = vpop.permute.xlu0 %1557 }
 0x3d5   :  { %1651 = vrot.lane.b32.xlu2 %v6269_v10, %s3547_s24 }
 0x3d6   :  { %1649 = vrot.lane.b32.xlu1 %v6276_v50, %s3547_s24  ;;  %v3470_v50 = vld [vmem:[%s8501_s0 + $0x2b8] sm:$0xff] }
 0x3d7   :  { %1647 = vrot.lane.b32.xlu0 %v6283_v1, %s3547_s24 }
 0x3d9   :  { %v6289_v23 = vpop.permute.xlu1 %1565 }
 0x3da   :  { %v6287_v45 = vpop.permute.xlu2 %1585  ;;  %9469 = vst [vmem:[#allocation399_spill] sm:$0xff] %v6289_v23 }
 0x3db   :  { %9468 = vst [vmem:[#allocation398_spill] sm:$0xff] %v6287_v45  ;;  %v6291_v10 = vpop.permute.xlu0 %1563  ;;  %v6304_v45 = vld [vmem:[%s8501_s0 + $0x2a8] sm:$0xff] }
 0x3dc   :  { %9470 = vst [vmem:[#allocation400_spill] sm:$0xff] %v6291_v10 }
 0x3dd   :  { %1657 = vrot.lane.b32.xlu2 %v3469_v14, %s3547_s24  ;;  %9471 = vst [vmem:[#allocation401_spill] sm:$0xff] %v6304_v45  ;;  %v3472_v14 = vld [vmem:[%s8501_s0 + $0x2e8] sm:$0xff] }
 0x3de   :  { %1655 = vrot.lane.b32.xlu1 %v3470_v50, %s3547_s24  ;;  %v3473_v50 = vld [vmem:[%s8501_s0 + $0x2d8] sm:$0xff] }
 0x3df   :  { %1653 = vrot.lane.b32.xlu0 %v6304_v45, %s3547_s24  ;;  %v3474_v45 = vld [vmem:[%s8501_s0 + $0x2d0] sm:$0xff] }
 0x3e1   :  { %v6310_v10 = vpop.permute.xlu1 %1571 }
 0x3e2   :  { %v6308_v23 = vpop.permute.xlu2 %1591  ;;  %9473 = vst [vmem:[#allocation403_spill] sm:$0xff] %v6310_v10 }
 0x3e3   :  { %9472 = vst [vmem:[#allocation402_spill] sm:$0xff] %v6308_v23  ;;  %v6312_v38 = vpop.permute.xlu0 %1569 }
 0x3e4   :  { %9474 = vst [vmem:[#allocation404_spill] sm:$0xff] %v6312_v38 }
 0x3e5   :  { %1663 = vrot.lane.b32.xlu2 %v3472_v14, %s3547_s24  ;;  %v3475_v14 = vld [vmem:[%s8501_s0 + $0x308] sm:$0xff] }
 0x3e6   :  { %1661 = vrot.lane.b32.xlu1 %v3473_v50, %s3547_s24  ;;  %v3476_v50 = vld [vmem:[%s8501_s0 + $0x300] sm:$0xff] }
 0x3e7   :  { %1659 = vrot.lane.b32.xlu0 %v3474_v45, %s3547_s24  ;;  %v3477_v45 = vld [vmem:[%s8501_s0 + $0x2f0] sm:$0xff] }
 0x3e9   :  { %v6328_v38 = vpop.permute.xlu1 %1577 }
 0x3ea   :  { %v6326_v10 = vpop.permute.xlu2 %1597  ;;  %9476 = vst [vmem:[#allocation406_spill] sm:$0xff] %v6328_v38 }
 0x3eb   :  { %9475 = vst [vmem:[#allocation405_spill] sm:$0xff] %v6326_v10  ;;  %v6330_v23 = vpop.permute.xlu0 %1575 }
 0x3ec   :  { %9477 = vst [vmem:[#allocation407_spill] sm:$0xff] %v6330_v23 }
 0x3ed   :  { %1669 = vrot.lane.b32.xlu2 %v3475_v14, %s3547_s24  ;;  %v3478_v14 = vld [vmem:[%s8501_s0 + $0x320] sm:$0xff] }
 0x3ee   :  { %1667 = vrot.lane.b32.xlu1 %v3476_v50, %s3547_s24  ;;  %v3479_v50 = vld [vmem:[%s8501_s0 + $0x318] sm:$0xff] }
 0x3ef   :  { %1665 = vrot.lane.b32.xlu0 %v3477_v45, %s3547_s24 }
 0x3f1   :  { %v6346_v23 = vpop.permute.xlu1 %1583 }
 0x3f2   :  { %v6344_v38 = vpop.permute.xlu2 %1603  ;;  %9479 = vst [vmem:[#allocation409_spill] sm:$0xff] %v6346_v23 }
 0x3f3   :  { %9478 = vst [vmem:[#allocation408_spill] sm:$0xff] %v6344_v38  ;;  %v6348_v10 = vpop.permute.xlu0 %1581 }
 0x3f4   :  { %9480 = vst [vmem:[#allocation410_spill] sm:$0xff] %v6348_v10 }
 0x3f5   :  { %1675 = vrot.lane.b32.xlu2 %v5486_v62, %s3547_s24  ;;  %v6369_v62 = vld [vmem:[%s8501_s0 + $0x350] sm:$0xff] }
 0x3f6   :  { %1673 = vrot.lane.b32.xlu1 %v3478_v14, %s3547_s24  ;;  %9482 = vst [vmem:[#allocation412_spill] sm:$0xff] %v6369_v62  ;;  %v6374_v14 = vld [vmem:[%s8501_s0 + $0x348] sm:$0xff] }
 0x3f7   :  { %1671 = vrot.lane.b32.xlu0 %v3479_v50, %s3547_s24  ;;  %9483 = vst [vmem:[#allocation413_spill] sm:$0xff] %v6374_v14 }
 0x3f9   :  { %v6362_v23 = vpop.permute.xlu1 %1589 }
 0x3fa   :  { %v6360_v45 = vpop.permute.xlu2 %1609 }
 0x3fb   :  { %9481 = vst [vmem:[#allocation411_spill] sm:$0xff] %v6360_v45  ;;  %v6364_v10 = vpop.permute.xlu0 %1587 }
 0x3fd   :  { %1681 = vrot.lane.b32.xlu2 %v6369_v62, %s3547_s24 }
 0x3fe   :  { %1679 = vrot.lane.b32.xlu1 %v6374_v14, %s3547_s24 }
 0x3ff   :  { %1677 = vrot.lane.b32.xlu0 %v5481_v18, %s3547_s24  ;;  %s3549_s24 = smov 32  }
 0x401   :  { %v6384_v45 = vpop.permute.xlu1 %1595 }
 0x402   :  { %v6382_v50 = vpop.permute.xlu2 %1615 }
 0x403   :  { %9484 = vst [vmem:[#allocation414_spill] sm:$0xff] %v6382_v50  ;;  %v6386_v38 = vpop.permute.xlu0 %1593 }
 0x405   :  { %1751 = vrot.lane.b32.xlu2 %v9180_v29, %s3548_s25 }
 0x406   :  { %1749 = vrot.lane.b32.xlu1 %v9181_v40, %s3548_s25 }
 0x407   :  { %1747 = vrot.lane.b32.xlu0 %v9173_v28, %s3548_s25 }
 0x409   :  { %v6396_v62 = vpop.permute.xlu1 %1601 }
 0x40a   :  { %v6394_v14 = vpop.permute.xlu2 %1621  ;;  %9485 = vst [vmem:[#allocation415_spill] sm:$0xff] %v6396_v62  ;;  %v9505_v62 = vld [vmem:[#allocation24_spill] sm:$0xff] }
 0x40b   :  { %v6398_v18 = vpop.permute.xlu0 %1599 }
 0x40c   :  { %9486 = vst [vmem:[#allocation416_spill] sm:$0xff] %v6398_v18  ;;  %v9510_v18 = vld [vmem:[#allocation33_spill] sm:$0xff] }
 0x40d   :  { %1757 = vrot.lane.b32.xlu2 %v9186_v17, %s3548_s25 }
 0x40e   :  { %1755 = vrot.lane.b32.xlu1 %v9187_v15, %s3548_s25 }
 0x40f   :  { %1753 = vrot.lane.b32.xlu0 %v9179_v36, %s3548_s25 }
 0x411   :  { %v6408_v40 = vpop.permute.xlu1 %1607 }
 0x412   :  { %v6406_v29 = vpop.permute.xlu2 %1627  ;;  %9487 = vst [vmem:[#allocation417_spill] sm:$0xff] %v6408_v40  ;;  %v9500_v40 = vld [vmem:[#allocation21_spill] sm:$0xff] }
 0x413   :  { %v6410_v28 = vpop.permute.xlu0 %1605 }
 0x414   :  { %9488 = vst [vmem:[#allocation418_spill] sm:$0xff] %v6410_v28  ;;  %v9504_v28 = vld [vmem:[#allocation29_spill] sm:$0xff] }
 0x415   :  { %1763 = vrot.lane.b32.xlu2 %v9192_v32, %s3548_s25 }
 0x416   :  { %1761 = vrot.lane.b32.xlu1 %v9193_v42, %s3548_s25 }
 0x417   :  { %1759 = vrot.lane.b32.xlu0 %v9185_v27, %s3548_s25 }
 0x419   :  { %v6420_v15 = vpop.permute.xlu1 %1613 }
 0x41a   :  { %v6418_v17 = vpop.permute.xlu2 %1633  ;;  %9490 = vst [vmem:[#allocation420_spill] sm:$0xff] %v6420_v15  ;;  %v9496_v15 = vld [vmem:[#allocation23_spill] sm:$0xff] }
 0x41b   :  { %9489 = vst [vmem:[#allocation419_spill] sm:$0xff] %v6418_v17  ;;  %v6422_v36 = vpop.permute.xlu0 %1611 }
 0x41c   :  { %9491 = vst [vmem:[#allocation421_spill] sm:$0xff] %v6422_v36 }
 0x41d   :  { %1769 = vrot.lane.b32.xlu2 %v9198_v12, %s3548_s25  ;;  %v9494_v12 = vld [vmem:[#allocation16_spill] sm:$0xff] }
 0x41e   :  { %1767 = vrot.lane.b32.xlu1 %v9199_v13, %s3548_s25 }
 0x41f   :  { %1765 = vrot.lane.b32.xlu0 %v9191_v55, %s3548_s25 }
 0x421   :  { %v6432_v42 = vpop.permute.xlu1 %1619 }
 0x422   :  { %v6430_v32 = vpop.permute.xlu2 %1639 }
 0x423   :  { %9492 = vst [vmem:[#allocation422_spill] sm:$0xff] %v6430_v32  ;;  %v6434_v27 = vpop.permute.xlu0 %1617 }
 0x424   :  { %9493 = vst [vmem:[#allocation423_spill] sm:$0xff] %v6434_v27  ;;  %v9497_v27 = vld [vmem:[#allocation18_spill] sm:$0xff] }
 0x425   :  { %1775 = vrot.lane.b32.xlu2 %v9204_v11, %s3548_s25  ;;  %v9498_v11 = vld [vmem:[#allocation19_spill] sm:$0xff] }
 0x426   :  { %1773 = vrot.lane.b32.xlu1 %v9205_v56, %s3548_s25 }
 0x427   :  { %1771 = vrot.lane.b32.xlu0 %v9494_v12, %s3548_s25 }
 0x429   :  { %v6444_v13 = vpop.permute.xlu1 %1625 }
 0x42a   :  { %v6442_v50 = vpop.permute.xlu2 %1645 }
 0x42b   :  { %9495 = vst [vmem:[#allocation16_spill] sm:$0xff] %v6442_v50  ;;  %v6446_v55 = vpop.permute.xlu0 %1623  ;;  %v9499_v50 = vld [vmem:[#allocation26_spill] sm:$0xff] }
 0x42d   :  { %1781 = vrot.lane.b32.xlu2 %v9496_v15, %s3548_s25  ;;  %v9501_v15 = vld [vmem:[#allocation22_spill] sm:$0xff] }
 0x42e   :  { %1779 = vrot.lane.b32.xlu1 %v9497_v27, %s3548_s25 }
 0x42f   :  { %1777 = vrot.lane.b32.xlu0 %v9498_v11, %s3548_s25 }
 0x431   :  { %v6456_v56 = vpop.permute.xlu1 %1631 }
 0x432   :  { %v6454_v36 = vpop.permute.xlu2 %1651 }
 0x433   :  { %v6458_v12 = vpop.permute.xlu0 %1629 }
 0x435   :  { %1787 = vrot.lane.b32.xlu2 %v9499_v50, %s3548_s25  ;;  %v9506_v50 = vld [vmem:[#allocation25_spill] sm:$0xff] }
 0x436   :  { %1785 = vrot.lane.b32.xlu1 %v9500_v40, %s3548_s25 }
 0x437   :  { %1783 = vrot.lane.b32.xlu0 %v9501_v15, %s3548_s25 }
 0x439   :  { %v6468_v27 = vpop.permute.xlu1 %1637 }
 0x43a   :  { %v6466_v32 = vpop.permute.xlu2 %1657  ;;  %9502 = vst [vmem:[#allocation23_spill] sm:$0xff] %v6468_v27  ;;  %v9511_v27 = vld [vmem:[#allocation27_spill] sm:$0xff] }
 0x43b   :  { %v6470_v11 = vpop.permute.xlu0 %1635 }
 0x43c   :  { %9503 = vst [vmem:[#allocation18_spill] sm:$0xff] %v6470_v11 }
 0x43d   :  { %1793 = vrot.lane.b32.xlu2 %v9504_v28, %s3548_s25  ;;  %v9512_v28 = vld [vmem:[#allocation28_spill] sm:$0xff] }
 0x43e   :  { %1791 = vrot.lane.b32.xlu1 %v9505_v62, %s3548_s25 }
 0x43f   :  { %1789 = vrot.lane.b32.xlu0 %v9506_v50, %s3548_s25 }
 0x441   :  { %v6480_v40 = vpop.permute.xlu1 %1643 }
 0x442   :  { %v6478_v17 = vpop.permute.xlu2 %1663  ;;  %9508 = vst [vmem:[#allocation26_spill] sm:$0xff] %v6480_v40  ;;  %v9517_v40 = vld [vmem:[#allocation306_spill] sm:$0xff] }
 0x443   :  { %9507 = vst [vmem:[#allocation19_spill] sm:$0xff] %v6478_v17  ;;  %v6482_v15 = vpop.permute.xlu0 %1641  ;;  %v9516_v17 = vld [vmem:[#allocation47_spill] sm:$0xff] }
 0x444   :  { %9509 = vst [vmem:[#allocation21_spill] sm:$0xff] %v6482_v15 }
 0x445   :  { %1799 = vrot.lane.b32.xlu2 %v9510_v18, %s3548_s25  ;;  %v9518_v18 = vld [vmem:[#allocation32_spill] sm:$0xff] }
 0x446   :  { %1797 = vrot.lane.b32.xlu1 %v9511_v27, %s3548_s25 }
 0x447   :  { %1795 = vrot.lane.b32.xlu0 %v9512_v28, %s3548_s25 }
 0x449   :  { %v6492_v62 = vpop.permute.xlu1 %1649 }
 0x44a   :  { %v6490_v11 = vpop.permute.xlu2 %1669  ;;  %9514 = vst [vmem:[#allocation29_spill] sm:$0xff] %v6492_v62 }
 0x44b   :  { %9513 = vst [vmem:[#allocation22_spill] sm:$0xff] %v6490_v11  ;;  %v6494_v50 = vpop.permute.xlu0 %1647 }
 0x44c   :  { %9515 = vst [vmem:[#allocation24_spill] sm:$0xff] %v6494_v50  ;;  %v9522_v50 = vld [vmem:[#allocation46_spill] sm:$0xff] }
 0x44d   :  { %1811 = vrot.lane.b32.xlu2 %v9516_v17, %s3548_s25  ;;  %v9520_v17 = vld [vmem:[#allocation94_spill] sm:$0xff] }
 0x44e   :  { %1803 = vrot.lane.b32.xlu1 %v9517_v40, %s3548_s25 }
 0x44f   :  { %1801 = vrot.lane.b32.xlu0 %v9518_v18, %s3548_s25 }
 0x451   :  { %v6504_v27 = vpop.permute.xlu1 %1655 }
 0x452   :  { %v6502_v15 = vpop.permute.xlu2 %1675 }
 0x453   :  { %9519 = vst [vmem:[#allocation25_spill] sm:$0xff] %v6502_v15  ;;  %v6506_v28 = vpop.permute.xlu0 %1653  ;;  %v9527_v15 = vld [vmem:[#allocation45_spill] sm:$0xff] }
 0x455   :  { %2035 = vrot.lane.b32.xlu2 %v9368_v53, %s3549_s24 }
 0x456   :  { %2003 = vrot.lane.b32.xlu1 %v9332_v25, %s3549_s24 }
 0x457   :  { %1843 = vrot.lane.b32.xlu0 %v9520_v17, %s3548_s25 }
 0x459   :  { %v6516_v62 = vpop.permute.xlu1 %1661 }
 0x45a   :  { %v6514_v40 = vpop.permute.xlu2 %1681 }
 0x45b   :  { %9521 = vst [vmem:[#allocation33_spill] sm:$0xff] %v6514_v40  ;;  %v6518_v18 = vpop.permute.xlu0 %1659 }
 0x45d   :  { %1813 = vrot.lane.b32.xlu2 %v9522_v50, %s3548_s25  ;;  %v9524_v50 = vld [vmem:[#allocation93_spill] sm:$0xff] }
 0x45e   :  { %1971 = vrot.lane.b32.xlu1 %v4685_v54, %s3549_s24 }
 0x45f   :  { %1939 = vrot.lane.b32.xlu0 %v4526_v34, %s3549_s24 }
 0x461   :  { %v6528_v25 = vpop.permute.xlu1 %1667 }
 0x462   :  { %v6526_v53 = vpop.permute.xlu2 %1751  ;;  %9523 = vst [vmem:[#allocation27_spill] sm:$0xff] %v6528_v25  ;;  %v9559_v25 = vld [vmem:[#allocation20_spill] sm:$0xff] }
 0x463   :  { %v6530_v17 = vpop.permute.xlu0 %1665 }
 0x465   :  { %2037 = vrot.lane.b32.xlu2 %v9367_v16, %s3549_s24 }
 0x466   :  { %2005 = vrot.lane.b32.xlu1 %v9340_v57, %s3549_s24 }
 0x467   :  { %1845 = vrot.lane.b32.xlu0 %v9524_v50, %s3548_s25 }
 0x469   :  { %v6540_v54 = vpop.permute.xlu1 %1673 }
 0x46a   :  { %v6538_v40 = vpop.permute.xlu2 %1757  ;;  %9525 = vst [vmem:[#allocation28_spill] sm:$0xff] %v6540_v54 }
 0x46b   :  { %v6542_v34 = vpop.permute.xlu0 %1671 }
 0x46c   :  { %9526 = vst [vmem:[#allocation47_spill] sm:$0xff] %v6542_v34  ;;  %v9533_v34 = vld [vmem:[#allocation55_spill] sm:$0xff] }
 0x46d   :  { %1815 = vrot.lane.b32.xlu2 %v9527_v15, %s3548_s25  ;;  %v9531_v15 = vld [vmem:[#allocation106_spill] sm:$0xff] }
 0x46e   :  { %1973 = vrot.lane.b32.xlu1 %v4682_v7, %s3549_s24 }
 0x46f   :  { %1941 = vrot.lane.b32.xlu0 %v4557_v26, %s3549_s24 }
 0x471   :  { %v6552_v57 = vpop.permute.xlu1 %1679 }
 0x472   :  { %v6550_v16 = vpop.permute.xlu2 %1763  ;;  %9529 = vst [vmem:[#allocation32_spill] sm:$0xff] %v6552_v57 }
 0x473   :  { %9528 = vst [vmem:[#allocation306_spill] sm:$0xff] %v6550_v16  ;;  %v6554_v50 = vpop.permute.xlu0 %1677  ;;  %v9558_v16 = vld [vmem:[#allocation14_spill] sm:$0xff] }
 0x474   :  { %9530 = vst [vmem:[#allocation94_spill] sm:$0xff] %v6554_v50 }
 0x475   :  { %2039 = vrot.lane.b32.xlu2 %v9366_v4, %s3549_s24 }
 0x476   :  { %2007 = vrot.lane.b32.xlu1 %v9339_v52, %s3549_s24 }
 0x477   :  { %1847 = vrot.lane.b32.xlu0 %v9531_v15, %s3548_s25 }
 0x479   :  { %v6564_v7 = vpop.permute.xlu1 %1749 }
 0x47a   :  { %v6562_v54 = vpop.permute.xlu2 %1769 }
 0x47b   :  { %9532 = vst [vmem:[#allocation46_spill] sm:$0xff] %v6562_v54  ;;  %v6566_v26 = vpop.permute.xlu0 %1747  ;;  %v9543_v54 = vld [vmem:[#allocation53_spill] sm:$0xff] }
 0x47d   :  { %1817 = vrot.lane.b32.xlu2 %v9533_v34, %s3548_s25  ;;  %v9535_v34 = vld [vmem:[#allocation105_spill] sm:$0xff] }
 0x47e   :  { %1975 = vrot.lane.b32.xlu1 %v4679_v63, %s3549_s24 }
 0x47f   :  { %1943 = vrot.lane.b32.xlu0 %v4554_v31, %s3549_s24 }
 0x481   :  { %v6576_v52 = vpop.permute.xlu1 %1755 }
 0x482   :  { %v6574_v4 = vpop.permute.xlu2 %1775 }
 0x483   :  { %9534 = vst [vmem:[#allocation93_spill] sm:$0xff] %v6574_v4  ;;  %v6578_v15 = vpop.permute.xlu0 %1753  ;;  %v9536_v4 = vld [vmem:[#allocation54_spill] sm:$0xff] }
 0x485   :  { %2041 = vrot.lane.b32.xlu2 %v9374_v2, %s3549_s24 }
 0x486   :  { %2009 = vrot.lane.b32.xlu1 %v9338_v3, %s3549_s24 }
 0x487   :  { %1849 = vrot.lane.b32.xlu0 %v9535_v34, %s3548_s25 }
 0x489   :  { %v6588_v63 = vpop.permute.xlu1 %1761 }
 0x48a   :  { %v6586_v57 = vpop.permute.xlu2 %1781 }
 0x48b   :  { %v6590_v31 = vpop.permute.xlu0 %1759 }
 0x48d   :  { %1819 = vrot.lane.b32.xlu2 %v9536_v4, %s3548_s25  ;;  %v9539_v4 = vld [vmem:[#allocation104_spill] sm:$0xff] }
 0x48e   :  { %1977 = vrot.lane.b32.xlu1 %v4710_v6, %s3549_s24 }
 0x48f   :  { %1945 = vrot.lane.b32.xlu0 %v4551_v22, %s3549_s24 }
 0x491   :  { %v6600_v3 = vpop.permute.xlu1 %1767 }
 0x492   :  { %v6598_v2 = vpop.permute.xlu2 %1787  ;;  %9537 = vst [vmem:[#allocation45_spill] sm:$0xff] %v6600_v3 }
 0x493   :  { %v6602_v34 = vpop.permute.xlu0 %1765 }
 0x494   :  { %9538 = vst [vmem:[#allocation106_spill] sm:$0xff] %v6602_v34  ;;  %v9554_v34 = vld [vmem:[#allocation129_spill] sm:$0xff] }
 0x495   :  { %2043 = vrot.lane.b32.xlu2 %v9373_v33, %s3549_s24 }
 0x496   :  { %2011 = vrot.lane.b32.xlu1 %v9346_v20, %s3549_s24 }
 0x497   :  { %1851 = vrot.lane.b32.xlu0 %v9539_v4, %s3548_s25 }
 0x499   :  { %v6612_v6 = vpop.permute.xlu1 %1773 }
 0x49a   :  { %v6610_v50 = vpop.permute.xlu2 %1793  ;;  %9541 = vst [vmem:[#allocation105_spill] sm:$0xff] %v6612_v6  ;;  %v2655_v6 = vld [vmem:[%s8502_s1 + $0x20] sm:$0xf] }
 0x49b   :  { %9540 = vst [vmem:[#allocation55_spill] sm:$0xff] %v6610_v50  ;;  %v6614_v22 = vpop.permute.xlu0 %1771  ;;  %3396 = vmatpush.msk.msra.mxu2 %vm2849_vm2, %v2655_v6  ;;  %3397 = vmatpush.msk.msra.mxu3 %vm2849_vm2, %v2655_v6 }
 0x49c   :  { %9542 = vst [vmem:[#allocation54_spill] sm:$0xff] %v6614_v22  ;;  %3330 = vmatpush.msk.msra.mxu0 %vm2849_vm2, %v2655_v6  ;;  %3395 = vmatpush.msk.msra.mxu1 %vm2849_vm2, %v2655_v6 }
 0x49d   :  { %1821 = vrot.lane.b32.xlu2 %v9543_v54, %s3548_s25  ;;  %v9546_v54 = vld [vmem:[#allocation116_spill] sm:$0xff] }
 0x49e   :  { %1979 = vrot.lane.b32.xlu1 %v4707_v39, %s3549_s24  ;;  %v2654_v39 = vld [vmem:[%s8502_s1 + $0x18] sm:$0xff] }
 0x49f   :  { %1947 = vrot.lane.b32.xlu0 %v4583_v37, %s3549_s24  ;;  %v2653_v37 = vld [vmem:[%s8502_s1 + $0x10] sm:$0xff]  ;;  %3399 = vmatpush.msra.mxu2 %v2654_v39 }
 0x4a0   :  { %3400 = vmatpush.msra.mxu3 %v2654_v39  ;;  %2865 = vmatpush.msra.mxu0 %v2654_v39 }
 0x4a1   :  { %v6624_v20 = vpop.permute.xlu1 %1779  ;;  %3398 = vmatpush.msra.mxu1 %v2654_v39  ;;  %3402 = vmatpush.msra.mxu2 %v2653_v37 }
 0x4a2   :  { %v6622_v33 = vpop.permute.xlu2 %1799  ;;  %3403 = vmatpush.msra.mxu3 %v2653_v37  ;;  %2866 = vmatpush.msra.mxu0 %v2653_v37 }
 0x4a3   :  { %9544 = vst [vmem:[#allocation104_spill] sm:$0xff] %v6622_v33  ;;  %v6626_v4 = vpop.permute.xlu0 %1777  ;;  %3401 = vmatpush.msra.mxu1 %v2653_v37  ;;  %v3480_v33 = vld [vmem:[%s8501_s0 + $0x1b0] sm:$0xff] }
 0x4a4   :  { %9545 = vst [vmem:[#allocation53_spill] sm:$0xff] %v6626_v4  ;;  %v2652_v4 = vld [vmem:[%s8502_s1 + $0x8] sm:$0xff] }
 0x4a5   :  { %2045 = vrot.lane.b32.xlu2 %v9372_v8, %s3549_s24  ;;  %3405 = vmatpush.msra.mxu2 %v2652_v4  ;;  %v2651_v8 = vld [vmem:[%s8502_s1] sm:$0xff] }
 0x4a6   :  { %2013 = vrot.lane.b32.xlu1 %v9345_v0, %s3549_s24  ;;  %3406 = vmatpush.msra.mxu3 %v2652_v4  ;;  %v9547_v0 = vld [vmem:[#allocation64_spill] sm:$0xff] }
 0x4a7   :  { %1853 = vrot.lane.b32.xlu0 %v9546_v54, %s3548_s25  ;;  %3408 = vmatpush.msra.mxu2 %v2651_v8 }
 0x4a8   :  { %2867 = vmatpush.msra.mxu0 %v2652_v4  ;;  %3404 = vmatpush.msra.mxu1 %v2652_v4  ;;  %v9548_v4 = vld [vmem:[#allocation115_spill] sm:$0xff] }
 0x4a9   :  { %v6646_v6 = vpop.permute.xlu1 %1785  ;;  %3409 = vmatpush.msra.mxu3 %v2651_v8 }
 0x4aa   :  { %v1812_v22 = vpop.permute.xlu2 %1811  ;;  %2868 = vmatpush.msra.mxu0 %v2651_v8  ;;  %3407 = vmatpush.msra.mxu1 %v2651_v8 }
 0x4ab   :  { %v6648_v39 = vpop.permute.xlu0 %1783 }
 0x4ad   :  { %1823 = vrot.lane.b32.xlu2 %v9547_v0, %s3548_s25 }
 0x4ae   :  { %1981 = vrot.lane.b32.xlu1 %v4704_v49, %s3549_s24 }
 0x4af   :  { %1949 = vrot.lane.b32.xlu0 %v4580_v47, %s3549_s24  ;;  %v9551_v47 = vld [vmem:[#allocation63_spill] sm:$0xff] }
 0x4b1   :  { %v6659_v3 = vpop.permute.xlu1 %1791 }
 0x4b2   :  { %v2036_v54 = vpop.permute.xlu2 %2035 }
 0x4b3   :  { %v6661_v37 = vpop.permute.xlu0 %1789 }
 0x4b5   :  { %2047 = vrot.lane.b32.xlu2 %v9378_v19, %s3549_s24 }
 0x4b6   :  { %2015 = vrot.lane.b32.xlu1 %v9344_v43, %s3549_s24 }
 0x4b7   :  { %1855 = vrot.lane.b32.xlu0 %v9548_v4, %s3548_s25 }
 0x4b9   :  { %v6671_v49 = vpop.permute.xlu1 %1797 }
 0x4ba   :  { %v6669_v8 = vpop.permute.xlu2 %1813  ;;  %9549 = vst [vmem:[#allocation116_spill] sm:$0xff] %v6671_v49  ;;  %v9555_v49 = vld [vmem:[#allocation168_spill] sm:$0xff] }
 0x4bb   :  { %v6673_v0 = vpop.permute.xlu0 %1795 }
 0x4bc   :  { %9550 = vst [vmem:[#allocation64_spill] sm:$0xff] %v6673_v0 }
 0x4bd   :  { %1825 = vrot.lane.b32.xlu2 %v9551_v47, %s3548_s25  ;;  %v2164_v47 = vsel %vm2131_vm3, %v3480_v33, %v9554_v34 }
 0x4be   :  { %1983 = vrot.lane.b32.xlu1 %v4736_v41, %s3549_s24  ;;  %v2180_v41 = vsel %vm2131_vm3, %v6252_v9, %v9555_v49 }
 0x4bf   :  { %1951 = vrot.lane.b32.xlu0 %v4577_v21, %s3549_s24  ;;  %v9556_v21 = vld [vmem:[#allocation216_spill] sm:$0xff] }
 0x4c0   :  { %v2229_v11 = vsel %vm2196_vm4, %v2164_v47, %v9556_v21  ;;  %v9563_v47 = vld [vmem:[#allocation65_spill] sm:$0xff]  ;;  %v9564_v21 = vld [vmem:[#allocation88_spill] sm:$0xff] }
 0x4c1   :  { %v6683_v43 = vpop.permute.xlu1 %1803  ;;  %v2294_v0 = vsel %vm2261_vm5, %v2229_v11, %v9558_v16  ;;  %v9560_v11 = vld [vmem:[#allocation114_spill] sm:$0xff] }
 0x4c2   :  { %v6681_v19 = vpop.permute.xlu2 %2037  ;;  %9552 = vst [vmem:[#allocation115_spill] sm:$0xff] %v6683_v43  ;;  %v9557_v43 = vld [vmem:[#allocation245_spill] sm:$0xff]  ;;  %v2359_v34 = vsel %vm2326_vm6, %v2294_v0, %v5786_v44 }
 0x4c3   :  { %v6685_v4 = vpop.permute.xlu0 %1801  ;;  %v2424_v33 = vsel %vm2391_vm7, %v2359_v34, %v6108_v59 }
 0x4c4   :  { %9553 = vst [vmem:[#allocation63_spill] sm:$0xff] %v6685_v4  ;;  %v2245_v4 = vsel %vm2196_vm4, %v2180_v41, %v9557_v43  ;;  %v3482_v43 = vld [vmem:[%s8501_s0 + $0xc0] sm:$0xff] }
 0x4c5   :  { %v2310_v50 = vsel %vm2261_vm5, %v2245_v4, %v9559_v25  ;;  %2049 = vrot.lane.b32.xlu2 %v5010_v46, %s3549_s24  ;;  %v2489_v46 = vsel %vm2456_vm8, %v2424_v33, %v6432_v42  ;;  %v9561_v42 = vld [vmem:[#allocation71_spill] sm:$0xff] }
 0x4c6   :  { %v2375_v9 = vsel %vm2326_vm6, %v2310_v50, %v5901_v58  ;;  %2017 = vrot.lane.b32.xlu1 %v9352_v30, %s3549_s24  ;;  %v2554_v59 = vsel %vm2521_vm10, %v2489_v46, %v1812_v22  ;;  %v9567_v46 = vld [vmem:[#allocation319_spill] sm:$0xff] }
 0x4c7   :  { %1857 = vrot.lane.b32.xlu0 %v9560_v11, %s3548_s25  ;;  %v2440_v44 = vsel %vm2391_vm7, %v2375_v9, %v6166_v5  ;;  %v3481_v5 = vld [vmem:[%s8501_s0] sm:$0xff]  ;;  %v9565_v9 = vld [vmem:[#allocation252_spill] sm:$0xff]  ;;  %v9566_v11 = vld [vmem:[#allocation287_spill] sm:$0xff] }
 0x4c8   :  { %v2505_v58 = vsel %vm2456_vm8, %v2440_v44, %v6454_v36  ;;  %v2132_v0 = vsel %vm2131_vm3, %v3481_v5, %v9561_v42  ;;  %v9562_v36 = vld [vmem:[#allocation120_spill] sm:$0xff] }
 0x4c9   :  { %v2004_v30 = vpop.permute.xlu1 %2003  ;;  %v2148_v22 = vsel %vm2131_vm3, %v3482_v43, %v9562_v36  ;;  %v2197_v41 = vsel %vm2196_vm4, %v2132_v0, %v9563_v47  ;;  %v9573_v47 = vld [vmem:[#allocation215_spill] sm:$0xff] }
 0x4ca   :  { %v6719_v25 = vpop.permute.xlu2 %1815  ;;  %v2619_v49 = vsel %vm2586_vm9, %v2554_v59, %v2004_v30  ;;  %v2213_v34 = vsel %vm2196_vm4, %v2148_v22, %v9564_v21  ;;  %v2262_v33 = vsel %vm2261_vm5, %v2197_v41, %v9565_v9  ;;  %v9568_v59 = vld [vmem:[#allocation333_spill] sm:$0xff]  ;;  %v9569_v30 = vld [vmem:[#allocation62_spill] sm:$0xff] }
 0x4cb   :  { %v1844_v16 = vpop.permute.xlu0 %1843  ;;  %3363 = vmatmul.msk.f32.vlgmr.msra.gmra.mxu2 %vm2656_vm11, %v2619_v49  ;;  %v2278_v44 = vsel %vm2261_vm5, %v2213_v34, %v9566_v11  ;;  %v9570_v49 = vld [vmem:[#allocation143_spill] sm:$0xff]  ;;  %v9574_v21 = vld [vmem:[#allocation226_spill] sm:$0xff]  ;;  %v9576_v11 = vld [vmem:[#allocation304_spill] sm:$0xff] }
 0x4cc   :  { %v2570_v50 = vsel %vm2521_vm10, %v2505_v58, %v1844_v16  ;;  %v2327_v58 = vsel %vm2326_vm6, %v2262_v33, %v9567_v46  ;;  %v9575_v9 = vld [vmem:[#allocation2_spill] sm:$0xff]  ;;  %v9577_v46 = vld [vmem:[#allocation353_spill] sm:$0xff] }
 0x4cd   :  { %v2635_v4 = vsel %vm2586_vm9, %v2570_v50, %v2036_v54  ;;  %v2343_v54 = vsel %vm2326_vm6, %v2278_v44, %v9568_v59  ;;  %1827 = vrot.lane.b32.xlu2 %v9569_v30, %s3548_s25  ;;  %v2392_v16 = vsel %vm2391_vm7, %v2327_v58, %v5965_v24  ;;  %v9578_v59 = vld [vmem:[#allocation187_spill] sm:$0xff] }
 0x4ce   :  { %3379 = vmatmul.msk.f32.vlgmr.msra.gmra.mxu3 %vm2656_vm11, %v2635_v4  ;;  %v2408_v50 = vsel %vm2391_vm7, %v2343_v54, %v5987_v48  ;;  %1985 = vrot.lane.b32.xlu1 %v4733_v51, %s3549_s24  ;;  %v2457_v5 = vsel %vm2456_vm8, %v2392_v16, %v6192_v60  ;;  %v3483_v60 = vld [vmem:[%s8501_s0 + $0x1b8] sm:$0xff]  ;;  %v9571_v4 = vld [vmem:[#allocation146_spill] sm:$0xff]  ;;  %v9579_v54 = vld [vmem:[#allocation367_spill] sm:$0xff] }
 0x4cf   :  { %1953 = vrot.lane.b32.xlu0 %v9570_v49, %s3549_s24  ;;  %v2473_v42 = vsel %vm2456_vm8, %v2408_v50, %v6364_v10  ;;  %v2522_v24 = vsel %vm2521_vm10, %v2457_v5, %v6566_v26  ;;  %v2165_v10 = vsel %vm2131_vm3, %v3483_v60, %v9571_v4  ;;  %v9572_v26 = vld [vmem:[#allocation167_spill] sm:$0xff]  ;;  %v9581_v50 = vld [vmem:[#allocation177_spill] sm:$0xff]  ;;  %v9582_v49 = vld [vmem:[#allocation124_spill] sm:$0xff] }
 0x4d0   :  { %v2538_v48 = vsel %vm2521_vm10, %v2473_v42, %v6624_v20  ;;  %v2181_v20 = vsel %vm2131_vm3, %v6245_v61, %v9572_v26  ;;  %v2230_v41 = vsel %vm2196_vm4, %v2165_v10, %v9573_v47  ;;  %v9580_v30 = vld [vmem:[#allocation219_spill] sm:$0xff]  ;;  %v9583_v5 = vld [vmem:[#allocation217_spill] sm:$0xff]  ;;  %v9584_v26 = vld [vmem:[#allocation82_spill] sm:$0xff] }
 0x4d1   :  { %v1972_v43 = vpop.permute.xlu1 %1971  ;;  %v2246_v34 = vsel %vm2196_vm4, %v2181_v20, %v9574_v21  ;;  %v2295_v33 = vsel %vm2261_vm5, %v2230_v41, %v9575_v9  ;;  %v3484_v10 = vld [vmem:[%s8501_s0 + $0x8] sm:$0xff]  ;;  %v9585_v20 = vld [vmem:[#allocation90_spill] sm:$0xff]  ;;  %v9586_v41 = vld [vmem:[#allocation41_spill] sm:$0xff] }
 0x4d2   :  { %v6765_v0 = vpop.permute.xlu2 %2039  ;;  %v2603_v22 = vsel %vm2586_vm9, %v2538_v48, %v1972_v43  ;;  %v2311_v44 = vsel %vm2261_vm5, %v2246_v34, %v9576_v11  ;;  %v2360_v58 = vsel %vm2326_vm6, %v2295_v33, %v9577_v46  ;;  %v9587_v34 = vld [vmem:[#allocation117_spill] sm:$0xff]  ;;  %v9588_v33 = vld [vmem:[#allocation272_spill] sm:$0xff] }
 0x4d3   :  { %v1940_v36 = vpop.permute.xlu0 %1939  ;;  %3347 = vmatmul.msk.f32.vlgmr.msra.gmra.mxu1 %vm2656_vm11, %v2603_v22  ;;  %v2376_v61 = vsel %vm2326_vm6, %v2311_v44, %v9579_v54  ;;  %v2425_v16 = vsel %vm2391_vm7, %v2360_v58, %v9580_v30  ;;  %v9589_v44 = vld [vmem:[#allocation286_spill] sm:$0xff]  ;;  %v9591_v54 = vld [vmem:[#allocation323_spill] sm:$0xff]  ;;  %v9593_v30 = vld [vmem:[#allocation172_spill] sm:$0xff] }
 0x4d4   :  { %v2587_v51 = vsel %vm2586_vm9, %v2522_v24, %v1940_v36  ;;  %v2441_v42 = vsel %vm2391_vm7, %v2376_v61, %v9583_v5  ;;  %v2490_v24 = vsel %vm2456_vm8, %v2425_v16, %v6394_v14  ;;  %v2133_v14 = vsel %vm2131_vm3, %v3484_v10, %v9584_v26  ;;  %v9590_v58 = vld [vmem:[#allocation318_spill] sm:$0xff]  ;;  %v9595_v5 = vld [vmem:[#allocation165_spill] sm:$0xff] }
 0x4d5   :  { %3331 = vmatmul.msk.f32.vlgmr.msra.gmra.mxu0 %vm2656_vm11, %v2587_v51  ;;  %2051 = vrot.lane.b32.xlu2 %v9578_v59, %s3549_s24  ;;  %v2506_v43 = vsel %vm2456_vm8, %v2441_v42, %v6506_v28  ;;  %v2555_v36 = vsel %vm2521_vm10, %v2490_v24, %v6669_v8  ;;  %v3485_v28 = vld [vmem:[%s8501_s0 + $0xc8] sm:$0xff]  ;;  %v2198_v21 = vsel %vm2196_vm4, %v2133_v14, %v9586_v41  ;;  %v9592_v61 = vld [vmem:[#allocation74_spill] sm:$0xff]  ;;  %v9597_v14 = vld [vmem:[#allocation145_spill] sm:$0xff] }
 0x4d6   :  { %2019 = vrot.lane.b32.xlu1 %v9581_v50, %s3549_s24  ;;  %v2149_v8 = vsel %vm2131_vm3, %v3485_v28, %v9585_v20  ;;  %v2263_v11 = vsel %vm2261_vm5, %v2198_v21, %v9588_v33  ;;  %v9594_v50 = vld [vmem:[#allocation383_spill] sm:$0xff]  ;;  %v9596_v42 = vld [vmem:[#allocation142_spill] sm:$0xff]  ;;  %v9599_v28 = vld [vmem:[#allocation196_spill] sm:$0xff] }
 0x4d7   :  { %1859 = vrot.lane.b32.xlu0 %v9582_v49, %s3548_s25  ;;  %v2214_v9 = vsel %vm2196_vm4, %v2149_v8, %v9587_v34  ;;  %v2328_v59 = vsel %vm2326_vm6, %v2263_v11, %v9590_v58  ;;  %v9600_v8 = vld [vmem:[#allocation251_spill] sm:$0xff]  ;;  %v9603_v33 = vld [vmem:[#allocation352_spill] sm:$0xff] }
 0x4d8   :  { %v2279_v46 = vsel %vm2261_vm5, %v2214_v9, %v9589_v44  ;;  %v2393_v16 = vsel %vm2391_vm7, %v2328_v59, %v9593_v30  ;;  %v9601_v41 = vld [vmem:[#allocation291_spill] sm:$0xff]  ;;  %v9604_v44 = vld [vmem:[#allocation186_spill] sm:$0xff]  ;;  %v9606_v58 = vld [vmem:[#allocation200_spill] sm:$0xff] }
 0x4d9   :  { %v2006_v51 = vpop.permute.xlu1 %2005  ;;  %v2458_v24 = vsel %vm2456_vm8, %v2393_v16, %v6264_v35  ;;  %v3486_v35 = vld [vmem:[%s8501_s0 + $0x1c8] sm:$0xff] }
 0x4da   :  { %v6807_v48 = vpop.permute.xlu2 %1817  ;;  %v2620_v4 = vsel %vm2586_vm9, %v2555_v36, %v2006_v51  ;;  %v2523_v51 = vsel %vm2521_vm10, %v2458_v24, %v6564_v7  ;;  %v9598_v7 = vld [vmem:[#allocation156_spill] sm:$0xff]  ;;  %v9602_v34 = vld [vmem:[#allocation303_spill] sm:$0xff] }
 0x4db   :  { %v1846_v22 = vpop.permute.xlu0 %1845  ;;  %3364 = vmatmul.msk.f32.gmra.mxu2 %vm2656_vm11, %v2620_v4 }
 0x4dc   :  { %v2571_v60 = vsel %vm2521_vm10, %v2506_v43, %v1846_v22 }
 0x4dd   :  { %v2636_v47 = vsel %vm2586_vm9, %v2571_v60, %v6681_v19  ;;  %v2344_v19 = vsel %vm2326_vm6, %v2279_v46, %v9591_v54  ;;  %1829 = vrot.lane.b32.xlu2 %v9592_v61, %s3548_s25  ;;  %v9605_v46 = vld [vmem:[#allocation357_spill] sm:$0xff]  ;;  %v9607_v54 = vld [vmem:[#allocation56_spill] sm:$0xff] }
 0x4de   :  { %3380 = vmatmul.msk.f32.gmra.mxu3 %vm2656_vm11, %v2636_v47  ;;  %v2409_v49 = vsel %vm2391_vm7, %v2344_v19, %v9594_v50  ;;  %1987 = vrot.lane.b32.xlu1 %v9595_v5, %s3549_s24  ;;  %v9608_v19 = vld [vmem:[#allocation123_spill] sm:$0xff]  ;;  %v9609_v61 = vld [vmem:[#allocation388_spill] sm:$0xff] }
 0x4df   :  { %1955 = vrot.lane.b32.xlu0 %v9596_v42, %s3549_s24  ;;  %v2474_v43 = vsel %vm2456_vm8, %v2409_v49, %v6362_v23  ;;  %v2166_v23 = vsel %vm2131_vm3, %v3486_v35, %v9597_v14  ;;  %v9613_v14 = vld [vmem:[#allocation118_spill] sm:$0xff] }
 0x4e0   :  { %v2539_v22 = vsel %vm2521_vm10, %v2474_v43, %v6586_v57  ;;  %v2182_v57 = vsel %vm2131_vm3, %v6283_v1, %v9598_v7  ;;  %v2231_v20 = vsel %vm2196_vm4, %v2166_v23, %v9599_v28  ;;  %v9614_v7 = vld [vmem:[#allocation271_spill] sm:$0xff]  ;;  %v9615_v28 = vld [vmem:[#allocation276_spill] sm:$0xff] }
 0x4e1   :  { %v1974_v60 = vpop.permute.xlu1 %1973  ;;  %v2247_v47 = vsel %vm2196_vm4, %v2182_v57, %v9600_v8  ;;  %v2296_v21 = vsel %vm2261_vm5, %v2231_v20, %v9601_v41  ;;  %v9616_v8 = vld [vmem:[#allocation37_spill] sm:$0xff]  ;;  %v9617_v41 = vld [vmem:[#allocation338_spill] sm:$0xff] }
 0x4e2   :  { %v6855_v36 = vpop.permute.xlu2 %2041  ;;  %v2604_v26 = vsel %vm2586_vm9, %v2539_v22, %v1974_v60  ;;  %v2312_v9 = vsel %vm2261_vm5, %v2247_v47, %v9602_v34  ;;  %v2361_v11 = vsel %vm2326_vm6, %v2296_v21, %v9603_v33  ;;  %v3487_v22 = vld [vmem:[%s8501_s0 + $0x18] sm:$0xff]  ;;  %v9610_v60 = vld [vmem:[#allocation70_spill] sm:$0xff]  ;;  %v9619_v34 = vld [vmem:[#allocation376_spill] sm:$0xff] }
 0x4e3   :  { %v1942_v4 = vpop.permute.xlu0 %1941  ;;  %3348 = vmatmul.msk.f32.gmra.mxu1 %vm2656_vm11, %v2604_v26  ;;  %v2377_v1 = vsel %vm2326_vm6, %v2312_v9, %v9605_v46  ;;  %v2426_v59 = vsel %vm2391_vm7, %v2361_v11, %v9606_v58  ;;  %v9612_v26 = vld [vmem:[#allocation79_spill] sm:$0xff]  ;;  %v9618_v21 = vld [vmem:[#allocation73_spill] sm:$0xff]  ;;  %v9620_v33 = vld [vmem:[#allocation382_spill] sm:$0xff] }
 0x4e4   :  { %v2588_v10 = vsel %vm2586_vm9, %v2523_v51, %v1942_v4  ;;  %v2442_v30 = vsel %vm2391_vm7, %v2377_v1, %v9609_v61  ;;  %v2491_v16 = vsel %vm2456_vm8, %v2426_v59, %v6446_v55  ;;  %v2134_v55 = vsel %vm2131_vm3, %v3487_v22, %v9610_v60  ;;  %v9611_v4 = vld [vmem:[#allocation127_spill] sm:$0xff]  ;;  %v9622_v46 = vld [vmem:[#allocation141_spill] sm:$0xff]  ;;  %v9624_v59 = vld [vmem:[#allocation402_spill] sm:$0xff] }
 0x4e5   :  { %3332 = vmatmul.msk.f32.gmra.mxu0 %vm2656_vm11, %v2588_v10  ;;  %2053 = vrot.lane.b32.xlu2 %v9604_v44, %s3549_s24  ;;  %v2507_v49 = vsel %vm2456_vm8, %v2442_v30, %v6504_v27  ;;  %v2556_v5 = vsel %vm2521_vm10, %v2491_v16, %v6719_v25  ;;  %v3488_v27 = vld [vmem:[%s8501_s0 + $0xd8] sm:$0xff]  ;;  %v2199_v35 = vsel %vm2196_vm4, %v2134_v55, %v9612_v26  ;;  %v9621_v44 = vld [vmem:[#allocation171_spill] sm:$0xff]  ;;  %v9628_v60 = vld [vmem:[#allocation222_spill] sm:$0xff] }
 0x4e6   :  { %2021 = vrot.lane.b32.xlu1 %v9607_v54, %s3549_s24  ;;  %v2150_v25 = vsel %vm2131_vm3, %v3488_v27, %v9611_v4  ;;  %v2264_v57 = vsel %vm2261_vm5, %v2199_v35, %v9614_v7  ;;  %v9623_v1 = vld [vmem:[#allocation395_spill] sm:$0xff]  ;;  %v9627_v22 = vld [vmem:[#allocation397_spill] sm:$0xff]  ;;  %v9629_v27 = vld [vmem:[#allocation250_spill] sm:$0xff] }
 0x4e7   :  { %1861 = vrot.lane.b32.xlu0 %v9608_v19, %s3548_s25  ;;  %v2215_v23 = vsel %vm2196_vm4, %v2150_v25, %v9613_v14  ;;  %v2329_v47 = vsel %vm2326_vm6, %v2264_v57, %v9616_v8  ;;  %v9630_v25 = vld [vmem:[#allocation12_spill] sm:$0xff]  ;;  %v9631_v26 = vld [vmem:[#allocation293_spill] sm:$0xff]  ;;  %v9632_v14 = vld [vmem:[#allocation342_spill] sm:$0xff] }
 0x4e8   :  { %v2280_v20 = vsel %vm2261_vm5, %v2215_v23, %v9615_v28  ;;  %v2394_v9 = vsel %vm2391_vm7, %v2329_v47, %v9619_v34  ;;  %v9633_v7 = vld [vmem:[#allocation190_spill] sm:$0xff]  ;;  %v9634_v57 = vld [vmem:[#allocation372_spill] sm:$0xff] }
 0x4e9   :  { %v2008_v42 = vpop.permute.xlu1 %2007  ;;  %v2459_v58 = vsel %vm2456_vm8, %v2394_v9, %v9623_v1  ;;  %v9636_v47 = vld [vmem:[#allocation68_spill] sm:$0xff] }
 0x4ea   :  { %v6897_v50 = vpop.permute.xlu2 %1819  ;;  %v2621_v51 = vsel %vm2586_vm9, %v2556_v5, %v2008_v42  ;;  %v2524_v61 = vsel %vm2521_vm10, %v2459_v58, %v6526_v53  ;;  %v9626_v53 = vld [vmem:[#allocation36_spill] sm:$0xff] }
 0x4eb   :  { %v1848_v24 = vpop.permute.xlu0 %1847  ;;  %3365 = vmatmul.msk.f32.gmra.mxu2 %vm2656_vm11, %v2621_v51 }
 0x4ec   :  { %v2572_v43 = vsel %vm2521_vm10, %v2507_v49, %v1848_v24  ;;  %v3489_v24 = vld [vmem:[%s8501_s0 + $0x1d0] sm:$0xff] }
 0x4ed   :  { %v2637_v10 = vsel %vm2586_vm9, %v2572_v43, %v6765_v0  ;;  %v2345_v0 = vsel %vm2326_vm6, %v2280_v20, %v9617_v41  ;;  %1831 = vrot.lane.b32.xlu2 %v9618_v21, %s3548_s25  ;;  %v9625_v43 = vld [vmem:[#allocation132_spill] sm:$0xff]  ;;  %v9635_v20 = vld [vmem:[#allocation225_spill] sm:$0xff]  ;;  %v9637_v41 = vld [vmem:[#allocation122_spill] sm:$0xff] }
 0x4ee   :  { %3381 = vmatmul.msk.f32.gmra.mxu3 %vm2656_vm11, %v2637_v10  ;;  %v2410_v11 = vsel %vm2391_vm7, %v2345_v0, %v9620_v33  ;;  %1989 = vrot.lane.b32.xlu1 %v9621_v44, %s3549_s24  ;;  %v2167_v51 = vsel %vm2131_vm3, %v3489_v24, %v9625_v43  ;;  %v9638_v0 = vld [vmem:[#allocation241_spill] sm:$0xff]  ;;  %v9643_v24 = vld [vmem:[#allocation258_spill] sm:$0xff] }
 0x4ef   :  { %1957 = vrot.lane.b32.xlu0 %v9622_v46, %s3549_s24  ;;  %v2475_v54 = vsel %vm2456_vm8, %v2410_v11, %v9624_v59  ;;  %v2232_v55 = vsel %vm2196_vm4, %v2167_v51, %v9628_v60  ;;  %v3490_v59 = vld [vmem:[%s8501_s0 + $0x20] sm:$0xff]  ;;  %v9646_v60 = vld [vmem:[#allocation337_spill] sm:$0xff] }
 0x4f0   :  { %v2540_v30 = vsel %vm2521_vm10, %v2475_v54, %v6648_v39  ;;  %v2183_v39 = vsel %vm2131_vm3, %v9627_v22, %v9626_v53  ;;  %v2297_v10 = vsel %vm2261_vm5, %v2232_v55, %v9630_v25  ;;  %v9639_v54 = vld [vmem:[#allocation81_spill] sm:$0xff]  ;;  %v9644_v51 = vld [vmem:[#allocation290_spill] sm:$0xff]  ;;  %v9647_v55 = vld [vmem:[#allocation72_spill] sm:$0xff] }
 0x4f1   :  { %v1976_v16 = vpop.permute.xlu1 %1975  ;;  %v2248_v4 = vsel %vm2196_vm4, %v2183_v39, %v9629_v27  ;;  %v2362_v23 = vsel %vm2326_vm6, %v2297_v10, %v9632_v14  ;;  %v9645_v22 = vld [vmem:[#allocation322_spill] sm:$0xff]  ;;  %v9648_v27 = vld [vmem:[#allocation375_spill] sm:$0xff]  ;;  %v9649_v25 = vld [vmem:[#allocation181_spill] sm:$0xff] }
 0x4f2   :  { %v6945_v19 = vpop.permute.xlu2 %2043  ;;  %v2605_v42 = vsel %vm2586_vm9, %v2540_v30, %v1976_v16  ;;  %v2313_v35 = vsel %vm2261_vm5, %v2248_v4, %v9631_v26  ;;  %v2427_v8 = vsel %vm2391_vm7, %v2362_v23, %v9635_v20  ;;  %v9641_v16 = vld [vmem:[#allocation78_spill] sm:$0xff] }
 0x4f3   :  { %v1944_v49 = vpop.permute.xlu0 %1943  ;;  %3349 = vmatmul.msk.f32.gmra.mxu1 %vm2656_vm11, %v2605_v42  ;;  %v2378_v28 = vsel %vm2326_vm6, %v2313_v35, %v9634_v57  ;;  %v2492_v34 = vsel %vm2456_vm8, %v2427_v8, %v6444_v13  ;;  %v2135_v13 = vsel %vm2131_vm3, %v3490_v59, %v9639_v54  ;;  %v9650_v26 = vld [vmem:[#allocation170_spill] sm:$0xff]  ;;  %v9651_v35 = vld [vmem:[#allocation149_spill] sm:$0xff]  ;;  %v9659_v54 = vld [vmem:[#allocation308_spill] sm:$0xff] }
 0x4f4   :  { %v2589_v5 = vsel %vm2586_vm9, %v2524_v61, %v1944_v49  ;;  %v2443_v21 = vsel %vm2391_vm7, %v2378_v28, %v9638_v0  ;;  %v2557_v11 = vsel %vm2521_vm10, %v2492_v34, %v6807_v48  ;;  %v9640_v61 = vld [vmem:[#allocation126_spill] sm:$0xff]  ;;  %v2200_v49 = vsel %vm2196_vm4, %v2135_v13, %v9641_v16  ;;  %v9653_v34 = vld [vmem:[#allocation152_spill] sm:$0xff] }
 0x4f5   :  { %3333 = vmatmul.msk.f32.gmra.mxu0 %vm2656_vm11, %v2589_v5  ;;  %2055 = vrot.lane.b32.xlu2 %v9633_v7, %s3549_s24  ;;  %v2508_v33 = vsel %vm2456_vm8, %v2443_v21, %v6466_v32  ;;  %v3491_v32 = vld [vmem:[%s8501_s0 + $0xe0] sm:$0xff]  ;;  %v2265_v43 = vsel %vm2261_vm5, %v2200_v49, %v9643_v24  ;;  %v9663_v49 = vld [vmem:[#allocation224_spill] sm:$0xff] }
 0x4f6   :  { %2023 = vrot.lane.b32.xlu1 %v9636_v47, %s3549_s24  ;;  %v2151_v48 = vsel %vm2131_vm3, %v3491_v32, %v9640_v61  ;;  %v9642_v5 = vld [vmem:[#allocation98_spill] sm:$0xff]  ;;  %v2330_v39 = vsel %vm2326_vm6, %v2265_v43, %v9645_v22  ;;  %v9660_v32 = vld [vmem:[#allocation356_spill] sm:$0xff]  ;;  %v9666_v43 = vld [vmem:[#allocation223_spill] sm:$0xff] }
 0x4f7   :  { %1863 = vrot.lane.b32.xlu0 %v9637_v41, %s3548_s25  ;;  %v2216_v42 = vsel %vm2196_vm4, %v2151_v48, %v9642_v5  ;;  %v2395_v4 = vsel %vm2391_vm7, %v2330_v39, %v9648_v27  ;;  %v9652_v14 = vld [vmem:[#allocation262_spill] sm:$0xff]  ;;  %v9661_v48 = vld [vmem:[#allocation189_spill] sm:$0xff]  ;;  %v9665_v24 = vld [vmem:[#allocation128_spill] sm:$0xff] }
 0x4f8   :  { %v2281_v53 = vsel %vm2261_vm5, %v2216_v42, %v9644_v51  ;;  %v2460_v23 = vsel %vm2456_vm8, %v2395_v4, %v9652_v14  ;;  %v3492_v21 = vld [vmem:[%s8501_s0 + $0x1e0] sm:$0xff]  ;;  %v9664_v42 = vld [vmem:[#allocation179_spill] sm:$0xff] }
 0x4f9   :  { %v2010_v44 = vpop.permute.xlu1 %2009  ;;  %v2525_v28 = vsel %vm2521_vm10, %v2460_v23, %v6578_v15  ;;  %v9654_v15 = vld [vmem:[#allocation31_spill] sm:$0xff]  ;;  %v9669_v14 = vld [vmem:[#allocation50_spill] sm:$0xff] }
 0x4fa   :  { %v6987_v9 = vpop.permute.xlu2 %1821  ;;  %v2622_v58 = vsel %vm2586_vm9, %v2557_v11, %v2010_v44  ;;  %v9656_v11 = vld [vmem:[#allocation221_spill] sm:$0xff] }
 0x4fb   :  { %v1850_v46 = vpop.permute.xlu0 %1849  ;;  %3366 = vmatmul.msk.f32.gmra.mxu2 %vm2656_vm11, %v2622_v58  ;;  %v9658_v58 = vld [vmem:[#allocation7_spill] sm:$0xff] }
 0x4fc   :  { %v2573_v1 = vsel %vm2521_vm10, %v2508_v33, %v1850_v46  ;;  %v9655_v33 = vld [vmem:[#allocation396_spill] sm:$0xff] }
 0x4fd   :  { %v2638_v30 = vsel %vm2586_vm9, %v2573_v1, %v6855_v36  ;;  %v2346_v36 = vsel %vm2326_vm6, %v2281_v53, %v9646_v60  ;;  %1833 = vrot.lane.b32.xlu2 %v9647_v55, %s3548_s25  ;;  %v9657_v46 = vld [vmem:[#allocation232_spill] sm:$0xff] }
 0x4fe   :  { %3382 = vmatmul.msk.f32.gmra.mxu3 %vm2656_vm11, %v2638_v30  ;;  %v2411_v10 = vsel %vm2391_vm7, %v2346_v36, %v9649_v25  ;;  %1991 = vrot.lane.b32.xlu1 %v9650_v26, %s3549_s24  ;;  %v9662_v30 = vld [vmem:[#allocation371_spill] sm:$0xff]  ;;  %v3493_v25 = vld [vmem:[%s8501_s0 + $0x30] sm:$0xff]  ;;  %v9668_v26 = vld [vmem:[#allocation101_spill] sm:$0xff] }
 0x4ff   :  { %1959 = vrot.lane.b32.xlu0 %v9651_v35, %s3549_s24  ;;  %v2476_v7 = vsel %vm2456_vm8, %v2411_v10, %v6386_v38  ;;  %v2168_v38 = vsel %vm2131_vm3, %v3492_v21, %v9653_v34  ;;  %v9667_v10 = vld [vmem:[#allocation44_spill] sm:$0xff]  ;;  %v9674_v34 = vld [vmem:[#allocation326_spill] sm:$0xff] }
 0x500   :  { %v2541_v20 = vsel %vm2521_vm10, %v2476_v7, %v6646_v6  ;;  %v2184_v6 = vsel %vm2131_vm3, %v9655_v33, %v9654_v15  ;;  %v2233_v44 = vsel %vm2196_vm4, %v2168_v38, %v9656_v11  ;;  %v9670_v7 = vld [vmem:[#allocation193_spill] sm:$0xff]  ;;  %v9676_v15 = vld [vmem:[#allocation39_spill] sm:$0xff] }
 0x501   :  { %v1978_v8 = vpop.permute.xlu1 %1977  ;;  %v2249_v1 = vsel %vm2196_vm4, %v2184_v6, %v9657_v46  ;;  %v2298_v59 = vsel %vm2261_vm5, %v2233_v44, %v9658_v58  ;;  %v9675_v38 = vld [vmem:[#allocation85_spill] sm:$0xff]  ;;  %v9677_v6 = vld [vmem:[#allocation387_spill] sm:$0xff]  ;;  %v9679_v46 = vld [vmem:[#allocation148_spill] sm:$0xff] }
 0x502   :  { %v7035_v57 = vpop.permute.xlu2 %2045  ;;  %v2606_v0 = vsel %vm2586_vm9, %v2541_v20, %v1978_v8  ;;  %v2314_v13 = vsel %vm2261_vm5, %v2249_v1, %v9659_v54  ;;  %v2363_v61 = vsel %vm2326_vm6, %v2298_v59, %v9660_v32  ;;  %v9671_v20 = vld [vmem:[#allocation275_spill] sm:$0xff]  ;;  %v9678_v44 = vld [vmem:[#allocation169_spill] sm:$0xff]  ;;  %v9680_v1 = vld [vmem:[#allocation400_spill] sm:$0xff] }
 0x503   :  { %v1946_v47 = vpop.permute.xlu0 %1945  ;;  %3350 = vmatmul.msk.f32.gmra.mxu1 %vm2656_vm11, %v2606_v0  ;;  %v2379_v16 = vsel %vm2326_vm6, %v2314_v13, %v9662_v30  ;;  %v2428_v5 = vsel %vm2391_vm7, %v2363_v61, %v9663_v49  ;;  %v9673_v0 = vld [vmem:[#allocation321_spill] sm:$0xff]  ;;  %v9681_v30 = vld [vmem:[#allocation412_spill] sm:$0xff] }
 0x504   :  { %v2590_v41 = vsel %vm2586_vm9, %v2525_v28, %v1946_v47  ;;  %v2444_v51 = vsel %vm2391_vm7, %v2379_v16, %v9666_v43  ;;  %v2493_v53 = vsel %vm2456_vm8, %v2428_v5, %v6406_v29  ;;  %v2136_v29 = vsel %vm2131_vm3, %v3493_v25, %v9667_v10  ;;  %v9672_v47 = vld [vmem:[#allocation289_spill] sm:$0xff]  ;;  %v9683_v43 = vld [vmem:[#allocation151_spill] sm:$0xff] }
 0x505   :  { %3334 = vmatmul.msk.f32.gmra.mxu0 %vm2656_vm11, %v2590_v41  ;;  %2057 = vrot.lane.b32.xlu2 %v9661_v48, %s3549_s24  ;;  %v2509_v39 = vsel %vm2456_vm8, %v2444_v51, %v6518_v18  ;;  %v2558_v60 = vsel %vm2521_vm10, %v2493_v53, %v6897_v50  ;;  %v3494_v18 = vld [vmem:[%s8501_s0 + $0xf0] sm:$0xff]  ;;  %v2201_v23 = vsel %vm2196_vm4, %v2136_v29, %v9669_v14  ;;  %v581_v16 = vrot.slane %v9681_v30, 1  ;;  %v9682_v49 = vld [vmem:[#allocation413_spill] sm:$0xff]  ;;  %v9689_v25 = vld [vmem:[#allocation307_spill] sm:$0xff] }
 0x506   :  { %2025 = vrot.lane.b32.xlu1 %v9664_v42, %s3549_s24  ;;  %v2152_v50 = vsel %vm2131_vm3, %v3494_v18, %v9668_v26  ;;  %v2266_v8 = vsel %vm2261_vm5, %v2201_v23, %v9671_v20  ;;  %v580_v5 = vrot.slane %v9682_v49, 1  ;;  %v9685_v51 = vld [vmem:[#allocation401_spill] sm:$0xff]  ;;  %v9690_v29 = vld [vmem:[#allocation355_spill] sm:$0xff]  ;;  %v9693_v23 = vld [vmem:[#allocation206_spill] sm:$0xff] }
 0x507   :  { %1865 = vrot.lane.b32.xlu0 %v9665_v24, %s3548_s25  ;;  %v2217_v28 = vsel %vm2196_vm4, %v2152_v50, %v9670_v7  ;;  %v2331_v21 = vsel %vm2326_vm6, %v2266_v8, %v9673_v0  ;;  %v9691_v26 = vld [vmem:[#allocation385_spill] sm:$0xff]  ;;  %v9695_v20 = vld [vmem:[#allocation335_spill] sm:$0xff] }
 0x508   :  { %v2282_v41 = vsel %vm2261_vm5, %v2217_v28, %v9672_v47  ;;  %v2396_v33 = vsel %vm2391_vm7, %v2331_v21, %v9676_v15  ;;  %v7160_v50 = vsel %vm221_vm0, %v580_v5, %v581_v16  ;;  %v9694_v28 = vld [vmem:[#allocation178_spill] sm:$0xff]  ;;  %v9696_v8 = vld [vmem:[#allocation257_spill] sm:$0xff]  ;;  %v9700_v5 = vld [vmem:[#allocation192_spill] sm:$0xff] }
 0x509   :  { %v2012_v36 = vpop.permute.xlu1 %2011  ;;  %v2461_v58 = vsel %vm2456_vm8, %v2396_v33, %v9680_v1  ;;  %v3496_v21 = vld [vmem:[%s8501_s0 + $0x198] sm:$0xff] }
 0x50a   :  { %v7077_v22 = vpop.permute.xlu2 %1823  ;;  %v2623_v4 = vsel %vm2586_vm9, %v2558_v60, %v2012_v36  ;;  %v2526_v13 = vsel %vm2521_vm10, %v2461_v58, %v6576_v52  ;;  %v9687_v36 = vld [vmem:[#allocation254_spill] sm:$0xff]  ;;  %v3498_v58 = vld [vmem:[%s8501_s0 + $0x38] sm:$0xff] }
 0x50b   :  { %v1852_v55 = vpop.permute.xlu0 %1851  ;;  %3367 = vmatmul.msk.f32.gmra.mxu2 %vm2656_vm11, %v2623_v4 }
 0x50c   :  { %v2574_v27 = vsel %vm2521_vm10, %v2509_v39, %v1852_v55  ;;  %v9686_v39 = vld [vmem:[#allocation202_spill] sm:$0xff] }
 0x50d   :  { %v2639_v35 = vsel %vm2586_vm9, %v2574_v27, %v6945_v19  ;;  %v2347_v19 = vsel %vm2326_vm6, %v2282_v41, %v9674_v34  ;;  %1835 = vrot.lane.b32.xlu2 %v9675_v38, %s3548_s25  ;;  %v9688_v27 = vld [vmem:[#allocation292_spill] sm:$0xff]  ;;  %v575_v34 = vrot.slane %v3496_v21, 1 }
 0x50e   :  { %3383 = vmatmul.msk.f32.gmra.mxu3 %vm2656_vm11, %v2639_v35  ;;  %v2412_v11 = vsel %vm2391_vm7, %v2347_v19, %v9677_v6  ;;  %1993 = vrot.lane.b32.xlu1 %v9678_v44, %s3549_s24  ;;  %v9692_v35 = vld [vmem:[#allocation360_spill] sm:$0xff]  ;;  %v7182_v19 = vld [vmem:[%s8501_s0 + $0x1a0] sm:$0xff]  ;;  %v590_v44 = vrot.slane %v9682_v49, 2 }
 0x50f   :  { %1961 = vrot.lane.b32.xlu0 %v9679_v46, %s3549_s24  ;;  %v2477_v59 = vsel %vm2456_vm8, %v2412_v11, %v6384_v45  ;;  %v3495_v45 = vld [vmem:[%s8501_s0 + $0x1e8] sm:$0xff]  ;;  %v576_v38 = vrot.slane %v7182_v19, 1  ;;  %v591_v11 = vrot.slane %v9681_v30, 2 }
 0x510   :  { %v2542_v32 = vsel %vm2521_vm10, %v2477_v59, %v6598_v2  ;;  %v2169_v52 = vsel %vm2131_vm3, %v3495_v45, %v9683_v43  ;;  %v9684_v2 = vld [vmem:[#allocation159_spill] sm:$0xff]  ;;  %v9697_v59 = vld [vmem:[#allocation52_spill] sm:$0xff] }
 0x511   :  { %v1980_v61 = vpop.permute.xlu1 %1979  ;;  %v2185_v53 = vsel %vm2131_vm3, %v9685_v51, %v9684_v2  ;;  %v2234_v60 = vsel %vm2196_vm4, %v2169_v52, %v9686_v39  ;;  %v9702_v43 = vld [vmem:[#allocation279_spill] sm:$0xff]  ;;  %v9705_v39 = vld [vmem:[#allocation84_spill] sm:$0xff] }
 0x512   :  { %v7125_v54 = vpop.permute.xlu2 %2047  ;;  %v2607_v24 = vsel %vm2586_vm9, %v2542_v32, %v1980_v61  ;;  %v2250_v55 = vsel %vm2196_vm4, %v2185_v53, %v9687_v36  ;;  %v2299_v4 = vsel %vm2261_vm5, %v2234_v60, %v9688_v27  ;;  %v9703_v2 = vld [vmem:[#allocation311_spill] sm:$0xff]  ;;  %v9704_v53 = vld [vmem:[#allocation341_spill] sm:$0xff]  ;;  %v7224_v60 = vsel %vm221_vm0, %v575_v34, %v576_v38 }
 0x513   :  { %v1948_v48 = vpop.permute.xlu0 %1947  ;;  %3351 = vmatmul.msk.f32.gmra.mxu1 %vm2656_vm11, %v2607_v24  ;;  %v2315_v10 = vsel %vm2261_vm5, %v2250_v55, %v9689_v25  ;;  %v2364_v18 = vsel %vm2326_vm6, %v2299_v4, %v9690_v29  ;;  %v9701_v24 = vld [vmem:[#allocation274_spill] sm:$0xff]  ;;  %v7229_v36 = vsel %vm382_vm1, %v590_v44, %v591_v11  ;;  %v9709_v29 = vld [vmem:[#allocation147_spill] sm:$0xff]  ;;  %v9714_v44 = vld [vmem:[#allocation228_spill] sm:$0xff] }
 0x514   :  { %v2591_v42 = vsel %vm2586_vm9, %v2526_v13, %v1948_v48  ;;  %v2380_v14 = vsel %vm2326_vm6, %v2315_v10, %v9692_v35  ;;  %v2429_v7 = vsel %vm2391_vm7, %v2364_v18, %v9693_v23  ;;  %v9698_v13 = vld [vmem:[#allocation131_spill] sm:$0xff]  ;;  %v9699_v48 = vld [vmem:[#allocation76_spill] sm:$0xff]  ;;  %v9706_v55 = vld [vmem:[#allocation378_spill] sm:$0xff] }
 0x515   :  { %3335 = vmatmul.msk.f32.gmra.mxu0 %vm2656_vm11, %v2591_v42  ;;  %2059 = vrot.lane.b32.xlu2 %v9691_v26, %s3549_s24  ;;  %v2445_v47 = vsel %vm2391_vm7, %v2380_v14, %v9696_v8  ;;  %v2494_v41 = vsel %vm2456_vm8, %v2429_v7, %v6458_v12  ;;  %v9707_v4 = vld [vmem:[#allocation386_spill] sm:$0xff]  ;;  %v9708_v10 = vld [vmem:[#allocation369_spill] sm:$0xff]  ;;  %v9710_v18 = vld [vmem:[#allocation399_spill] sm:$0xff] }
 0x516   :  { %2027 = vrot.lane.b32.xlu1 %v9694_v28, %s3549_s24  ;;  %v2510_v15 = vsel %vm2456_vm8, %v2445_v47, %v6516_v62  ;;  %v2559_v12 = vsel %vm2521_vm10, %v2494_v41, %v6987_v9  ;;  %v2137_v62 = vsel %vm2131_vm3, %v3498_v58, %v9697_v59  ;;  %v3499_v9 = vld [vmem:[%s8501_s0 + $0xf8] sm:$0xff]  ;;  %v585_v47 = vrot.slane %v3496_v21, 2  ;;  %v9716_v59 = vld [vmem:[#allocation15_spill] sm:$0xff] }
 0x517   :  { %1867 = vrot.lane.b32.xlu0 %v9695_v20, %s3548_s25  ;;  %v2153_v32 = vsel %vm2131_vm3, %v3499_v9, %v9698_v13  ;;  %v2202_v49 = vsel %vm2196_vm4, %v2137_v62, %v9699_v48  ;;  %v9711_v35 = vld [vmem:[#allocation405_spill] sm:$0xff]  ;;  %v586_v41 = vrot.slane %v7182_v19, 2  ;;  %v9717_v9 = vld [vmem:[#allocation296_spill] sm:$0xff]  ;;  %v9800_v19 = vld [vmem:[#allocation259_spill] sm:$0xff] }
 0x518   :  { %v2218_v42 = vsel %vm2196_vm4, %v2153_v32, %v9700_v5  ;;  %v2267_v45 = vsel %vm2261_vm5, %v2202_v49, %v9701_v24  ;;  %v9718_v32 = vld [vmem:[#allocation345_spill] sm:$0xff]  ;;  %v9719_v48 = vld [vmem:[#allocation384_spill] sm:$0xff]  ;;  %v9720_v5 = vld [vmem:[#allocation30_spill] sm:$0xff] }
 0x519   :  { %v2014_v33 = vpop.permute.xlu1 %2013  ;;  %v2283_v52 = vsel %vm2261_vm5, %v2218_v42, %v9702_v43  ;;  %v2332_v51 = vsel %vm2326_vm6, %v2267_v45, %v9703_v2  ;;  %v7279_v49 = vsel %vm382_vm1, %v585_v47, %v586_v41  ;;  %v9721_v24 = vld [vmem:[#allocation231_spill] sm:$0xff]  ;;  %v9722_v43 = vld [vmem:[#allocation66_spill] sm:$0xff]  ;;  %v9724_v2 = vld [vmem:[#allocation256_spill] sm:$0xff] }
 0x51a   :  { %v7174_v0 = vpop.permute.xlu2 %1825  ;;  %v2624_v1 = vsel %vm2586_vm9, %v2559_v12, %v2014_v33  ;;  %v2397_v27 = vsel %vm2391_vm7, %v2332_v51, %v9706_v55  ;;  %v3500_v12 = vld [vmem:[%s8501_s0 + $0x1f8] sm:$0xff]  ;;  %v9712_v33 = vld [vmem:[#allocation135_spill] sm:$0xff] }
 0x51b   :  { %v1854_v6 = vpop.permute.xlu0 %1853  ;;  %3368 = vmatmul.msk.f32.gmra.mxu2 %vm2656_vm11, %v2624_v1  ;;  %v2462_v26 = vsel %vm2456_vm8, %v2397_v27, %v9710_v18  ;;  %v9715_v1 = vld [vmem:[#allocation253_spill] sm:$0xff]  ;;  %v3502_v18 = vld [vmem:[%s8501_s0 + $0x48] sm:$0xff] }
 0x51c   :  { %v2575_v46 = vsel %vm2521_vm10, %v2510_v15, %v1854_v6  ;;  %v2527_v7 = vsel %vm2521_vm10, %v2462_v26, %v6538_v40  ;;  %v2170_v6 = vsel %vm2131_vm3, %v3500_v12, %v9712_v33  ;;  %v3501_v40 = vld [vmem:[%s8501_s0 + $0x2b8] sm:$0xff]  ;;  %v9726_v26 = vld [vmem:[#allocation92_spill] sm:$0xff]  ;;  %v9731_v12 = vld [vmem:[#allocation3_spill] sm:$0xff] }
 0x51d   :  { %v2640_v61 = vsel %vm2586_vm9, %v2575_v46, %v7035_v57  ;;  %v2348_v57 = vsel %vm2326_vm6, %v2283_v52, %v9704_v53  ;;  %1837 = vrot.lane.b32.xlu2 %v9705_v39, %s3548_s25  ;;  %v2235_v46 = vsel %vm2196_vm4, %v2170_v6, %v9714_v44  ;;  %v9723_v52 = vld [vmem:[#allocation339_spill] sm:$0xff]  ;;  %v9732_v6 = vld [vmem:[#allocation325_spill] sm:$0xff] }
 0x51e   :  { %3384 = vmatmul.msk.f32.gmra.mxu3 %vm2656_vm11, %v2640_v61  ;;  %v2413_v25 = vsel %vm2391_vm7, %v2348_v57, %v9707_v4  ;;  %1995 = vrot.lane.b32.xlu1 %v9708_v10, %s3549_s24  ;;  %v2300_v62 = vsel %vm2261_vm5, %v2235_v46, %v9716_v59  ;;  %v9725_v39 = vld [vmem:[#allocation19_spill] sm:$0xff]  ;;  %v9735_v44 = vld [vmem:[#allocation377_spill] sm:$0xff] }
 0x51f   :  { %1963 = vrot.lane.b32.xlu0 %v9709_v29, %s3549_s24  ;;  %v2478_v14 = vsel %vm2456_vm8, %v2413_v25, %v9711_v35  ;;  %v2365_v61 = vsel %vm2326_vm6, %v2300_v62, %v9718_v32  ;;  %v3503_v35 = vld [vmem:[%s8501_s0 + $0x108] sm:$0xff]  ;;  %v9738_v62 = vld [vmem:[#allocation305_spill] sm:$0xff]  ;;  %v9740_v32 = vld [vmem:[#allocation416_spill] sm:$0xff] }
 0x520   :  { %v2543_v28 = vsel %vm2521_vm10, %v2478_v14, %v6661_v37  ;;  %v9713_v37 = vld [vmem:[#allocation43_spill] sm:$0xff]  ;;  %v2430_v45 = vsel %vm2391_vm7, %v2365_v61, %v9721_v24  ;;  %v9727_v14 = vld [vmem:[#allocation130_spill] sm:$0xff] }
 0x521   :  { %v1982_v20 = vpop.permute.xlu1 %1981  ;;  %v2186_v21 = vsel %vm2131_vm3, %v3501_v40, %v9713_v37  ;;  %v2495_v53 = vsel %vm2456_vm8, %v2430_v45, %v6456_v56  ;;  %v2138_v56 = vsel %vm2131_vm3, %v3502_v18, %v9726_v26  ;;  %v9733_v37 = vld [vmem:[#allocation340_spill] sm:$0xff]  ;;  %v9737_v59 = vld [vmem:[#allocation155_spill] sm:$0xff]  ;;  %v9746_v18 = vld [vmem:[#allocation310_spill] sm:$0xff] }
 0x522   :  { %v7243_v23 = vpop.permute.xlu2 %2049  ;;  %v2608_v15 = vsel %vm2586_vm9, %v2543_v28, %v1982_v20  ;;  %v2251_v58 = vsel %vm2196_vm4, %v2186_v21, %v9715_v1  ;;  %v2560_v27 = vsel %vm2521_vm10, %v2495_v53, %v7077_v22  ;;  %v2154_v22 = vsel %vm2131_vm3, %v3503_v35, %v9727_v14  ;;  %v9728_v28 = vld [vmem:[#allocation86_spill] sm:$0xff]  ;;  %v9734_v21 = vld [vmem:[#allocation368_spill] sm:$0xff] }
 0x523   :  { %v1950_v8 = vpop.permute.xlu0 %1949  ;;  %3352 = vmatmul.msk.f32.gmra.mxu1 %vm2656_vm11, %v2608_v15  ;;  %v2316_v13 = vsel %vm2261_vm5, %v2251_v58, %v9717_v9  ;;  %v2203_v20 = vsel %vm2196_vm4, %v2138_v56, %v9728_v28  ;;  %v9736_v1 = vld [vmem:[#allocation96_spill] sm:$0xff]  ;;  %v9739_v9 = vld [vmem:[#allocation261_spill] sm:$0xff]  ;;  %v9747_v56 = vld [vmem:[#allocation359_spill] sm:$0xff] }
 0x524   :  { %v2592_v34 = vsel %vm2586_vm9, %v2527_v7, %v1950_v8  ;;  %v2381_v42 = vsel %vm2326_vm6, %v2316_v13, %v9720_v5  ;;  %v9729_v8 = vld [vmem:[#allocation109_spill] sm:$0xff]  ;;  %v9748_v14 = vld [vmem:[#allocation180_spill] sm:$0xff]  ;;  %v9750_v28 = vld [vmem:[#allocation230_spill] sm:$0xff] }
 0x525   :  { %3336 = vmatmul.msk.f32.gmra.mxu0 %vm2656_vm11, %v2592_v34  ;;  %2061 = vrot.lane.b32.xlu2 %v9719_v48, %s3549_s24  ;;  %v2446_v51 = vsel %vm2391_vm7, %v2381_v42, %v9724_v2  ;;  %v2219_v47 = vsel %vm2196_vm4, %v2154_v22, %v9729_v8  ;;  %v9730_v34 = vld [vmem:[#allocation264_spill] sm:$0xff]  ;;  %v3504_v2 = vld [vmem:[%s8501_s0 + $0x200] sm:$0xff]  ;;  %v9749_v22 = vld [vmem:[#allocation173_spill] sm:$0xff] }
 0x526   :  { %2029 = vrot.lane.b32.xlu1 %v9722_v43, %s3549_s24  ;;  %v2511_v55 = vsel %vm2456_vm8, %v2446_v51, %v9725_v39  ;;  %v2268_v15 = vsel %vm2261_vm5, %v2203_v20, %v9730_v34  ;;  %v2284_v33 = vsel %vm2261_vm5, %v2219_v47, %v9731_v12  ;;  %v9741_v51 = vld [vmem:[#allocation158_spill] sm:$0xff]  ;;  %v9751_v8 = vld [vmem:[#allocation83_spill] sm:$0xff]  ;;  %v9752_v47 = vld [vmem:[#allocation229_spill] sm:$0xff] }
 0x527   :  { %1869 = vrot.lane.b32.xlu0 %v9723_v52, %s3548_s25  ;;  %v2333_v40 = vsel %vm2326_vm6, %v2268_v15, %v9732_v6  ;;  %v2171_v53 = vsel %vm2131_vm3, %v3504_v2, %v9741_v51  ;;  %v9753_v15 = vld [vmem:[#allocation419_spill] sm:$0xff]  ;;  %v9762_v51 = vld [vmem:[#allocation154_spill] sm:$0xff] }
 0x528   :  { %v2398_v46 = vsel %vm2391_vm7, %v2333_v40, %v9735_v44  ;;  %v3506_v44 = vld [vmem:[%s8501_s0 + $0x50] sm:$0xff] }
 0x529   :  { %v2016_v4 = vpop.permute.xlu1 %2015  ;;  %v2463_v13 = vsel %vm2456_vm8, %v2398_v46, %v9739_v9  ;;  %v9754_v46 = vld [vmem:[#allocation91_spill] sm:$0xff] }
 0x52a   :  { %v7293_v57 = vpop.permute.xlu2 %1827  ;;  %v2625_v29 = vsel %vm2586_vm9, %v2560_v27, %v2016_v4  ;;  %v2528_v5 = vsel %vm2521_vm10, %v2463_v13, %v6590_v31  ;;  %v3505_v31 = vld [vmem:[%s8501_s0 + $0x2c0] sm:$0xff] }
 0x52b   :  { %v1856_v25 = vpop.permute.xlu0 %1855  ;;  %3369 = vmatmul.msk.f32.gmra.mxu2 %vm2656_vm11, %v2625_v29  ;;  %v9744_v4 = vld [vmem:[#allocation238_spill] sm:$0xff] }
 0x52c   :  { %v2576_v10 = vsel %vm2521_vm10, %v2511_v55, %v1856_v25  ;;  %v9743_v55 = vld [vmem:[#allocation227_spill] sm:$0xff]  ;;  %v9757_v13 = vld [vmem:[#allocation198_spill] sm:$0xff] }
 0x52d   :  { %v2641_v7 = vsel %vm2586_vm9, %v2576_v10, %v7125_v54  ;;  %v2349_v54 = vsel %vm2326_vm6, %v2284_v33, %v9733_v37  ;;  %1997 = vrot.lane.b32.xlu2 %v9734_v21, %s3549_s24  ;;  %v2236_v27 = vsel %vm2196_vm4, %v2171_v53, %v9743_v55  ;;  %v9745_v10 = vld [vmem:[#allocation10_spill] sm:$0xff]  ;;  %v9763_v53 = vld [vmem:[#allocation175_spill] sm:$0xff] }
 0x52e   :  { %3385 = vmatmul.msk.f32.gmra.mxu3 %vm2656_vm11, %v2641_v7  ;;  %v2414_v58 = vsel %vm2391_vm7, %v2349_v54, %v9736_v1  ;;  %1965 = vrot.lane.b32.xlu1 %v9737_v59, %s3549_s24  ;;  %v2301_v29 = vsel %vm2261_vm5, %v2236_v27, %v9745_v10  ;;  %v2139_v1 = vsel %vm2131_vm3, %v3506_v44, %v9754_v46  ;;  %v9765_v27 = vld [vmem:[#allocation404_spill] sm:$0xff]  ;;  %v9775_v46 = vld [vmem:[#allocation363_spill] sm:$0xff] }
 0x52f   :  { %1805 = vrot.lane.b32.xlu0 %v9738_v62, %s3548_s25  ;;  %v2479_v61 = vsel %vm2456_vm8, %v2414_v58, %v9740_v32  ;;  %v2366_v35 = vsel %vm2326_vm6, %v2301_v29, %v9747_v56  ;;  %v9755_v58 = vld [vmem:[#allocation111_spill] sm:$0xff]  ;;  %v9756_v62 = vld [vmem:[#allocation58_spill] sm:$0xff] }
 0x530   :  { %v2544_v42 = vsel %vm2521_vm10, %v2479_v61, %v6659_v3  ;;  %v9742_v3 = vld [vmem:[#allocation42_spill] sm:$0xff]  ;;  %v2431_v20 = vsel %vm2391_vm7, %v2366_v35, %v9750_v28  ;;  %v2204_v9 = vsel %vm2196_vm4, %v2139_v1, %v9756_v62  ;;  %v124_v61 = vld [vmem:[%s8501_s0 + $0x358] sm:$0x3]  ;;  %v9778_v62 = vld [vmem:[#allocation255_spill] sm:$0xff] }
 0x531   :  { %v1984_v24 = vpop.permute.xlu1 %1983  ;;  %v2187_v39 = vsel %vm2131_vm3, %v3505_v31, %v9742_v3  ;;  %v2496_v12 = vsel %vm2456_vm8, %v2431_v20, %v9753_v15  ;;  %v9764_v3 = vld [vmem:[#allocation194_spill] sm:$0xff]  ;;  %v583_v55 = vrot.slane %v124_v61, 1  ;;  %v3509_v20 = vld [vmem:[%s8501_s0 + $0x2d0] sm:$0xff] }
 0x532   :  { %v7341_v48 = vpop.permute.xlu2 %2051  ;;  %v2609_v52 = vsel %vm2586_vm9, %v2544_v42, %v1984_v24  ;;  %v2252_v25 = vsel %vm2196_vm4, %v2187_v39, %v9744_v4  ;;  %v2561_v40 = vsel %vm2521_vm10, %v2496_v12, %v7174_v0  ;;  %v9759_v24 = vld [vmem:[#allocation5_spill] sm:$0xff]  ;;  %v7464_v12 = vld [vmem:[%s8501_s0 + $0x1a8] sm:$0x3] }
 0x533   :  { %v1952_v45 = vpop.permute.xlu0 %1951  ;;  %3353 = vmatmul.msk.f32.gmra.mxu1 %vm2656_vm11, %v2609_v52  ;;  %v2317_v26 = vsel %vm2261_vm5, %v2252_v25, %v9746_v18  ;;  %v9761_v52 = vld [vmem:[#allocation329_spill] sm:$0xff]  ;;  %v9766_v25 = vld [vmem:[#allocation415_spill] sm:$0xff] }
 0x534   :  { %v2593_v43 = vsel %vm2586_vm9, %v2528_v5, %v1952_v45  ;;  %v2382_v7 = vsel %vm2326_vm6, %v2317_v26, %v9749_v22  ;;  %v9758_v5 = vld [vmem:[#allocation278_spill] sm:$0xff]  ;;  %v9767_v26 = vld [vmem:[#allocation55_spill] sm:$0xff]  ;;  %v3508_v22 = vld [vmem:[%s8501_s0 + $0x210] sm:$0xff] }
 0x535   :  { %3337 = vmatmul.msk.f32.gmra.mxu0 %vm2656_vm11, %v2593_v43  ;;  %2031 = vrot.lane.b32.xlu2 %v9748_v14, %s3549_s24  ;;  %v2447_v34 = vsel %vm2391_vm7, %v2382_v7, %v9752_v47  ;;  %v2269_v42 = vsel %vm2261_vm5, %v2204_v9, %v9758_v5  ;;  %v9760_v43 = vld [vmem:[#allocation324_spill] sm:$0xff]  ;;  %v9768_v7 = vld [vmem:[#allocation157_spill] sm:$0xff] }
 0x536   :  { %1871 = vrot.lane.b32.xlu1 %v7160_v50, %s3548_s25  ;;  %v2512_v6 = vsel %vm2456_vm8, %v2447_v34, %v6530_v17  ;;  %v3507_v17 = vld [vmem:[%s8501_s0 + $0x110] sm:$0xff]  ;;  %v2172_v28 = vsel %vm2131_vm3, %v3508_v22, %v9768_v7 }
 0x537   :  { %1839 = vrot.lane.b32.xlu0 %v9751_v8, %s3548_s25  ;;  %v2155_v0 = vsel %vm2131_vm3, %v3507_v17, %v9755_v58  ;;  %v9769_v8 = vld [vmem:[#allocation162_spill] sm:$0xff]  ;;  %v9770_v34 = vld [vmem:[#allocation208_spill] sm:$0xff] }
 0x538   :  { %v2220_v32 = vsel %vm2196_vm4, %v2155_v0, %v9757_v13  ;;  %v2188_v47 = vsel %vm2131_vm3, %v3509_v20, %v9769_v8  ;;  %v2237_v15 = vsel %vm2196_vm4, %v2172_v28, %v9770_v34  ;;  %v9776_v17 = vld [vmem:[#allocation212_spill] sm:$0xff]  ;;  %v9777_v0 = vld [vmem:[#allocation95_spill] sm:$0xff]  ;;  %v9779_v13 = vld [vmem:[#allocation18_spill] sm:$0xff] }
 0x539   :  { %v2018_v37 = vpop.permute.xlu1 %2017  ;;  %v2285_v45 = vsel %vm2261_vm5, %v2220_v32, %v9759_v24  ;;  %v9780_v24 = vld [vmem:[#allocation27_spill] sm:$0xff]  ;;  %v9788_v22 = vld [vmem:[#allocation344_spill] sm:$0xff] }
 0x53a   :  { %v7385_v33 = vpop.permute.xlu2 %1829  ;;  %v2626_v21 = vsel %vm2586_vm9, %v2561_v40, %v2018_v37  ;;  %v2350_v2 = vsel %vm2326_vm6, %v2285_v45, %v9761_v52  ;;  %v9772_v37 = vld [vmem:[#allocation295_spill] sm:$0xff] }
 0x53b   :  { %v1858_v54 = vpop.permute.xlu0 %1857  ;;  %3370 = vmatmul.msk.f32.gmra.mxu2 %vm2656_vm11, %v2626_v21  ;;  %v2415_v39 = vsel %vm2391_vm7, %v2350_v2, %v9764_v3  ;;  %v9774_v21 = vld [vmem:[#allocation358_spill] sm:$0xff] }
 0x53c   :  { %v2577_v50 = vsel %vm2521_vm10, %v2512_v6, %v1858_v54  ;;  %v2480_v10 = vsel %vm2456_vm8, %v2415_v39, %v9766_v25  ;;  %v9771_v6 = vld [vmem:[#allocation260_spill] sm:$0xff]  ;;  %v9773_v54 = vld [vmem:[#allocation309_spill] sm:$0xff]  ;;  %v9782_v3 = vld [vmem:[#allocation134_spill] sm:$0xff] }
 0x53d   :  { %v2642_v59 = vsel %vm2586_vm9, %v2577_v50, %v7243_v23  ;;  %v2334_v23 = vsel %vm2326_vm6, %v2269_v42, %v9760_v43  ;;  %1967 = vrot.lane.b32.xlu2 %v9762_v51, %s3549_s24  ;;  %v2545_v56 = vsel %vm2521_vm10, %v2480_v10, %v9767_v26  ;;  %v2253_v40 = vsel %vm2196_vm4, %v2188_v47, %v9771_v6  ;;  %v3510_v51 = vld [vmem:[%s8501_s0 + $0x60] sm:$0xff]  ;;  %v9784_v10 = vld [vmem:[#allocation197_spill] sm:$0xff]  ;;  %v9791_v47 = vld [vmem:[#allocation75_spill] sm:$0xff] }
 0x53e   :  { %3386 = vmatmul.msk.f32.gmra.mxu3 %vm2656_vm11, %v2642_v59  ;;  %v2399_v31 = vsel %vm2391_vm7, %v2334_v23, %v9763_v53  ;;  %1807 = vrot.lane.b32.xlu1 %v7224_v60, %s3548_s25  ;;  %v2318_v50 = vsel %vm2261_vm5, %v2253_v40, %v9773_v54  ;;  %v578_v59 = vrot.slane %v7464_v12, 1  ;;  %v593_v42 = vrot.slane %v124_v61, 2  ;;  %v9781_v53 = vld [vmem:[#allocation61_spill] sm:$0xff]  ;;  %v3511_v61 = vld [vmem:[%s8501_s0 + $0x120] sm:$0xff]  ;;  %v9793_v40 = vld [vmem:[#allocation408_spill] sm:$0xff] }
 0x53f   :  { %2063 = vrot.lane.b32.xlu0 %v7229_v36, %s3549_s24  ;;  %v2464_v4 = vsel %vm2456_vm8, %v2399_v31, %v9765_v27  ;;  %v2383_v1 = vsel %vm2326_vm6, %v2318_v50, %v9775_v46  ;;  %v2140_v31 = vsel %vm2131_vm3, %v3510_v51, %v9781_v53  ;;  %v9785_v26 = vld [vmem:[#allocation277_spill] sm:$0xff] }
 0x540   :  { %v2529_v18 = vsel %vm2521_vm10, %v2464_v4, %v6588_v63  ;;  %v584_v63 = vsel %vm221_vm0, %v581_v16, %v583_v55  ;;  %v2302_v16 = vsel %vm2261_vm5, %v2237_v15, %v9772_v37  ;;  %v2448_v9 = vsel %vm2391_vm7, %v2383_v1, %v9778_v62  ;;  %v7512_v55 = vld [vmem:[%s8503_s2] ss:$0 sm:$0xff]  ;;  %v9783_v4 = vld [vmem:[#allocation100_spill] sm:$0xff]  ;;  %v9792_v15 = vld [vmem:[#allocation403_spill] sm:$0xff] }
 0x541   :  { %v1986_v35 = vpop.permute.xlu1 %1985  ;;  %v2367_v44 = vsel %vm2326_vm6, %v2302_v16, %v9774_v21  ;;  %v2513_v45 = vsel %vm2456_vm8, %v2448_v9, %v9780_v24  ;;  %v579_v27 = vsel %vm221_vm0, %v576_v38, %v578_v59  ;;  %v2205_v25 = vsel %vm2196_vm4, %v2140_v31, %v9783_v4  ;;  %v7532_v38 = vld [vmem:[%s8504_s3] ss:$0 sm:$0xff]  ;;  %v3512_v62 = vld [vmem:[%s8501_s0 + $0x218] sm:$0xff] }
 0x542   :  { %v7436_v29 = vpop.permute.xlu2 %2053  ;;  %v2610_v36 = vsel %vm2586_vm9, %v2545_v56, %v1986_v35  ;;  %v2432_v58 = vsel %vm2391_vm7, %v2367_v44, %v9776_v17  ;;  %v2270_v56 = vsel %vm2261_vm5, %v2205_v25, %v9785_v26  ;;  %v9786_v35 = vld [vmem:[#allocation282_spill] sm:$0xff]  ;;  %v588_v21 = vrot.slane %v7464_v12, 2  ;;  %v9794_v44 = vld [vmem:[#allocation64_spill] sm:$0xff] }
 0x543   :  { %v1954_v60 = vpop.permute.xlu0 %1953  ;;  %3354 = vmatmul.msk.f32.gmra.mxu1 %vm2656_vm11, %v2610_v36  ;;  %v2497_v32 = vsel %vm2456_vm8, %v2432_v58, %v9779_v13  ;;  %v9795_v9 = vld [vmem:[#allocation138_spill] sm:$0xff] }
 0x544   :  { %v2594_v14 = vsel %vm2586_vm9, %v2529_v18, %v1954_v60  ;;  %v2562_v43 = vsel %vm2521_vm10, %v2497_v32, %v7293_v57  ;;  %v2156_v57 = vsel %vm2131_vm3, %v3511_v61, %v9782_v3  ;;  %v2173_v13 = vsel %vm2131_vm3, %v3512_v62, %v9795_v9  ;;  %v9796_v12 = vld [vmem:[#allocation306_spill] sm:$0xff]  ;;  %v3513_v61 = vld [vmem:[%s8501_s0 + $0x2d8] sm:$0xff]  ;;  %v9798_v3 = vld [vmem:[#allocation40_spill] sm:$0xff] }
 0x545   :  { %3338 = vmatmul.msk.f32.gmra.mxu0 %vm2656_vm11, %v2594_v14  ;;  %1873 = vrot.lane.b32.xlu2 %v584_v63, %s3548_s25  ;;  %v2221_v18 = vsel %vm2196_vm4, %v2156_v57, %v9784_v10  ;;  %v9787_v14 = vld [vmem:[#allocation314_spill] sm:$0xff]  ;;  %v9790_v63 = vld [vmem:[#allocation201_spill] sm:$0xff]  ;;  %v589_v31 = vsel %vm382_vm1, %v586_v41, %v588_v21  ;;  %v2189_v57 = vsel %vm2131_vm3, %v3513_v61, %v9798_v3  ;;  %v9801_v10 = vld [vmem:[#allocation348_spill] sm:$0xff] }
 0x546   :  { %1841 = vrot.lane.b32.xlu1 %v9777_v0, %s3548_s25  ;;  %v2286_v60 = vsel %vm2261_vm5, %v2221_v18, %v9786_v35  ;;  %v2335_v36 = vsel %vm2326_vm6, %v2270_v56, %v9787_v14  ;;  %v2254_v41 = vsel %vm2196_vm4, %v2189_v57, %v9800_v19  ;;  %v9803_v56 = vld [vmem:[#allocation237_spill] sm:$0xff]  ;;  %v9805_v14 = vld [vmem:[#allocation35_spill] sm:$0xff]  ;;  %v9814_v62 = vld [vmem:[#allocation4_spill] sm:$0xff] }
 0x547   :  { %1999 = vrot.lane.b32.xlu0 %v7279_v49, %s3549_s24  ;;  %v2351_v7 = vsel %vm2326_vm6, %v2286_v60, %v9788_v22  ;;  %v9804_v60 = vld [vmem:[#allocation153_spill] sm:$0xff]  ;;  %v9806_v22 = vld [vmem:[#allocation23_spill] sm:$0xff] }
 0x548   :  { %v2416_v20 = vsel %vm2391_vm7, %v2351_v7, %v9790_v63  ;;  %v9811_v21 = vld [vmem:[#allocation99_spill] sm:$0xff] }
 0x549   :  { %v2020_v23 = vpop.permute.xlu1 %2019  ;;  %v2481_v37 = vsel %vm2456_vm8, %v2416_v20, %v9793_v40  ;;  %v9809_v40 = vld [vmem:[#allocation103_spill] sm:$0xff] }
 0x54a   :  { %v7488_v5 = vpop.permute.xlu2 %1831  ;;  %v2627_v2 = vsel %vm2586_vm9, %v2562_v43, %v2020_v23  ;;  %v2546_v46 = vsel %vm2521_vm10, %v2481_v37, %v9794_v44 }
 0x54b   :  { %v1860_v52 = vpop.permute.xlu0 %1859  ;;  %3371 = vmatmul.msk.f32.gmra.mxu2 %vm2656_vm11, %v2627_v2  ;;  %v9797_v2 = vld [vmem:[#allocation234_spill] sm:$0xff] }
 0x54c   :  { %v2578_v49 = vsel %vm2521_vm10, %v2513_v45, %v1860_v52  ;;  %v2238_v51 = vsel %vm2196_vm4, %v2173_v13, %v9797_v2  ;;  %v9815_v13 = vld [vmem:[#allocation328_spill] sm:$0xff]  ;;  %v9819_v2 = vld [vmem:[#allocation391_spill] sm:$0xff] }
 0x54d   :  { %v2643_v39 = vsel %vm2586_vm9, %v2578_v49, %v7341_v48  ;;  %v594_v48 = vsel %vm382_vm1, %v591_v11, %v593_v42  ;;  %1809 = vrot.lane.b32.xlu2 %v579_v27, %s3548_s25  ;;  %v9789_v11 = vld [vmem:[#allocation89_spill] sm:$0xff] }
 0x54e   :  { %3387 = vmatmul.msk.f32.gmra.mxu3 %vm2656_vm11, %v2643_v39  ;;  %v2966_v30 = vpop.f32.mrf.mxu2  ;;  %v2400_v28 = vsel %vm2391_vm7, %v2335_v36, %v9789_v11  ;;  %2065 = vrot.lane.b32.xlu1 %v594_v48, %s3549_s24  ;;  %v9799_v39 = vld [vmem:[#allocation294_spill] sm:$0xff]  ;;  %v9802_v48 = vld [vmem:[#allocation299_spill] sm:$0xff] }
 0x54f   :  { %v3098_v8 = vmul.f32 %v7512_v55, %v2966_v30  ;;  %2033 = vrot.lane.b32.xlu0 %v9791_v47, %s3549_s24  ;;  %v2465_v6 = vsel %vm2456_vm8, %v2400_v28, %v9792_v15  ;;  %v2303_v27 = vsel %vm2261_vm5, %v2238_v51, %v9799_v39  ;;  %v2319_v26 = vsel %vm2261_vm5, %v2254_v41, %v9802_v48  ;;  %v9807_v30 = vld [vmem:[#allocation263_spill] sm:$0xff]  ;;  %v9821_v39 = vld [vmem:[#allocation116_spill] sm:$0xff]  ;;  %v9822_v48 = vld [vmem:[#allocation161_spill] sm:$0xff] }
 0x550   :  { %v2918_v50 = vpop.f32.mrf.mxu1  ;;  %v2530_v32 = vsel %vm2521_vm10, %v2465_v6, %v9796_v12  ;;  %v2368_v18 = vsel %vm2326_vm6, %v2303_v27, %v9801_v10  ;;  %v2384_v36 = vsel %vm2326_vm6, %v2319_v26, %v9805_v14  ;;  %v3514_v6 = vld [vmem:[%s8501_s0 + $0x68] sm:$0xff] }
 0x551   :  { %v3014_v34 = vpop.f32.mrf.mxu3  ;;  %v3166_v1 = vadd.f32 %v7532_v38, %v3098_v8  ;;  %v3082_v58 = vmul.f32 %v7512_v55, %v2918_v50  ;;  %v1988_v59 = vpop.permute.xlu1 %1987  ;;  %v2433_v35 = vsel %vm2391_vm7, %v2368_v18, %v9803_v56  ;;  %v2449_v11 = vsel %vm2391_vm7, %v2384_v36, %v9807_v30  ;;  %v9808_v8 = vld [vmem:[#allocation22_spill] sm:$0xff]  ;;  %v3516_v18 = vld [vmem:[%s8501_s0 + $0x228] sm:$0xff] }
 0x552   :  { %v3114_v16 = vmul.f32 %v7512_v55, %v3014_v34  ;;  %v2870_v54 = vpop.f32.mrf.mxu0  ;;  %v7558_v0 = vpop.permute.xlu2 %2055  ;;  %v2611_v45 = vsel %vm2586_vm9, %v2546_v46, %v1988_v59  ;;  %v2498_v7 = vsel %vm2456_vm8, %v2433_v35, %v9806_v22  ;;  %v2514_v47 = vsel %vm2456_vm8, %v2449_v11, %v9808_v8  ;;  %v9812_v46 = vld [vmem:[#allocation184_spill] sm:$0xff]  ;;  %v9823_v56 = vld [vmem:[#allocation106_spill] sm:$0xff] }
 0x553   :  { %v3066_v17 = vmul.f32 %v7512_v55, %v2870_v54  ;;  %v1956_v24 = vpop.permute.xlu0 %1955  ;;  %v3230_v43 = vmax.f32 %v3166_v1, 0.0  ;;  %v3150_v52 = vadd.f32 %v7532_v38, %v3082_v58  ;;  %3355 = vmatmul.msk.f32.gmra.mxu1 %vm2656_vm11, %v2611_v45  ;;  %v2563_v28 = vsel %vm2521_vm10, %v2498_v7, %v7385_v33  ;;  %v3515_v33 = vld [vmem:[%s8501_s0 + $0x128] sm:$0xff]  ;;  %v9817_v45 = vld [vmem:[#allocation182_spill] sm:$0xff] }
 0x554   :  { %v3182_v42 = vadd.f32 %v7532_v38, %v3114_v16  ;;  %v2595_v49 = vsel %vm2586_vm9, %v2530_v32, %v1956_v24  ;;  %v2141_v37 = vsel %vm2131_vm3, %v3514_v6, %v9809_v40  ;;  %v9810_v16 = vld [vmem:[#allocation133_spill] sm:$0xff]  ;;  %v9813_v58 = vld [vmem:[#allocation267_spill] sm:$0xff]  ;;  %v2174_v26 = vsel %vm2131_vm3, %v3516_v18, %v9822_v48 }
 0x555   :  { %v3134_v23 = vadd.f32 %v7532_v38, %v3066_v17  ;;  %3339 = vmatmul.msk.f32.gmra.mxu0 %vm2656_vm11, %v2595_v49  ;;  %3294 = vst.msk [vmem:[%s8505_s4 + $0x100] sm:$0xff] %vm2196_vm4, %v3230_v43  ;;  %v3214_v25 = vmax.f32 %v3150_v52, 0.0  ;;  %v2157_v54 = vsel %vm2131_vm3, %v3515_v33, %v9810_v16  ;;  %v2206_v44 = vsel %vm2196_vm4, %v2141_v37, %v9811_v21  ;;  %v9816_v32 = vld [vmem:[#allocation343_spill] sm:$0xff]  ;;  %v9826_v6 = vld [vmem:[#allocation13_spill] sm:$0xff]  ;;  %v9827_v16 = vld [vmem:[#allocation244_spill] sm:$0xff] }
 0x556   :  { %v3246_v53 = vmax.f32 %v3182_v42, 0.0  ;;  %2001 = vrot.lane.b32.xlu1 %v589_v31, %s3549_s24  ;;  %v2222_v1 = vsel %vm2196_vm4, %v2157_v54, %v9812_v46  ;;  %v2271_v59 = vsel %vm2261_vm5, %v2206_v44, %v9813_v58  ;;  %v9829_v44 = vld [vmem:[#allocation313_spill] sm:$0xff]  ;;  %v9831_v58 = vld [vmem:[#allocation174_spill] sm:$0xff]  ;;  %v9841_v18 = vld [vmem:[#allocation327_spill] sm:$0xff] }
 0x557   :  { %v3198_v4 = vmax.f32 %v3134_v23, 0.0  ;;  %1969 = vrot.lane.b32.xlu0 %v9804_v60, %s3549_s24  ;;  %3278 = vst.msk [vmem:[%s8505_s4 + $0x80] sm:$0xff] %vm2196_vm4, %v3214_v25  ;;  %v2287_v9 = vsel %vm2261_vm5, %v2222_v1, %v9814_v62  ;;  %v2336_v12 = vsel %vm2326_vm6, %v2271_v59, %v9815_v13  ;;  %v9818_v23 = vld [vmem:[#allocation110_spill] sm:$0xff]  ;;  %v9830_v1 = vld [vmem:[#allocation236_spill] sm:$0xff]  ;;  %v9833_v13 = vld [vmem:[#allocation235_spill] sm:$0xff] }
 0x558   :  { %3310 = vst.msk [vmem:[%s8505_s4 + $0x180] sm:$0xff] %vm2196_vm4, %v3246_v53  ;;  %v2352_v42 = vsel %vm2326_vm6, %v2287_v9, %v9816_v32  ;;  %v2401_v43 = vsel %vm2391_vm7, %v2336_v12, %v9817_v45  ;;  %v9820_v53 = vld [vmem:[#allocation418_spill] sm:$0xff] }
 0x559   :  { %3262 = vst.msk [vmem:[%s8505_s4] sm:$0xff] %vm2196_vm4, %v3198_v4  ;;  %v2022_v20 = vpop.permute.xlu1 %2021  ;;  %v2466_v51 = vsel %vm2456_vm8, %v2401_v43, %v9819_v2  ;;  %v9832_v62 = vld [vmem:[#allocation422_spill] sm:$0xff]  ;;  %v3519_v2 = vld [vmem:[%s8501_s0 + $0x138] sm:$0xff] }
 0x55a   :  { %v7621_v63 = vpop.permute.xlu2 %1833  ;;  %v2628_v15 = vsel %vm2586_vm9, %v2563_v28, %v2022_v20  ;;  %v2531_v35 = vsel %vm2521_vm10, %v2466_v51, %v9823_v56  ;;  %v9824_v28 = vld [vmem:[#allocation233_spill] sm:$0xff]  ;;  %v9836_v51 = vld [vmem:[#allocation119_spill] sm:$0xff] }
 0x55b   :  { %v1862_v34 = vpop.permute.xlu0 %1861  ;;  %3372 = vmatmul.msk.f32.gmra.mxu2 %vm2656_vm11, %v2628_v15  ;;  %v2239_v20 = vsel %vm2196_vm4, %v2174_v26, %v9824_v28  ;;  %v9842_v26 = vld [vmem:[#allocation332_spill] sm:$0xff]  ;;  %v9846_v28 = vld [vmem:[#allocation417_spill] sm:$0xff] }
 0x55c   :  { %v2579_v50 = vsel %vm2521_vm10, %v2514_v47, %v1862_v34  ;;  %v3517_v47 = vld [vmem:[%s8501_s0 + $0x2e8] sm:$0xff]  ;;  %v9825_v34 = vld [vmem:[#allocation48_spill] sm:$0xff]  ;;  %v2304_v40 = vsel %vm2261_vm5, %v2239_v20, %v9826_v6 }
 0x55d   :  { %v2644_v17 = vsel %vm2586_vm9, %v2579_v50, %v7436_v29  ;;  %v2417_v29 = vsel %vm2391_vm7, %v2352_v42, %v9818_v23  ;;  %v2190_v15 = vsel %vm2131_vm3, %v3517_v47, %v9825_v34  ;;  %v9828_v50 = vld [vmem:[#allocation362_spill] sm:$0xff] }
 0x55e   :  { %3388 = vmatmul.msk.f32.gmra.mxu3 %vm2656_vm11, %v2644_v17  ;;  %v2969_v24 = vpop.f32.mrf.mxu2  ;;  %v2482_v31 = vsel %vm2456_vm8, %v2417_v29, %v9820_v53  ;;  %v2255_v54 = vsel %vm2196_vm4, %v2190_v15, %v9827_v16  ;;  %v2369_v21 = vsel %vm2326_vm6, %v2304_v40, %v9828_v50  ;;  %v3518_v29 = vld [vmem:[%s8501_s0 + $0x78] sm:$0xff]  ;;  %v9847_v15 = vld [vmem:[#allocation104_spill] sm:$0xff] }
 0x55f   :  { %v3099_v52 = vmul.f32 %v7512_v55, %v2969_v24  ;;  %v2547_v27 = vsel %vm2521_vm10, %v2482_v31, %v9821_v39  ;;  %v2320_v46 = vsel %vm2261_vm5, %v2255_v54, %v9829_v44  ;;  %v2434_v17 = vsel %vm2391_vm7, %v2369_v21, %v9830_v1  ;;  %v9834_v24 = vld [vmem:[#allocation47_spill] sm:$0xff]  ;;  %v3520_v54 = vld [vmem:[%s8501_s0 + $0x230] sm:$0xff]  ;;  %v9849_v44 = vld [vmem:[#allocation45_spill] sm:$0xff] }
 0x560   :  { %v2921_v57 = vpop.f32.mrf.mxu1  ;;  %v2385_v59 = vsel %vm2326_vm6, %v2320_v46, %v9831_v58  ;;  %v2499_v9 = vsel %vm2456_vm8, %v2434_v17, %v9832_v62  ;;  %v9848_v50 = vld [vmem:[#allocation160_spill] sm:$0xff] }
 0x561   :  { %v3017_v49 = vpop.f32.mrf.mxu3  ;;  %v3167_v4 = vadd.f32 %v7532_v38, %v3099_v52  ;;  %v3083_v19 = vmul.f32 %v7512_v55, %v2921_v57  ;;  %v1990_v10 = vpop.permute.xlu1 %1989  ;;  %v2450_v12 = vsel %vm2391_vm7, %v2385_v59, %v9833_v13  ;;  %v2564_v32 = vsel %vm2521_vm10, %v2499_v9, %v7488_v5  ;;  %v9835_v52 = vld [vmem:[#allocation102_spill] sm:$0xff]  ;;  %v9838_v57 = vld [vmem:[#allocation204_spill] sm:$0xff] }
 0x562   :  { %v3115_v61 = vmul.f32 %v7512_v55, %v3017_v49  ;;  %v2873_v3 = vpop.f32.mrf.mxu0  ;;  %v7668_v41 = vpop.permute.xlu2 %2057  ;;  %v2612_v36 = vsel %vm2586_vm9, %v2547_v27, %v1990_v10  ;;  %v2515_v45 = vsel %vm2456_vm8, %v2450_v12, %v9834_v24  ;;  %v2142_v49 = vsel %vm2131_vm3, %v3518_v29, %v9835_v52  ;;  %v9850_v12 = vld [vmem:[#allocation214_spill] sm:$0xff]  ;;  %v3521_v24 = vld [vmem:[%s8501_s0 + $0x2f0] sm:$0xff] }
 0x563   :  { %v3067_v25 = vmul.f32 %v7512_v55, %v2873_v3  ;;  %v1958_v14 = vpop.permute.xlu0 %1957  ;;  %v3231_v22 = vmax.f32 %v3167_v4, 0.0  ;;  %v3151_v30 = vadd.f32 %v7532_v38, %v3083_v19  ;;  %3356 = vmatmul.msk.f32.gmra.mxu1 %vm2656_vm11, %v2612_v36  ;;  %v2158_v5 = vsel %vm2131_vm3, %v3519_v2, %v9836_v51  ;;  %v9839_v4 = vld [vmem:[#allocation281_spill] sm:$0xff]  ;;  %v9840_v19 = vld [vmem:[#allocation8_spill] sm:$0xff]  ;;  %v9844_v36 = vld [vmem:[#allocation199_spill] sm:$0xff] }
 0x564   :  { %v3183_v60 = vadd.f32 %v7532_v38, %v3115_v61  ;;  %v2596_v11 = vsel %vm2586_vm9, %v2531_v35, %v1958_v14  ;;  %v9837_v61 = vld [vmem:[#allocation67_spill] sm:$0xff]  ;;  %v2223_v39 = vsel %vm2196_vm4, %v2158_v5, %v9838_v57  ;;  %v2175_v21 = vsel %vm2131_vm3, %v3520_v54, %v9848_v50  ;;  %v9853_v51 = vld [vmem:[#allocation266_spill] sm:$0xff] }
 0x565   :  { %v3135_v7 = vadd.f32 %v7532_v38, %v3067_v25  ;;  %3340 = vmatmul.msk.f32.gmra.mxu0 %vm2656_vm11, %v2596_v11  ;;  %3295 = vst.msk [vmem:[%s8505_s4 + $0x108] sm:$0xff] %vm2196_vm4, %v3231_v22  ;;  %v3215_v33 = vmax.f32 %v3151_v30, 0.0  ;;  %v2207_v3 = vsel %vm2196_vm4, %v2142_v49, %v9837_v61  ;;  %v2288_v10 = vsel %vm2261_vm5, %v2223_v39, %v9840_v19  ;;  %v9845_v30 = vld [vmem:[#allocation407_spill] sm:$0xff]  ;;  %v9856_v39 = vld [vmem:[#allocation218_spill] sm:$0xff]  ;;  %v9858_v19 = vld [vmem:[#allocation21_spill] sm:$0xff] }
 0x566   :  { %v3247_v8 = vmax.f32 %v3183_v60, 0.0  ;;  %v2272_v25 = vsel %vm2261_vm5, %v2207_v3, %v9839_v4  ;;  %v2353_v56 = vsel %vm2326_vm6, %v2288_v10, %v9842_v26  ;;  %v9843_v60 = vld [vmem:[#allocation49_spill] sm:$0xff]  ;;  %v9855_v3 = vld [vmem:[#allocation312_spill] sm:$0xff]  ;;  %v9857_v4 = vld [vmem:[#allocation366_spill] sm:$0xff] }
 0x567   :  { %v3199_v37 = vmax.f32 %v3135_v7, 0.0  ;;  %3279 = vst.msk [vmem:[%s8505_s4 + $0x88] sm:$0xff] %vm2196_vm4, %v3215_v33  ;;  %v2337_v48 = vsel %vm2326_vm6, %v2272_v25, %v9841_v18  ;;  %v9859_v18 = vld [vmem:[#allocation390_spill] sm:$0xff]  ;;  %v9868_v50 = vld [vmem:[#allocation347_spill] sm:$0xff] }
 0x568   :  { %3311 = vst.msk [vmem:[%s8505_s4 + $0x188] sm:$0xff] %vm2196_vm4, %v3247_v8  ;;  %v2402_v14 = vsel %vm2391_vm7, %v2337_v48, %v9843_v60 }
 0x569   :  { %3263 = vst.msk [vmem:[%s8505_s4 + $0x8] sm:$0xff] %vm2196_vm4, %v3199_v37  ;;  %v2024_v42 = vpop.permute.xlu1 %2023  ;;  %v2467_v11 = vsel %vm2456_vm8, %v2402_v14, %v9845_v30  ;;  %v3523_v30 = vld [vmem:[%s8501_s0 + $0x140] sm:$0xff] }
 0x56a   :  { %v2629_v23 = vsel %vm2586_vm9, %v2564_v32, %v2024_v42  ;;  %v7738_v53 = vpop.permute.xlu2 %1835  ;;  %v2532_v46 = vsel %vm2521_vm10, %v2467_v11, %v9849_v44  ;;  %v2240_v32 = vsel %vm2196_vm4, %v2175_v21, %v9850_v12  ;;  %v9862_v11 = vld [vmem:[#allocation137_spill] sm:$0xff]  ;;  %v9872_v12 = vld [vmem:[#allocation411_spill] sm:$0xff] }
 0x56b   :  { %v1864_v43 = vpop.permute.xlu0 %1863  ;;  %3373 = vmatmul.msk.f32.gmra.mxu2 %vm2656_vm11, %v2629_v23  ;;  %v9852_v23 = vld [vmem:[#allocation298_spill] sm:$0xff] }
 0x56c   :  { %v2580_v31 = vsel %vm2521_vm10, %v2515_v45, %v1864_v43  ;;  %v9851_v45 = vld [vmem:[#allocation166_spill] sm:$0xff]  ;;  %v2305_v29 = vsel %vm2261_vm5, %v2240_v32, %v9852_v23 }
 0x56d   :  { %v2645_v27 = vsel %vm2586_vm9, %v2580_v31, %v7558_v0  ;;  %v2418_v0 = vsel %vm2391_vm7, %v2353_v56, %v9844_v36  ;;  %v2191_v43 = vsel %vm2131_vm3, %v3521_v24, %v9851_v45  ;;  %v9854_v31 = vld [vmem:[#allocation361_spill] sm:$0xff] }
 0x56e   :  { %3389 = vmatmul.msk.f32.gmra.mxu3 %vm2656_vm11, %v2645_v27  ;;  %v2972_v35 = vpop.f32.mrf.mxu2  ;;  %v2483_v20 = vsel %vm2456_vm8, %v2418_v0, %v9846_v28  ;;  %v2256_v5 = vsel %vm2196_vm4, %v2191_v43, %v9853_v51  ;;  %v2370_v61 = vsel %vm2326_vm6, %v2305_v29, %v9854_v31  ;;  %v3522_v0 = vld [vmem:[%s8501_s0 + $0x80] sm:$0xff]  ;;  %v9873_v43 = vld [vmem:[#allocation63_spill] sm:$0xff]  ;;  %v9874_v31 = vld [vmem:[#allocation144_spill] sm:$0xff] }
 0x56f   :  { %v3100_v22 = vmul.f32 %v7512_v55, %v2972_v35  ;;  %v2548_v6 = vsel %vm2521_vm10, %v2483_v20, %v9847_v15  ;;  %v2321_v57 = vsel %vm2261_vm5, %v2256_v5, %v9855_v3  ;;  %v2435_v27 = vsel %vm2391_vm7, %v2370_v61, %v9856_v39  ;;  %v9860_v35 = vld [vmem:[#allocation28_spill] sm:$0xff]  ;;  %v9863_v20 = vld [vmem:[#allocation97_spill] sm:$0xff]  ;;  %v3524_v5 = vld [vmem:[%s8501_s0 + $0x240] sm:$0xff] }
 0x570   :  { %v2924_v34 = vpop.f32.mrf.mxu1  ;;  %v2386_v25 = vsel %vm2326_vm6, %v2321_v57, %v9857_v4  ;;  %v2500_v10 = vsel %vm2456_vm8, %v2435_v27, %v9858_v19  ;;  %v2176_v61 = vsel %vm2131_vm3, %v3524_v5, %v9874_v31  ;;  %v9875_v3 = vld [vmem:[#allocation46_spill] sm:$0xff] }
 0x571   :  { %v3020_v7 = vpop.f32.mrf.mxu3  ;;  %v3168_v40 = vadd.f32 %v7532_v38, %v3100_v22  ;;  %v3084_v33 = vmul.f32 %v7512_v55, %v2924_v34  ;;  %v1992_v16 = vpop.permute.xlu1 %1991  ;;  %v2451_v48 = vsel %vm2391_vm7, %v2386_v25, %v9859_v18  ;;  %v2565_v26 = vsel %vm2521_vm10, %v2500_v10, %v7621_v63  ;;  %v9861_v22 = vld [vmem:[#allocation69_spill] sm:$0xff]  ;;  %v9894_v31 = vld [vmem:[#allocation346_spill] sm:$0xff] }
 0x572   :  { %v3116_v8 = vmul.f32 %v7512_v55, %v3020_v7  ;;  %v2876_v47 = vpop.f32.mrf.mxu0  ;;  %v2613_v58 = vsel %vm2586_vm9, %v2548_v6, %v1992_v16  ;;  %v7799_v2 = vpop.permute.xlu2 %2059  ;;  %v2516_v60 = vsel %vm2456_vm8, %v2451_v48, %v9860_v35  ;;  %v2143_v7 = vsel %vm2131_vm3, %v3522_v0, %v9861_v22  ;;  %v9865_v6 = vld [vmem:[#allocation280_spill] sm:$0xff]  ;;  %v9867_v16 = vld [vmem:[#allocation317_spill] sm:$0xff]  ;;  %v3525_v35 = vld [vmem:[%s8501_s0 + $0x300] sm:$0xff] }
 0x573   :  { %v3068_v37 = vmul.f32 %v7512_v55, %v2876_v47  ;;  %v1960_v17 = vpop.permute.xlu0 %1959  ;;  %v3232_v59 = vmax.f32 %v3168_v40, 0.0  ;;  %v3152_v9 = vadd.f32 %v7532_v38, %v3084_v33  ;;  %3357 = vmatmul.msk.f32.gmra.mxu1 %vm2656_vm11, %v2613_v58  ;;  %v2159_v63 = vsel %vm2131_vm3, %v3523_v30, %v9862_v11  ;;  %v9864_v47 = vld [vmem:[#allocation203_spill] sm:$0xff]  ;;  %v9876_v48 = vld [vmem:[#allocation240_spill] sm:$0xff]  ;;  %v9879_v30 = vld [vmem:[#allocation265_spill] sm:$0xff] }
 0x574   :  { %v3184_v1 = vadd.f32 %v7532_v38, %v3116_v8  ;;  %v2597_v13 = vsel %vm2586_vm9, %v2532_v46, %v1960_v17  ;;  %v2208_v8 = vsel %vm2196_vm4, %v2143_v7, %v9863_v20  ;;  %v2224_v34 = vsel %vm2196_vm4, %v2159_v63, %v9864_v47  ;;  %v9869_v46 = vld [vmem:[#allocation87_spill] sm:$0xff]  ;;  %v9881_v20 = vld [vmem:[#allocation302_spill] sm:$0xff] }
 0x575   :  { %v3136_v62 = vadd.f32 %v7532_v38, %v3068_v37  ;;  %3341 = vmatmul.msk.f32.gmra.mxu0 %vm2656_vm11, %v2597_v13  ;;  %3296 = vst.msk [vmem:[%s8505_s4 + $0x110] sm:$0xff] %vm2196_vm4, %v3232_v59  ;;  %v3216_v49 = vmax.f32 %v3152_v9, 0.0  ;;  %v2273_v40 = vsel %vm2261_vm5, %v2208_v8, %v9865_v6  ;;  %v9866_v37 = vld [vmem:[#allocation285_spill] sm:$0xff]  ;;  %v9870_v17 = vld [vmem:[#allocation207_spill] sm:$0xff]  ;;  %v9871_v9 = vld [vmem:[#allocation406_spill] sm:$0xff] }
 0x576   :  { %v3248_v42 = vmax.f32 %v3184_v1, 0.0  ;;  %v2289_v33 = vsel %vm2261_vm5, %v2224_v34, %v9866_v37  ;;  %v2338_v54 = vsel %vm2326_vm6, %v2273_v40, %v9867_v16  ;;  %v9880_v63 = vld [vmem:[#allocation351_spill] sm:$0xff]  ;;  %v9884_v40 = vld [vmem:[#allocation26_spill] sm:$0xff] }
 0x577   :  { %v3200_v52 = vmax.f32 %v3136_v62, 0.0  ;;  %3280 = vst.msk [vmem:[%s8505_s4 + $0x90] sm:$0xff] %vm2196_vm4, %v3216_v49  ;;  %v2354_v21 = vsel %vm2326_vm6, %v2289_v33, %v9868_v50  ;;  %v2403_v1 = vsel %vm2391_vm7, %v2338_v54, %v9869_v46  ;;  %v9882_v47 = vld [vmem:[#allocation243_spill] sm:$0xff]  ;;  %v9885_v33 = vld [vmem:[#allocation389_spill] sm:$0xff] }
 0x578   :  { %3312 = vst.msk [vmem:[%s8505_s4 + $0x190] sm:$0xff] %vm2196_vm4, %v3248_v42  ;;  %v2468_v13 = vsel %vm2456_vm8, %v2403_v1, %v9871_v9  ;;  %v9888_v9 = vld [vmem:[#allocation136_spill] sm:$0xff] }
 0x579   :  { %3264 = vst.msk [vmem:[%s8505_s4 + $0x10] sm:$0xff] %vm2196_vm4, %v3200_v52  ;;  %v2026_v56 = vpop.permute.xlu1 %2025  ;;  %v2533_v57 = vsel %vm2521_vm10, %v2468_v13, %v9875_v3 }
 0x57a   :  { %v2630_v36 = vsel %vm2586_vm9, %v2565_v26, %v2026_v56  ;;  %v7863_v58 = vpop.permute.xlu2 %1837  ;;  %v2241_v26 = vsel %vm2196_vm4, %v2176_v61, %v9876_v48 }
 0x57b   :  { %v1866_v14 = vpop.permute.xlu0 %1865  ;;  %3374 = vmatmul.msk.f32.gmra.mxu2 %vm2656_vm11, %v2630_v36  ;;  %v9878_v36 = vld [vmem:[#allocation297_spill] sm:$0xff] }
 0x57c   :  { %v2581_v28 = vsel %vm2521_vm10, %v2516_v60, %v1866_v14  ;;  %v9877_v60 = vld [vmem:[#allocation60_spill] sm:$0xff]  ;;  %v2306_v0 = vsel %vm2261_vm5, %v2241_v26, %v9878_v36 }
 0x57d   :  { %v2646_v15 = vsel %vm2586_vm9, %v2581_v28, %v7668_v41  ;;  %v2419_v41 = vsel %vm2391_vm7, %v2354_v21, %v9870_v17  ;;  %v2192_v14 = vsel %vm2131_vm3, %v3525_v35, %v9877_v60  ;;  %v2371_v28 = vsel %vm2326_vm6, %v2306_v0, %v9880_v63  ;;  %v9899_v60 = vld [vmem:[#allocation115_spill] sm:$0xff] }
 0x57e   :  { %3390 = vmatmul.msk.f32.gmra.mxu3 %vm2656_vm11, %v2646_v15  ;;  %v2975_v44 = vpop.f32.mrf.mxu2  ;;  %v2484_v32 = vsel %vm2456_vm8, %v2419_v41, %v9872_v12  ;;  %v2257_v11 = vsel %vm2196_vm4, %v2192_v14, %v9879_v30  ;;  %v2436_v34 = vsel %vm2391_vm7, %v2371_v28, %v9882_v47  ;;  %v9883_v15 = vld [vmem:[#allocation51_spill] sm:$0xff]  ;;  %v3526_v41 = vld [vmem:[%s8501_s0 + $0x90] sm:$0xff]  ;;  %v9901_v28 = vld [vmem:[#allocation54_spill] sm:$0xff] }
 0x57f   :  { %v3101_v59 = vmul.f32 %v7512_v55, %v2975_v44  ;;  %v2549_v23 = vsel %vm2521_vm10, %v2484_v32, %v9873_v43  ;;  %v2322_v8 = vsel %vm2261_vm5, %v2257_v11, %v9881_v20  ;;  %v2501_v37 = vsel %vm2456_vm8, %v2436_v34, %v9884_v40  ;;  %v9886_v44 = vld [vmem:[#allocation25_spill] sm:$0xff]  ;;  %v9889_v32 = vld [vmem:[#allocation107_spill] sm:$0xff]  ;;  %v9900_v11 = vld [vmem:[#allocation164_spill] sm:$0xff] }
 0x580   :  { %v2927_v45 = vpop.f32.mrf.mxu1  ;;  %v2387_v6 = vsel %vm2326_vm6, %v2322_v8, %v9883_v15  ;;  %v2566_v54 = vsel %vm2521_vm10, %v2501_v37, %v7738_v53  ;;  %v3527_v53 = vld [vmem:[%s8501_s0 + $0x150] sm:$0xff]  ;;  %v3528_v30 = vld [vmem:[%s8501_s0 + $0x248] sm:$0xff] }
 0x581   :  { %v3023_v62 = vpop.f32.mrf.mxu3  ;;  %v3169_v29 = vadd.f32 %v7532_v38, %v3101_v59  ;;  %v3085_v49 = vmul.f32 %v7512_v55, %v2927_v45  ;;  %v1994_v51 = vpop.permute.xlu1 %1993  ;;  %v2452_v16 = vsel %vm2391_vm7, %v2387_v6, %v9885_v33  ;;  %v9887_v59 = vld [vmem:[#allocation113_spill] sm:$0xff]  ;;  %v2160_v13 = vsel %vm2131_vm3, %v3527_v53, %v9888_v9 }
 0x582   :  { %v3117_v42 = vmul.f32 %v7512_v55, %v3023_v62  ;;  %v2879_v24 = vpop.f32.mrf.mxu0  ;;  %v2614_v4 = vsel %vm2586_vm9, %v2549_v23, %v1994_v51  ;;  %v7931_v50 = vpop.permute.xlu2 %2061  ;;  %v2517_v46 = vsel %vm2456_vm8, %v2452_v16, %v9886_v44  ;;  %v2144_v62 = vsel %vm2131_vm3, %v3526_v41, %v9887_v59  ;;  %v9891_v23 = vld [vmem:[#allocation270_spill] sm:$0xff]  ;;  %v9893_v51 = vld [vmem:[#allocation331_spill] sm:$0xff]  ;;  %v9905_v53 = vld [vmem:[#allocation249_spill] sm:$0xff] }
 0x583   :  { %v3069_v52 = vmul.f32 %v7512_v55, %v2879_v24  ;;  %v1962_v27 = vpop.permute.xlu0 %1961  ;;  %v3233_v25 = vmax.f32 %v3169_v29, 0.0  ;;  %v3153_v10 = vadd.f32 %v7532_v38, %v3085_v49  ;;  %3358 = vmatmul.msk.f32.gmra.mxu1 %vm2656_vm11, %v2614_v4  ;;  %v9890_v24 = vld [vmem:[#allocation188_spill] sm:$0xff]  ;;  %v2177_v63 = vsel %vm2131_vm3, %v3528_v30, %v9900_v11  ;;  %v9902_v16 = vld [vmem:[#allocation239_spill] sm:$0xff] }
 0x584   :  { %v3185_v39 = vadd.f32 %v7532_v38, %v3117_v42  ;;  %v2598_v18 = vsel %vm2586_vm9, %v2533_v57, %v1962_v27  ;;  %v2209_v42 = vsel %vm2196_vm4, %v2144_v62, %v9889_v32  ;;  %v2225_v45 = vsel %vm2196_vm4, %v2160_v13, %v9890_v24  ;;  %v9895_v57 = vld [vmem:[#allocation183_spill] sm:$0xff]  ;;  %v9896_v27 = vld [vmem:[#allocation381_spill] sm:$0xff]  ;;  %v9907_v32 = vld [vmem:[#allocation316_spill] sm:$0xff] }
 0x585   :  { %v3137_v19 = vadd.f32 %v7532_v38, %v3069_v52  ;;  %3342 = vmatmul.msk.f32.gmra.mxu0 %vm2656_vm11, %v2598_v18  ;;  %3297 = vst.msk [vmem:[%s8505_s4 + $0x118] sm:$0xff] %vm2196_vm4, %v3233_v25  ;;  %v3217_v7 = vmax.f32 %v3153_v10, 0.0  ;;  %v2274_v29 = vsel %vm2261_vm5, %v2209_v42, %v9891_v23  ;;  %v9892_v52 = vld [vmem:[#allocation6_spill] sm:$0xff]  ;;  %v9898_v18 = vld [vmem:[#allocation421_spill] sm:$0xff]  ;;  %v3529_v44 = vld [vmem:[%s8501_s0 + $0x308] sm:$0xff] }
 0x586   :  { %v3249_v56 = vmax.f32 %v3185_v39, 0.0  ;;  %v2290_v49 = vsel %vm2261_vm5, %v2225_v45, %v9892_v52  ;;  %v2339_v5 = vsel %vm2326_vm6, %v2274_v29, %v9893_v51  ;;  %v9906_v13 = vld [vmem:[#allocation365_spill] sm:$0xff]  ;;  %v9908_v24 = vld [vmem:[#allocation242_spill] sm:$0xff]  ;;  %v9910_v29 = vld [vmem:[#allocation16_spill] sm:$0xff] }
 0x587   :  { %v3201_v22 = vmax.f32 %v3137_v19, 0.0  ;;  %3281 = vst.msk [vmem:[%s8505_s4 + $0x98] sm:$0xff] %vm2196_vm4, %v3217_v7  ;;  %v2355_v61 = vsel %vm2326_vm6, %v2290_v49, %v9894_v31  ;;  %v2404_v39 = vsel %vm2391_vm7, %v2339_v5, %v9895_v57  ;;  %v9897_v19 = vld [vmem:[#allocation394_spill] sm:$0xff]  ;;  %v9911_v49 = vld [vmem:[#allocation248_spill] sm:$0xff] }
 0x588   :  { %3313 = vst.msk [vmem:[%s8505_s4 + $0x198] sm:$0xff] %vm2196_vm4, %v3249_v56  ;;  %v2469_v10 = vsel %vm2456_vm8, %v2404_v39, %v9897_v19  ;;  %v9914_v19 = vld [vmem:[#allocation125_spill] sm:$0xff] }
 0x589   :  { %3265 = vst.msk [vmem:[%s8505_s4 + $0x18] sm:$0xff] %vm2196_vm4, %v3201_v22  ;;  %v2028_v21 = vpop.permute.xlu1 %2027  ;;  %v2534_v20 = vsel %vm2521_vm10, %v2469_v10, %v9901_v28 }
 0x58a   :  { %v2631_v17 = vsel %vm2586_vm9, %v2566_v54, %v2028_v21  ;;  %v7987_v15 = vpop.permute.xlu2 %1997  ;;  %v2242_v54 = vsel %vm2196_vm4, %v2177_v63, %v9902_v16  ;;  %v9920_v63 = vld [vmem:[#allocation336_spill] sm:$0xff] }
 0x58b   :  { %v1868_v1 = vpop.permute.xlu0 %1867  ;;  %3375 = vmatmul.msk.f32.gmra.mxu2 %vm2656_vm11, %v2631_v17  ;;  %v9904_v17 = vld [vmem:[#allocation17_spill] sm:$0xff] }
 0x58c   :  { %v2582_v12 = vsel %vm2521_vm10, %v2517_v46, %v1868_v1  ;;  %v9903_v46 = vld [vmem:[#allocation59_spill] sm:$0xff]  ;;  %v2307_v41 = vsel %vm2261_vm5, %v2242_v54, %v9904_v17 }
 0x58d   :  { %v2647_v43 = vsel %vm2586_vm9, %v2582_v12, %v7799_v2  ;;  %v2420_v2 = vsel %vm2391_vm7, %v2355_v61, %v9896_v27  ;;  %v2193_v1 = vsel %vm2131_vm3, %v3529_v44, %v9903_v46  ;;  %v2372_v12 = vsel %vm2326_vm6, %v2307_v41, %v9906_v13  ;;  %v9912_v61 = vld [vmem:[#allocation94_spill] sm:$0xff]  ;;  %v3530_v27 = vld [vmem:[%s8501_s0 + $0x98] sm:$0xff] }
 0x58e   :  { %3391 = vmatmul.msk.f32.gmra.mxu3 %vm2656_vm11, %v2647_v43  ;;  %v2978_v3 = vpop.f32.mrf.mxu2  ;;  %v2485_v48 = vsel %vm2456_vm8, %v2420_v2, %v9898_v18  ;;  %v2258_v9 = vsel %vm2196_vm4, %v2193_v1, %v9905_v53  ;;  %v2437_v45 = vsel %vm2391_vm7, %v2372_v12, %v9908_v24  ;;  %v9909_v43 = vld [vmem:[#allocation176_spill] sm:$0xff]  ;;  %v9915_v18 = vld [vmem:[#allocation77_spill] sm:$0xff] }
 0x58f   :  { %v3102_v4 = vmul.f32 %v7512_v55, %v2978_v3  ;;  %v2550_v14 = vsel %vm2521_vm10, %v2485_v48, %v9899_v60  ;;  %v2323_v42 = vsel %vm2261_vm5, %v2258_v9, %v9907_v32  ;;  %v2502_v52 = vsel %vm2456_vm8, %v2437_v45, %v9910_v29  ;;  %v9913_v2 = vld [vmem:[#allocation112_spill] sm:$0xff]  ;;  %v9927_v29 = vld [vmem:[#allocation185_spill] sm:$0xff] }
 0x590   :  { %v2930_v35 = vpop.f32.mrf.mxu1  ;;  %v2388_v23 = vsel %vm2326_vm6, %v2323_v42, %v9909_v43  ;;  %v2567_v5 = vsel %vm2521_vm10, %v2502_v52, %v7863_v58  ;;  %v3531_v58 = vld [vmem:[%s8501_s0 + $0x158] sm:$0xff]  ;;  %v9917_v60 = vld [vmem:[#allocation284_spill] sm:$0xff] }
 0x591   :  { %v3026_v25 = vpop.f32.mrf.mxu3  ;;  %v3170_v36 = vadd.f32 %v7532_v38, %v3102_v4  ;;  %v3086_v22 = vmul.f32 %v7512_v55, %v2930_v35  ;;  %v1996_v7 = vpop.permute.xlu1 %1995  ;;  %v2453_v51 = vsel %vm2391_vm7, %v2388_v23, %v9911_v49  ;;  %v2145_v4 = vsel %vm2131_vm3, %v3530_v27, %v9913_v2  ;;  %v9926_v9 = vld [vmem:[#allocation420_spill] sm:$0xff] }
 0x592   :  { %v3118_v26 = vmul.f32 %v7512_v55, %v3026_v25  ;;  %v2882_v56 = vpop.f32.mrf.mxu0  ;;  %v2615_v34 = vsel %vm2586_vm9, %v2550_v14, %v1996_v7  ;;  %v2518_v3 = vsel %vm2456_vm8, %v2453_v51, %v9912_v61  ;;  %v2161_v10 = vsel %vm2131_vm3, %v3531_v58, %v9914_v19  ;;  %v9919_v7 = vld [vmem:[#allocation330_spill] sm:$0xff]  ;;  %v9932_v58 = vld [vmem:[#allocation301_spill] sm:$0xff] }
 0x593   :  { %v3070_v0 = vmul.f32 %v7512_v55, %v2882_v56  ;;  %v1964_v47 = vpop.permute.xlu0 %1963  ;;  %v3234_v6 = vmax.f32 %v3170_v36, 0.0  ;;  %v3154_v37 = vadd.f32 %v7532_v38, %v3086_v22  ;;  %3359 = vmatmul.msk.f32.gmra.mxu1 %vm2656_vm11, %v2615_v34  ;;  %v2210_v48 = vsel %vm2196_vm4, %v2145_v4, %v9915_v18  ;;  %v9916_v56 = vld [vmem:[#allocation210_spill] sm:$0xff]  ;;  %v2032_v36 = vpop.permute.xlu2 %2031  ;;  %v9922_v34 = vld [vmem:[#allocation205_spill] sm:$0xff]  ;;  %v9931_v4 = vld [vmem:[#allocation320_spill] sm:$0xff] }
 0x594   :  { %v3186_v8 = vadd.f32 %v7532_v38, %v3118_v26  ;;  %v2599_v33 = vsel %vm2586_vm9, %v2534_v20, %v1964_v47  ;;  %v2226_v35 = vsel %vm2196_vm4, %v2161_v10, %v9916_v56  ;;  %v2275_v14 = vsel %vm2261_vm5, %v2210_v48, %v9917_v60  ;;  %v9933_v10 = vld [vmem:[#allocation380_spill] sm:$0xff] }
 0x595   :  { %v3138_v40 = vadd.f32 %v7532_v38, %v3070_v0  ;;  %3343 = vmatmul.msk.f32.gmra.mxu0 %vm2656_vm11, %v2599_v33  ;;  %3298 = vst.msk [vmem:[%s8505_s4 + $0x120] sm:$0xff] %vm2196_vm4, %v3234_v6  ;;  %v3218_v62 = vmax.f32 %v3154_v37, 0.0  ;;  %v9918_v0 = vld [vmem:[#allocation11_spill] sm:$0xff]  ;;  %v2340_v30 = vsel %vm2326_vm6, %v2275_v14, %v9919_v7 }
 0x596   :  { %v3250_v21 = vmax.f32 %v3186_v8, 0.0  ;;  %v2291_v22 = vsel %vm2261_vm5, %v2226_v35, %v9918_v0  ;;  %v9935_v35 = vld [vmem:[#allocation409_spill] sm:$0xff]  ;;  %v9936_v14 = vld [vmem:[#allocation211_spill] sm:$0xff] }
 0x597   :  { %v3202_v59 = vmax.f32 %v3138_v40, 0.0  ;;  %3282 = vst.msk [vmem:[%s8505_s4 + $0xa0] sm:$0xff] %vm2196_vm4, %v3218_v62  ;;  %v2356_v28 = vsel %vm2326_vm6, %v2291_v22, %v9920_v63  ;;  %v9923_v40 = vld [vmem:[#allocation410_spill] sm:$0xff]  ;;  %v9925_v62 = vld [vmem:[#allocation80_spill] sm:$0xff]  ;;  %v9937_v22 = vld [vmem:[#allocation93_spill] sm:$0xff] }
 0x598   :  { %3314 = vst.msk [vmem:[%s8505_s4 + $0x1a0] sm:$0xff] %vm2196_vm4, %v3250_v21  ;;  %v2421_v6 = vsel %vm2391_vm7, %v2356_v28, %v9922_v34  ;;  %v9924_v21 = vld [vmem:[#allocation105_spill] sm:$0xff] }
 0x599   :  { %3266 = vst.msk [vmem:[%s8505_s4 + $0x20] sm:$0xff] %vm2196_vm4, %v3202_v59  ;;  %v2030_v31 = vpop.permute.xlu1 %2029  ;;  %v3532_v59 = vld [vmem:[%s8501_s0 + $0xa8] sm:$0xff]  ;;  %v2486_v13 = vsel %vm2456_vm8, %v2421_v6, %v9926_v9 }
 0x59a   :  { %v2632_v39 = vsel %vm2586_vm9, %v2567_v5, %v2030_v31  ;;  %v2146_v53 = vsel %vm2131_vm3, %v3532_v59, %v9925_v62  ;;  %v3533_v5 = vld [vmem:[%s8501_s0 + $0x258] sm:$0xff]  ;;  %v9928_v31 = vld [vmem:[#allocation163_spill] sm:$0xff] }
 0x59b   :  { %v1870_v57 = vpop.permute.xlu0 %1869  ;;  %3376 = vmatmul.msk.f32.gmra.mxu2 %vm2656_vm11, %v2632_v39  ;;  %v2211_v52 = vsel %vm2196_vm4, %v2146_v53, %v9927_v29  ;;  %v2178_v61 = vsel %vm2131_vm3, %v3533_v5, %v9928_v31  ;;  %v1968_v48 = vpop.permute.xlu2 %1967  ;;  %v9944_v53 = vld [vmem:[#allocation32_spill] sm:$0xff] }
 0x59c   :  { %v2583_v25 = vsel %vm2521_vm10, %v2518_v3, %v1870_v57  ;;  %v9929_v3 = vld [vmem:[#allocation283_spill] sm:$0xff]  ;;  %v9945_v5 = vld [vmem:[#allocation140_spill] sm:$0xff] }
 0x59d   :  { %v2648_v26 = vsel %vm2586_vm9, %v2583_v25, %v7931_v50  ;;  %v9921_v50 = vld [vmem:[#allocation374_spill] sm:$0xff]  ;;  %v2276_v57 = vsel %vm2261_vm5, %v2211_v52, %v9929_v3  ;;  %v9946_v3 = vld [vmem:[#allocation209_spill] sm:$0xff] }
 0x59e   :  { %3392 = vmatmul.msk.f32.gmra.mxu3 %vm2656_vm11, %v2648_v26  ;;  %v2981_v11 = vpop.f32.mrf.mxu2  ;;  %v2405_v20 = vsel %vm2391_vm7, %v2340_v30, %v9921_v50  ;;  %v2341_v25 = vsel %vm2326_vm6, %v2276_v57, %v9931_v4  ;;  %v9934_v26 = vld [vmem:[#allocation364_spill] sm:$0xff]  ;;  %v9948_v4 = vld [vmem:[#allocation350_spill] sm:$0xff] }
 0x59f   :  { %v3103_v8 = vmul.f32 %v7512_v55, %v2981_v11  ;;  %v2470_v37 = vsel %vm2456_vm8, %v2405_v20, %v9923_v40  ;;  %v2406_v18 = vsel %vm2391_vm7, %v2341_v25, %v9933_v10  ;;  %v9938_v11 = vld [vmem:[#allocation24_spill] sm:$0xff]  ;;  %v9940_v40 = vld [vmem:[#allocation269_spill] sm:$0xff]  ;;  %v9950_v10 = vld [vmem:[#allocation414_spill] sm:$0xff] }
 0x5a0   :  { %v2933_v54 = vpop.f32.mrf.mxu1  ;;  %v2535_v44 = vsel %vm2521_vm10, %v2470_v37, %v9924_v21  ;;  %v2471_v60 = vsel %vm2456_vm8, %v2406_v18, %v9935_v35  ;;  %v9942_v21 = vld [vmem:[#allocation370_spill] sm:$0xff] }
 0x5a1   :  { %v3029_v47 = vpop.f32.mrf.mxu3  ;;  %v3171_v46 = vadd.f32 %v7532_v38, %v3103_v8  ;;  %v3087_v17 = vmul.f32 %v7512_v55, %v2933_v54  ;;  %v1966_v41 = vpop.permute.xlu1 %1965  ;;  %v2536_v7 = vsel %vm2521_vm10, %v2471_v60, %v9937_v22  ;;  %v3534_v8 = vld [vmem:[%s8501_s0 + $0x318] sm:$0xff]  ;;  %v3536_v35 = vld [vmem:[%s8501_s0 + $0x260] sm:$0xff] }
 0x5a2   :  { %v3119_v33 = vmul.f32 %v7512_v55, %v3029_v47  ;;  %v2885_v16 = vpop.f32.mrf.mxu0  ;;  %v2600_v42 = vsel %vm2586_vm9, %v2535_v44, %v1966_v41  ;;  %v2601_v50 = vsel %vm2586_vm9, %v2536_v7, %v1968_v48  ;;  %v9939_v47 = vld [vmem:[#allocation34_spill] sm:$0xff]  ;;  %v9952_v22 = vld [vmem:[#allocation57_spill] sm:$0xff] }
 0x5a3   :  { %v3071_v1 = vmul.f32 %v7512_v55, %v2885_v16  ;;  %v1806_v32 = vpop.permute.xlu0 %1805  ;;  %v3235_v24 = vmax.f32 %v3171_v46, 0.0  ;;  %v3155_v43 = vadd.f32 %v7532_v38, %v3087_v17  ;;  %3344 = vmatmul.msk.f32.gmra.mxu0 %vm2656_vm11, %v2600_v42  ;;  %v2194_v34 = vsel %vm2131_vm3, %v3534_v8, %v9939_v47  ;;  %v9943_v17 = vld [vmem:[#allocation393_spill] sm:$0xff]  ;;  %v9951_v60 = vld [vmem:[#allocation150_spill] sm:$0xff]  ;;  %v9955_v8 = vld [vmem:[#allocation300_spill] sm:$0xff] }
 0x5a4   :  { %v3187_v12 = vadd.f32 %v7532_v38, %v3119_v33  ;;  %v2551_v23 = vsel %vm2521_vm10, %v2486_v13, %v1806_v32  ;;  %v2259_v37 = vsel %vm2196_vm4, %v2194_v34, %v9940_v40  ;;  %v9941_v33 = vld [vmem:[#allocation315_spill] sm:$0xff]  ;;  %v9956_v34 = vld [vmem:[#allocation38_spill] sm:$0xff] }
 0x5a5   :  { %v3139_v45 = vadd.f32 %v7532_v38, %v3071_v1  ;;  %v2616_v51 = vsel %vm2586_vm9, %v2551_v23, %v7987_v15  ;;  %3299 = vst.msk [vmem:[%s8505_s4 + $0x128] sm:$0xff] %vm2196_vm4, %v3235_v24  ;;  %v3219_v27 = vmax.f32 %v3155_v43, 0.0  ;;  %v9930_v15 = vld [vmem:[#allocation220_spill] sm:$0xff]  ;;  %v2324_v16 = vsel %vm2261_vm5, %v2259_v37, %v9941_v33  ;;  %v9957_v40 = vld [vmem:[#allocation354_spill] sm:$0xff]  ;;  %v9958_v33 = vld [vmem:[#allocation373_spill] sm:$0xff] }
 0x5a6   :  { %v3251_v49 = vmax.f32 %v3187_v12, 0.0  ;;  %3360 = vmatmul.msk.f32.gmra.mxu1 %vm2656_vm11, %v2616_v51  ;;  %v2243_v2 = vsel %vm2196_vm4, %v2178_v61, %v9930_v15  ;;  %v2389_v44 = vsel %vm2326_vm6, %v2324_v16, %v9942_v21  ;;  %v3535_v51 = vld [vmem:[%s8501_s0 + $0x168] sm:$0xff]  ;;  %v9947_v15 = vld [vmem:[#allocation288_spill] sm:$0xff] }
 0x5a7   :  { %v3203_v39 = vmax.f32 %v3139_v45, 0.0  ;;  %v2308_v19 = vsel %vm2261_vm5, %v2243_v2, %v9932_v58  ;;  %3283 = vst.msk [vmem:[%s8505_s4 + $0xa8] sm:$0xff] %vm2196_vm4, %v3219_v27  ;;  %v2454_v41 = vsel %vm2391_vm7, %v2389_v44, %v9943_v17  ;;  %v2162_v31 = vsel %vm2131_vm3, %v3535_v51, %v9945_v5  ;;  %v9949_v58 = vld [vmem:[#allocation213_spill] sm:$0xff]  ;;  %v9959_v21 = vld [vmem:[#allocation247_spill] sm:$0xff] }
 0x5a8   :  { %3315 = vst.msk [vmem:[%s8505_s4 + $0x1a8] sm:$0xff] %vm2196_vm4, %v3251_v49  ;;  %v2373_v56 = vsel %vm2326_vm6, %v2308_v19, %v9934_v26  ;;  %v2519_v9 = vsel %vm2456_vm8, %v2454_v41, %v9944_v53  ;;  %v2227_v57 = vsel %vm2196_vm4, %v2162_v31, %v9946_v3 }
 0x5a9   :  { %3267 = vst.msk [vmem:[%s8505_s4 + $0x28] sm:$0xff] %vm2196_vm4, %v3203_v39  ;;  %v2438_v0 = vsel %vm2391_vm7, %v2373_v56, %v9936_v14  ;;  %v1872_v30 = vpop.permute.xlu1 %1871  ;;  %v2292_v2 = vsel %vm2261_vm5, %v2227_v57, %v9947_v15  ;;  %v2179_v14 = vsel %vm2131_vm3, %v3536_v35, %v9951_v60  ;;  %v9964_v15 = vld [vmem:[#allocation121_spill] sm:$0xff] }
 0x5aa   :  { %v2503_v63 = vsel %vm2456_vm8, %v2438_v0, %v9938_v11  ;;  %v2584_v24 = vsel %vm2521_vm10, %v2519_v9, %v1872_v30  ;;  %v2357_v25 = vsel %vm2326_vm6, %v2292_v2, %v9948_v4  ;;  %v3537_v0 = vld [vmem:[%s8501_s0 + $0x320] sm:$0xff]  ;;  %v9965_v4 = vld [vmem:[#allocation191_spill] sm:$0xff]  ;;  %v9968_v35 = vld [vmem:[#allocation273_spill] sm:$0xff] }
 0x5ab   :  { %v1840_v28 = vpop.permute.xlu0 %1839  ;;  %3345 = vmatmul.msk.f32.gmra.mxu0 %vm2656_vm11, %v2601_v50  ;;  %v2422_v19 = vsel %vm2391_vm7, %v2357_v25, %v9949_v58  ;;  %v2195_v7 = vsel %vm2131_vm3, %v3537_v0, %v9952_v22  ;;  %v9953_v11 = vld [vmem:[#allocation246_spill] sm:$0xff] }
 0x5ac   :  { %v2568_v20 = vsel %vm2521_vm10, %v2503_v63, %v1840_v28  ;;  %v2487_v18 = vsel %vm2456_vm8, %v2422_v19, %v9950_v10  ;;  %v2244_v63 = vsel %vm2196_vm4, %v2179_v14, %v9953_v11  ;;  %v9954_v28 = vld [vmem:[#allocation268_spill] sm:$0xff]  ;;  %v9969_v14 = vld [vmem:[#allocation349_spill] sm:$0xff]  ;;  %v9971_v11 = vld [vmem:[#allocation195_spill] sm:$0xff] }
 0x5ad   :  { %v2633_v6 = vsel %vm2586_vm9, %v2568_v20, %v2032_v36  ;;  %v2260_v50 = vsel %vm2196_vm4, %v2195_v7, %v9954_v28  ;;  %v1874_v20 = vpop.permute.xlu2 %1873  ;;  %v2309_v47 = vsel %vm2261_vm5, %v2244_v63, %v9955_v8  ;;  %v9966_v19 = vld [vmem:[#allocation108_spill] sm:$0xff]  ;;  %v9970_v7 = vld [vmem:[#allocation334_spill] sm:$0xff]  ;;  %v9972_v28 = vld [vmem:[#allocation379_spill] sm:$0xff] }
 0x5ae   :  { %3377 = vmatmul.msk.f32.gmra.mxu2 %vm2656_vm11, %v2633_v6  ;;  %v2984_v54 = vpop.f32.mrf.mxu2  ;;  %v2325_v6 = vsel %vm2261_vm5, %v2260_v50, %v9956_v34  ;;  %v2374_v37 = vsel %vm2326_vm6, %v2309_v47, %v9957_v40  ;;  %v9974_v47 = vld [vmem:[#allocation398_spill] sm:$0xff] }
 0x5af   :  { %v3104_v46 = vmul.f32 %v7512_v55, %v2984_v54  ;;  %v2390_v16 = vsel %vm2326_vm6, %v2325_v6, %v9958_v33  ;;  %v2439_v44 = vsel %vm2391_vm7, %v2374_v37, %v9959_v21  ;;  %v9975_v37 = vld [vmem:[#allocation53_spill] sm:$0xff] }
 0x5b0   :  { %v2936_v62 = vpop.f32.mrf.mxu1 }
 0x5b1   :  { %v3032_v1 = vpop.f32.mrf.mxu3  ;;  %v3172_v13 = vadd.f32 %v7532_v38, %v3104_v46  ;;  %v3088_v32 = vmul.f32 %v7512_v55, %v2936_v62  ;;  %v1808_v42 = vpop.permute.xlu1 %1807  ;;  %v9960_v46 = vld [vmem:[#allocation392_spill] sm:$0xff]  ;;  %v9962_v62 = vld [vmem:[#allocation33_spill] sm:$0xff] }
 0x5b2   :  { %v3120_v36 = vmul.f32 %v7512_v55, %v3032_v1  ;;  %v2888_v59 = vpop.f32.mrf.mxu0  ;;  %v2552_v26 = vsel %vm2521_vm10, %v2487_v18, %v1808_v42  ;;  %v2455_v1 = vsel %vm2391_vm7, %v2390_v16, %v9960_v46  ;;  %v9967_v18 = vld [vmem:[#allocation9_spill] sm:$0xff] }
 0x5b3   :  { %v3072_v12 = vmul.f32 %v7512_v55, %v2888_v59  ;;  %v2064_v43 = vpop.permute.xlu0 %2063  ;;  %v3236_v23 = vmax.f32 %v3172_v13, 0.0  ;;  %v3156_v52 = vadd.f32 %v7532_v38, %v3088_v32  ;;  %v2520_v53 = vsel %vm2456_vm8, %v2455_v1, %v9962_v62 }
 0x5b4   :  { %v3188_v45 = vadd.f32 %v7532_v38, %v3120_v36  ;;  %v2649_v49 = vsel %vm2586_vm9, %v2584_v24, %v2064_v43  ;;  %v9961_v36 = vld [vmem:[#allocation29_spill] sm:$0xff]  ;;  %v2585_v32 = vsel %vm2521_vm10, %v2520_v53, %v1874_v20  ;;  %v9973_v20 = vld [vmem:[#allocation423_spill] sm:$0xff] }
 0x5b5   :  { %v3140_v29 = vadd.f32 %v7532_v38, %v3072_v12  ;;  %3393 = vmatmul.msk.f32.gmra.mxu3 %vm2656_vm11, %v2649_v49  ;;  %3300 = vst.msk [vmem:[%s8505_s4 + $0x130] sm:$0xff] %vm2196_vm4, %v3236_v23  ;;  %v3220_v27 = vmax.f32 %v3156_v52, 0.0  ;;  %v2504_v59 = vsel %vm2456_vm8, %v2439_v44, %v9961_v36  ;;  %v3538_v23 = vld [vmem:[%s8501_s0 + $0x170] sm:$0xff]  ;;  %v1810_v22 = vpop.permute.xlu2 %1809 }
 0x5b6   :  { %v3252_v61 = vmax.f32 %v3188_v45, 0.0 }
 0x5b7   :  { %v3204_v39 = vmax.f32 %v3140_v29, 0.0  ;;  %3284 = vst.msk [vmem:[%s8505_s4 + $0xb0] sm:$0xff] %vm2196_vm4, %v3220_v27  ;;  %v9963_v29 = vld [vmem:[#allocation139_spill] sm:$0xff]  ;;  %v3539_v27 = vld [vmem:[%s8501_s0 + $0xb0] sm:$0xff] }
 0x5b8   :  { %3316 = vst.msk [vmem:[%s8505_s4 + $0x1b0] sm:$0xff] %vm2196_vm4, %v3252_v61  ;;  %v2163_v52 = vsel %vm2131_vm3, %v3538_v23, %v9963_v29  ;;  %v2147_v2 = vsel %vm2131_vm3, %v3539_v27, %v9964_v15 }
 0x5b9   :  { %3268 = vst.msk [vmem:[%s8505_s4 + $0x30] sm:$0xff] %vm2196_vm4, %v3204_v39  ;;  %v1842_v48 = vpop.permute.xlu1 %1841  ;;  %v2228_v25 = vsel %vm2196_vm4, %v2163_v52, %v9965_v4  ;;  %v2212_v10 = vsel %vm2196_vm4, %v2147_v2, %v9966_v19 }
 0x5ba   :  { %v2569_v49 = vsel %vm2521_vm10, %v2504_v59, %v1842_v48  ;;  %v2293_v48 = vsel %vm2261_vm5, %v2228_v25, %v9967_v18  ;;  %v2277_v60 = vsel %vm2261_vm5, %v2212_v10, %v9968_v35  ;;  %v8356_v10 = vld [vmem:[%s8504_s3] ss:$0 sm:$0xff] }
 0x5bb   :  { %v2000_v56 = vpop.permute.xlu0 %1999  ;;  %v2358_v0 = vsel %vm2326_vm6, %v2293_v48, %v9969_v14 }
 0x5bc   :  { %v2617_v30 = vsel %vm2586_vm9, %v2552_v26, %v2000_v56  ;;  %v2423_v63 = vsel %vm2391_vm7, %v2358_v0, %v9971_v11 }
 0x5bd   :  { %3361 = vmatmul.msk.f32.gmra.mxu1 %vm2656_vm11, %v2617_v30  ;;  %v2342_v30 = vsel %vm2326_vm6, %v2277_v60, %v9970_v7  ;;  %v2488_v8 = vsel %vm2456_vm8, %v2423_v63, %v9973_v20 }
 0x5be   :  { %v2987_v54 = vpop.f32.mrf.mxu2  ;;  %v2407_v50 = vsel %vm2391_vm7, %v2342_v30, %v9972_v28  ;;  %v2553_v6 = vsel %vm2521_vm10, %v2488_v8, %v1810_v22 }
 0x5bf   :  { %v3105_v17 = vmul.f32 %v7512_v55, %v2987_v54  ;;  %v2472_v34 = vsel %vm2456_vm8, %v2407_v50, %v9974_v47 }
 0x5c0   :  { %v2939_v12 = vpop.f32.mrf.mxu1  ;;  %v2537_v33 = vsel %vm2521_vm10, %v2472_v34, %v9975_v37 }
 0x5c1   :  { %v3035_v41 = vpop.f32.mrf.mxu3  ;;  %v3173_v42 = vadd.f32 %v7532_v38, %v3105_v17  ;;  %v3089_v45 = vmul.f32 %v7512_v55, %v2939_v12  ;;  %v2066_v43 = vpop.permute.xlu1 %2065 }
 0x5c2   :  { %v3121_v9 = vmul.f32 %v7512_v55, %v3035_v41  ;;  %v2891_v13 = vpop.f32.mrf.mxu0  ;;  %v2650_v31 = vsel %vm2586_vm9, %v2585_v32, %v2066_v43 }
 0x5c3   :  { %v3073_v24 = vmul.f32 %v7512_v55, %v2891_v13  ;;  %v2034_v5 = vpop.permute.xlu0 %2033  ;;  %v3237_v61 = vmax.f32 %v3173_v42, 0.0  ;;  %v3157_v57 = vadd.f32 %v7532_v38, %v3089_v45  ;;  %3394 = vmatmul.msk.f32.gmra.mxu3 %vm2656_vm11, %v2650_v31  ;;  %v8329_v31 = vld [vmem:[%s8503_s2] ss:$0 sm:$0xff] }
 0x5c4   :  { %v3189_v51 = vadd.f32 %v7532_v38, %v3121_v9  ;;  %v2634_v39 = vsel %vm2586_vm9, %v2569_v49, %v2034_v5 }
 0x5c5   :  { %v3141_v3 = vadd.f32 %v7532_v38, %v3073_v24  ;;  %3378 = vmatmul.msk.f32.gmra.mxu2 %vm2656_vm11, %v2634_v39  ;;  %3301 = vst.msk [vmem:[%s8505_s4 + $0x138] sm:$0xff] %vm2196_vm4, %v3237_v61  ;;  %v3221_v56 = vmax.f32 %v3157_v57, 0.0 }
 0x5c6   :  { %v3253_v58 = vmax.f32 %v3189_v51, 0.0 }
 0x5c7   :  { %v3205_v26 = vmax.f32 %v3141_v3, 0.0  ;;  %3285 = vst.msk [vmem:[%s8505_s4 + $0xb8] sm:$0xff] %vm2196_vm4, %v3221_v56 }
 0x5c8   :  { %3317 = vst.msk [vmem:[%s8505_s4 + $0x1b8] sm:$0xff] %vm2196_vm4, %v3253_v58 }
 0x5c9   :  { %3269 = vst.msk [vmem:[%s8505_s4 + $0x38] sm:$0xff] %vm2196_vm4, %v3205_v26  ;;  %v2002_v40 = vpop.permute.xlu1 %2001 }
 0x5ca   :  { %v2618_v54 = vsel %vm2586_vm9, %v2553_v6, %v2002_v40 }
 0x5cb   :  { %v1970_v16 = vpop.permute.xlu0 %1969  ;;  %3362 = vmatmul.msk.f32.gmra.mxu1 %vm2656_vm11, %v2618_v54 }
 0x5cc   :  { %v2602_v21 = vsel %vm2586_vm9, %v2537_v33, %v1970_v16 }
 0x5cd   :  { %3346 = vmatmul.msk.f32.gmra.mxu0 %vm2656_vm11, %v2602_v21 }
 0x5ce   :  { %v2990_v44 = vpop.f32.mrf.mxu2 }
 0x5cf   :  { %v3106_v46 = vmul.f32 %v7512_v55, %v2990_v44 }
 0x5d0   :  { %v2942_v41 = vpop.f32.mrf.mxu1 }
 0x5d1   :  { %v3038_v1 = vpop.f32.mrf.mxu3  ;;  %v3174_v36 = vadd.f32 %v7532_v38, %v3106_v46  ;;  %v3090_v62 = vmul.f32 %v7512_v55, %v2942_v41 }
 0x5d2   :  { %v3122_v17 = vmul.f32 %v7512_v55, %v3038_v1  ;;  %v2894_v59 = vpop.f32.mrf.mxu0 }
 0x5d3   :  { %v3074_v9 = vmul.f32 %v7512_v55, %v2894_v59  ;;  %v3238_v13 = vmax.f32 %v3174_v36, 0.0  ;;  %v3158_v12 = vadd.f32 %v7532_v38, %v3090_v62 }
 0x5d4   :  { %v3190_v53 = vadd.f32 %v7532_v38, %v3122_v17 }
 0x5d5   :  { %v3142_v42 = vadd.f32 %v7532_v38, %v3074_v9  ;;  %3302 = vst.msk [vmem:[%s8505_s4 + $0x140] sm:$0xff] %vm2196_vm4, %v3238_v13  ;;  %v3222_v24 = vmax.f32 %v3158_v12, 0.0 }
 0x5d6   :  { %v3254_v32 = vmax.f32 %v3190_v53, 0.0 }
 0x5d7   :  { %v3206_v45 = vmax.f32 %v3142_v42, 0.0  ;;  %3286 = vst.msk [vmem:[%s8505_s4 + $0xc0] sm:$0xff] %vm2196_vm4, %v3222_v24 }
 0x5d8   :  { %3318 = vst.msk [vmem:[%s8505_s4 + $0x1c0] sm:$0xff] %vm2196_vm4, %v3254_v32 }
 0x5d9   :  { %3270 = vst.msk [vmem:[%s8505_s4 + $0x40] sm:$0xff] %vm2196_vm4, %v3206_v45 }
 0x5de   :  { %v2993_v43 = vpop.f32.mrf.mxu2 }
 0x5df   :  { %v3107_v23 = vmul.f32 %v7512_v55, %v2993_v43 }
 0x5e0   :  { %v2945_v52 = vpop.f32.mrf.mxu1 }
 0x5e1   :  { %v3041_v29 = vpop.f32.mrf.mxu3  ;;  %v3175_v49 = vadd.f32 %v7532_v38, %v3107_v23  ;;  %v3091_v61 = vmul.f32 %v8329_v31, %v2945_v52 }
 0x5e2   :  { %v3123_v51 = vmul.f32 %v7512_v55, %v3041_v29  ;;  %v2897_v5 = vpop.f32.mrf.mxu0 }
 0x5e3   :  { %v3075_v3 = vmul.f32 %v8329_v31, %v2897_v5  ;;  %v3239_v57 = vmax.f32 %v3175_v49, 0.0  ;;  %v3159_v27 = vadd.f32 %v7532_v38, %v3091_v61 }
 0x5e4   :  { %v3191_v39 = vadd.f32 %v7532_v38, %v3123_v51 }
 0x5e5   :  { %v3143_v15 = vadd.f32 %v7532_v38, %v3075_v3  ;;  %3303 = vst.msk [vmem:[%s8505_s4 + $0x148] sm:$0xff] %vm2196_vm4, %v3239_v57  ;;  %v3223_v2 = vmax.f32 %v3159_v27, 0.0 }
 0x5e6   :  { %v3255_v55 = vmax.f32 %v3191_v39, 0.0 }
 0x5e7   :  { %v3207_v4 = vmax.f32 %v3143_v15, 0.0  ;;  %3287 = vst.msk [vmem:[%s8505_s4 + $0xc8] sm:$0xff] %vm2196_vm4, %v3223_v2 }
 0x5e8   :  { %3319 = vst.msk [vmem:[%s8505_s4 + $0x1c8] sm:$0xff] %vm2196_vm4, %v3255_v55 }
 0x5e9   :  { %3271 = vst.msk [vmem:[%s8505_s4 + $0x48] sm:$0xff] %vm2196_vm4, %v3207_v4 }
 0x5ee   :  { %v2996_v38 = vpop.f32.mrf.mxu2 }
 0x5ef   :  { %v3108_v25 = vmul.f32 %v8329_v31, %v2996_v38 }
 0x5f0   :  { %v2948_v19 = vpop.f32.mrf.mxu1 }
 0x5f1   :  { %v3044_v58 = vpop.f32.mrf.mxu3  ;;  %v3176_v18 = vadd.f32 %v8356_v10, %v3108_v25  ;;  %v3092_v56 = vmul.f32 %v8329_v31, %v2948_v19 }
 0x5f2   :  { %v3124_v48 = vmul.f32 %v8329_v31, %v3044_v58  ;;  %v2900_v26 = vpop.f32.mrf.mxu0 }
 0x5f3   :  { %v3076_v35 = vmul.f32 %v8329_v31, %v2900_v26  ;;  %v3240_v60 = vmax.f32 %v3176_v18, 0.0  ;;  %v3160_v0 = vadd.f32 %v8356_v10, %v3092_v56 }
 0x5f4   :  { %v3192_v14 = vadd.f32 %v8356_v10, %v3124_v48 }
 0x5f5   :  { %v3144_v22 = vadd.f32 %v8356_v10, %v3076_v35  ;;  %3304 = vst.msk [vmem:[%s8505_s4 + $0x150] sm:$0xff] %vm2196_vm4, %v3240_v60  ;;  %v3224_v30 = vmax.f32 %v3160_v0, 0.0 }
 0x5f6   :  { %v3256_v7 = vmax.f32 %v3192_v14, 0.0 }
 0x5f7   :  { %v3208_v11 = vmax.f32 %v3144_v22, 0.0  ;;  %3288 = vst.msk [vmem:[%s8505_s4 + $0xd0] sm:$0xff] %vm2196_vm4, %v3224_v30 }
 0x5f8   :  { %3320 = vst.msk [vmem:[%s8505_s4 + $0x1d0] sm:$0xff] %vm2196_vm4, %v3256_v7 }
 0x5f9   :  { %3272 = vst.msk [vmem:[%s8505_s4 + $0x50] sm:$0xff] %vm2196_vm4, %v3208_v11 }
 0x5fe   :  { %v2999_v63 = vpop.f32.mrf.mxu2 }
 0x5ff   :  { %v3109_v28 = vmul.f32 %v8329_v31, %v2999_v63 }
 0x600   :  { %v2951_v20 = vpop.f32.mrf.mxu1 }
 0x601   :  { %v3047_v50 = vpop.f32.mrf.mxu3  ;;  %v3177_v8 = vadd.f32 %v8356_v10, %v3109_v28  ;;  %v3093_v6 = vmul.f32 %v8329_v31, %v2951_v20 }
 0x602   :  { %v3125_v47 = vmul.f32 %v8329_v31, %v3047_v50  ;;  %v2903_v34 = vpop.f32.mrf.mxu0 }
 0x603   :  { %v3077_v40 = vmul.f32 %v8329_v31, %v2903_v34  ;;  %v3241_v37 = vmax.f32 %v3177_v8, 0.0  ;;  %v3161_v16 = vadd.f32 %v8356_v10, %v3093_v6 }
 0x604   :  { %v3193_v33 = vadd.f32 %v8356_v10, %v3125_v47 }
 0x605   :  { %v3145_v54 = vadd.f32 %v8356_v10, %v3077_v40  ;;  %3305 = vst.msk [vmem:[%s8505_s4 + $0x158] sm:$0xff] %vm2196_vm4, %v3241_v37  ;;  %v3225_v44 = vmax.f32 %v3161_v16, 0.0 }
 0x606   :  { %v3257_v21 = vmax.f32 %v3193_v33, 0.0 }
 0x607   :  { %v3209_v46 = vmax.f32 %v3145_v54, 0.0  ;;  %3289 = vst.msk [vmem:[%s8505_s4 + $0xd8] sm:$0xff] %vm2196_vm4, %v3225_v44 }
 0x608   :  { %3321 = vst.msk [vmem:[%s8505_s4 + $0x1d8] sm:$0xff] %vm2196_vm4, %v3257_v21 }
 0x609   :  { %3273 = vst.msk [vmem:[%s8505_s4 + $0x58] sm:$0xff] %vm2196_vm4, %v3209_v46 }
 0x60e   :  { %v3002_v1 = vpop.f32.mrf.mxu2 }
 0x60f   :  { %v3110_v17 = vmul.f32 %v8329_v31, %v3002_v1 }
 0x610   :  { %v2954_v36 = vpop.f32.mrf.mxu1 }
 0x611   :  { %v3050_v41 = vpop.f32.mrf.mxu3  ;;  %v3178_v59 = vadd.f32 %v8356_v10, %v3110_v17  ;;  %v3094_v9 = vmul.f32 %v8329_v31, %v2954_v36 }
 0x612   :  { %v3126_v62 = vmul.f32 %v8329_v31, %v3050_v41  ;;  %v2906_v53 = vpop.f32.mrf.mxu0 }
 0x613   :  { %v3078_v13 = vmul.f32 %v8329_v31, %v2906_v53  ;;  %v3242_v12 = vmax.f32 %v3178_v59, 0.0  ;;  %v3162_v42 = vadd.f32 %v8356_v10, %v3094_v9 }
 0x614   :  { %v3194_v32 = vadd.f32 %v8356_v10, %v3126_v62 }
 0x615   :  { %v3146_v24 = vadd.f32 %v8356_v10, %v3078_v13  ;;  %3306 = vst.msk [vmem:[%s8505_s4 + $0x160] sm:$0xff] %vm2196_vm4, %v3242_v12  ;;  %v3226_v43 = vmax.f32 %v3162_v42, 0.0 }
 0x616   :  { %v3258_v45 = vmax.f32 %v3194_v32, 0.0 }
 0x617   :  { %v3210_v23 = vmax.f32 %v3146_v24, 0.0  ;;  %3290 = vst.msk [vmem:[%s8505_s4 + $0xe0] sm:$0xff] %vm2196_vm4, %v3226_v43 }
 0x618   :  { %3322 = vst.msk [vmem:[%s8505_s4 + $0x1e0] sm:$0xff] %vm2196_vm4, %v3258_v45 }
 0x619   :  { %3274 = vst.msk [vmem:[%s8505_s4 + $0x60] sm:$0xff] %vm2196_vm4, %v3210_v23 }
 0x61e   :  { %v3005_v29 = vpop.f32.mrf.mxu2 }
 0x61f   :  { %v3111_v52 = vmul.f32 %v8329_v31, %v3005_v29 }
 0x620   :  { %v2909_v51 = vpop.f32.mrf.mxu0 }
 0x621   :  { %v3053_v49 = vpop.f32.mrf.mxu3  ;;  %v3179_v5 = vadd.f32 %v8356_v10, %v3111_v52  ;;  %v3079_v3 = vmul.f32 %v8329_v31, %v2909_v51 }
 0x622   :  { %v3127_v61 = vmul.f32 %v8329_v31, %v3053_v49 }
 0x623   :  { %v2957_v57 = vpop.f32.mrf.mxu1  ;;  %v3243_v39 = vmax.f32 %v3179_v5, 0.0  ;;  %v3147_v15 = vadd.f32 %v8356_v10, %v3079_v3 }
 0x624   :  { %v3195_v27 = vadd.f32 %v8356_v10, %v3127_v61  ;;  %v3095_v55 = vmul.f32 %v8329_v31, %v2957_v57 }
 0x625   :  { %3307 = vst.msk [vmem:[%s8505_s4 + $0x168] sm:$0xff] %vm2196_vm4, %v3243_v39  ;;  %v3211_v4 = vmax.f32 %v3147_v15, 0.0 }
 0x626   :  { %v3259_v2 = vmax.f32 %v3195_v27, 0.0  ;;  %v3163_v38 = vadd.f32 %v8356_v10, %v3095_v55 }
 0x627   :  { %3275 = vst.msk [vmem:[%s8505_s4 + $0x68] sm:$0xff] %vm2196_vm4, %v3211_v4 }
 0x628   :  { %3323 = vst.msk [vmem:[%s8505_s4 + $0x1e8] sm:$0xff] %vm2196_vm4, %v3259_v2  ;;  %v3227_v25 = vmax.f32 %v3163_v38, 0.0  ;;  %v2912_v58 = vpop.f32.mrf.mxu0 }
 0x629   :  { %v3080_v19 = vmul.f32 %v8329_v31, %v2912_v58 }
 0x62a   :  { %3291 = vst.msk [vmem:[%s8505_s4 + $0xe8] sm:$0xff] %vm2196_vm4, %v3227_v25 }
 0x62b   :  { %v3148_v18 = vadd.f32 %v8356_v10, %v3080_v19 }
 0x62d   :  { %v3212_v48 = vmax.f32 %v3148_v18, 0.0 }
 0x62f   :  { %3276 = vst.msk [vmem:[%s8505_s4 + $0x70] sm:$0xff] %vm2196_vm4, %v3212_v48 }
 0x631   :  { %v3008_v26 = vpop.f32.mrf.mxu2 }
 0x632   :  { %v3112_v56 = vmul.f32 %v8329_v31, %v3008_v26 }
 0x634   :  { %v3180_v35 = vadd.f32 %v8356_v10, %v3112_v56 }
 0x636   :  { %v3244_v60 = vmax.f32 %v3180_v35, 0.0 }
 0x638   :  { %3308 = vst.msk [vmem:[%s8505_s4 + $0x170] sm:$0xff] %vm2196_vm4, %v3244_v60  ;;  %v3056_v14 = vpop.f32.mrf.mxu3 }
 0x639   :  { %v3128_v0 = vmul.f32 %v8329_v31, %v3056_v14 }
 0x63a   :  { %v2960_v22 = vpop.f32.mrf.mxu1 }
 0x63b   :  { %v3196_v7 = vadd.f32 %v8356_v10, %v3128_v0  ;;  %v3096_v30 = vmul.f32 %v8329_v31, %v2960_v22 }
 0x63d   :  { %v3260_v11 = vmax.f32 %v3196_v7, 0.0  ;;  %v3164_v63 = vadd.f32 %v8356_v10, %v3096_v30 }
 0x63f   :  { %3324 = vst.msk [vmem:[%s8505_s4 + $0x1f0] sm:$0xff] %vm2196_vm4, %v3260_v11  ;;  %v3228_v28 = vmax.f32 %v3164_v63, 0.0 }
 0x641   :  { %3292 = vst.msk [vmem:[%s8505_s4 + $0xf0] sm:$0xff] %vm2196_vm4, %v3228_v28 }
 0x646   :  { %v3059_v50 = vpop.f32.mrf.mxu3 }
 0x647   :  { %v3129_v8 = vmul.f32 %v8329_v31, %v3059_v50 }
 0x648   :  { %v3011_v20 = vpop.f32.mrf.mxu2  ;;  %v2963_v34 = vpop.f32.mrf.mxu1 }
 0x649   :  { %v3113_v47 = vmul.f32 %v8329_v31, %v3011_v20  ;;  %v3197_v6 = vadd.f32 %v8356_v10, %v3129_v8  ;;  %v3097_v37 = vmul.f32 %v8329_v31, %v2963_v34 }
 0x64a   :  { %v2915_v40 = vpop.f32.mrf.mxu0 }
 0x64b   :  { %v3181_v33 = vadd.f32 %v8356_v10, %v3113_v47  ;;  %v3081_v16 = vmul.f32 %v8329_v31, %v2915_v40  ;;  %v3261_v54 = vmax.f32 %v3197_v6, 0.0  ;;  %v3165_v21 = vadd.f32 %v8356_v10, %v3097_v37 }
 0x64d   :  { %v3245_v44 = vmax.f32 %v3181_v33, 0.0  ;;  %v3149_v46 = vadd.f32 %v8356_v10, %v3081_v16  ;;  %3325 = vst.msk [vmem:[%s8505_s4 + $0x1f8] sm:$0xff] %vm2196_vm4, %v3261_v54  ;;  %v3229_v1 = vmax.f32 %v3165_v21, 0.0 }
 0x64f   :  { %3309 = vst.msk [vmem:[%s8505_s4 + $0x178] sm:$0xff] %vm2196_vm4, %v3245_v44  ;;  %v3213_v17 = vmax.f32 %v3149_v46, 0.0 }
 0x650   :  { %3293 = vst.msk [vmem:[%s8505_s4 + $0xf8] sm:$0xff] %vm2196_vm4, %v3229_v1 }
 0x651   :  { %3277 = vst.msk [vmem:[%s8505_s4 + $0x78] sm:$0xff] %vm2196_vm4, %v3213_v17 }

</bundles_post_ra>
